<compile_context>
chip_gen: v6e
topology: v6e:2x2x1
jax: 0.10.0
libtpu: 0.0.40
codegen_flags: <defaults>
</compile_context>

<pallas_src>
import functools

import jax
import jax.numpy as jnp
from jax import lax
from jax.experimental import pallas as pl
from jax.experimental.pallas import tpu as pltpu

EPS = 1e-5
LANE = 128

# nn.Sequential ordering of the PyTorch module (both encoder and decoder stacks):
#   layer 0: Linear -> ReLU -> BN ; layers 1-3: Linear -> BN -> ReLU ; layer 4: Linear
STACK_MODES = ("relu_bn", "bn_relu", "bn_relu", "bn_relu", "linear")
ENC_IDX = 4  # encoder output is produced after layer index 4


def _round_up(n, m=LANE):
    return ((n + m - 1) // m) * m


def _batchnorm(y):
    # Training-mode BatchNorm1d with gamma=1, beta=0 (fresh module); centered variance, f32.
    inv_b = 1.0 / y.shape[0]
    mean = jnp.sum(y, axis=0, keepdims=True) * inv_b
    d = y - mean
    var = jnp.sum(d * d, axis=0, keepdims=True) * inv_b  # biased variance
    return d * lax.rsqrt(var + EPS)


def _apply_layer(h_bf16, w_bf16, b_f32, mode):
    # bf16 MXU operands, f32 accumulation; all elementwise/statistics math in f32.
    y = jnp.dot(h_bf16, w_bf16, preferred_element_type=jnp.float32) + b_f32
    if mode == "relu_bn":      # Linear -> ReLU -> BatchNorm1d
        y = _batchnorm(jnp.maximum(y, 0.0))
    elif mode == "bn_relu":    # Linear -> BatchNorm1d -> ReLU
        y = jnp.maximum(_batchnorm(y), 0.0)
    # mode == 'linear': plain Linear
    return y                   # f32


def _make_fused_kernel(modes, enc_idx):
    n = len(modes)

    def kernel(*refs):
        x_ref = refs[0]
        w_refs = refs[1:1 + n]
        b_refs = refs[1 + n:1 + 2 * n]
        enc_ref = refs[1 + 2 * n]
        dec_ref = refs[2 + 2 * n]

        h = x_ref[...]  # bf16 activation, stays in VMEM/vregs across all 10 layers
        y = None
        for li, mode in enumerate(modes):
            y = _apply_layer(h, w_refs[li][...], b_refs[li][...], mode)
            if li == enc_idx:
                enc_ref[...] = y.astype(enc_ref.dtype)
            if li + 1 < n:
                h = y.astype(jnp.bfloat16)  # bf16 inter-layer carry
        dec_ref[...] = y.astype(dec_ref.dtype)

    return kernel


@functools.partial(jax.jit, static_argnames=("modes", "enc_idx"))
def fused_forward(x_pad, weights, biases, *, modes, enc_idx):
    B = x_pad.shape[0]
    nz_pad = weights[enc_idx].shape[1]
    nin_pad = weights[-1].shape[1]
    kernel = _make_fused_kernel(modes, enc_idx)

    # Full-array, single-buffered VMEM residency: no grid -> no pipeline double-buffers.
    vmem = pl.BlockSpec(memory_space=pltpu.MemorySpace.VMEM)
    n_inputs = 1 + 2 * len(weights)

    return pl.pallas_call(
        kernel,
        out_shape=(jax.ShapeDtypeStruct((B, nz_pad), jnp.float32),
                   jax.ShapeDtypeStruct((B, nin_pad), jnp.float32)),
        in_specs=[vmem] * n_inputs,
        out_specs=(vmem, vmem),
        compiler_params=pltpu.CompilerParams(
            vmem_limit_bytes=48 * 1024 * 1024),  # <= v7x 64 MiB budget
    )(x_pad, *weights, *biases)


# ---------------------------------------------------------------------------
# Parameter construction (deterministic, mimicking the shapes of __init__).
# Weights are pre-transposed to (in, out), zero-padded to lane multiples, bf16.
# ---------------------------------------------------------------------------
def _init_linear(key, din, dout, din_p, dout_p):
    kw, kb = jax.random.split(key)
    bound = 1.0 / (din ** 0.5)
    w = jax.random.uniform(kw, (din, dout), jnp.float32, -bound, bound)
    b = jax.random.uniform(kb, (dout,), jnp.float32, -bound, bound)
    w_pad = jnp.zeros((din_p, dout_p), jnp.float32).at[:din, :dout].set(w)
    b_pad = jnp.zeros((1, dout_p), jnp.float32).at[0, :dout].set(b)
    return w_pad.astype(jnp.bfloat16), b_pad


def init_fc_autoencoder(key, n_input, nz, n_hidden=512):
    nin_p, nz_p, nh_p = _round_up(n_input), _round_up(nz), _round_up(n_hidden)
    dims = ([(n_input, n_hidden, nin_p, nh_p)]
            + [(n_hidden, n_hidden, nh_p, nh_p)] * 3
            + [(n_hidden, nz, nh_p, nz_p)]
            + [(nz, n_hidden, nz_p, nh_p)]
            + [(n_hidden, n_hidden, nh_p, nh_p)] * 3
            + [(n_hidden, n_input, nh_p, nin_p)])
    keys = jax.random.split(key, len(dims))
    weights, biases = [], []
    for (din, dout, dp, op), k in zip(dims, keys):
        w, b = _init_linear(k, din, dout, dp, op)
        weights.append(w)
        biases.append(b)
    return tuple(weights), tuple(biases), nin_p, nz_p


def fc_autoencoder_forward(x, weights, biases, n_input, nz):
    B = x.shape[0]
    nin_p = weights[0].shape[0]
    # Input passed as bf16 (first matmul consumes bf16 anyway) -> halves input DMA bytes.
    x_pad = jnp.zeros((B, nin_p), jnp.bfloat16).at[:, :n_input].set(
        x.astype(jnp.bfloat16))
    enc_pad, dec_pad = fused_forward(
        x_pad, weights, biases,
        modes=STACK_MODES + STACK_MODES, enc_idx=ENC_IDX)
    return enc_pad[:, :nz], dec_pad[:, :n_input]


# Pure-JAX reference with identical numerics (bf16 operands/carry, f32 accumulation).
def _reference_forward(x_pad_bf16, weights, biases, modes, enc_idx):
    h = x_pad_bf16
    enc = None
    y = None
    n = len(modes)
    for li, (w, b, mode) in enumerate(zip(weights, biases, modes)):
        y = _apply_layer(h, w, b, mode)
        if li == enc_idx:
            enc = y
        if li + 1 < n:
            h = y.astype(jnp.bfloat16)
    return enc, y


if __name__ == "__main__":
    # Small, deterministic shapes consistent with the module's forward (batch, features).
    # B=128 fills the v5e MXU row dimension and amortizes the fixed weight DMA.
    batch, n_input, nz, n_hidden = 128, 64, 16, 128

    key = jax.random.PRNGKey(0)
    k_params, k_x = jax.random.split(key)
    weights, biases, nin_p, nz_p = init_fc_autoencoder(k_params, n_input, nz, n_hidden)
    x = jax.random.normal(k_x, (batch, n_input), jnp.float32)

    encoding, decoding = fc_autoencoder_forward(x, weights, biases, n_input, nz)
    jax.block_until_ready((encoding, decoding))

    x_pad = jnp.zeros((batch, nin_p), jnp.bfloat16).at[:, :n_input].set(
        x.astype(jnp.bfloat16))
    enc_ref_p, dec_ref_p = _reference_forward(
        x_pad, weights, biases, STACK_MODES + STACK_MODES, ENC_IDX)
    enc_ref = enc_ref_p[:, :nz]
    dec_ref = dec_ref_p[:, :n_input]

    assert encoding.shape == (batch, nz) and decoding.shape == (batch, n_input)
    assert jnp.allclose(encoding, enc_ref, atol=2e-2, rtol=2e-2)
    assert jnp.allclose(decoding, dec_ref, atol=2e-2, rtol=2e-2)

    print("KERNEL_OK")
</pallas_src>

<mosaic_0001>
module attributes {stable_mosaic.version = 11 : i64} {
  func.func @kernel(%arg0: memref<128x128xbf16, #tpu.memory_space<vmem>>, %arg1: memref<128x128xbf16, #tpu.memory_space<vmem>>, %arg2: memref<128x128xbf16, #tpu.memory_space<vmem>>, %arg3: memref<128x128xbf16, #tpu.memory_space<vmem>>, %arg4: memref<128x128xbf16, #tpu.memory_space<vmem>>, %arg5: memref<128x128xbf16, #tpu.memory_space<vmem>>, %arg6: memref<128x128xbf16, #tpu.memory_space<vmem>>, %arg7: memref<128x128xbf16, #tpu.memory_space<vmem>>, %arg8: memref<128x128xbf16, #tpu.memory_space<vmem>>, %arg9: memref<128x128xbf16, #tpu.memory_space<vmem>>, %arg10: memref<128x128xbf16, #tpu.memory_space<vmem>>, %arg11: memref<1x128xf32, #tpu.memory_space<vmem>>, %arg12: memref<1x128xf32, #tpu.memory_space<vmem>>, %arg13: memref<1x128xf32, #tpu.memory_space<vmem>>, %arg14: memref<1x128xf32, #tpu.memory_space<vmem>>, %arg15: memref<1x128xf32, #tpu.memory_space<vmem>>, %arg16: memref<1x128xf32, #tpu.memory_space<vmem>>, %arg17: memref<1x128xf32, #tpu.memory_space<vmem>>, %arg18: memref<1x128xf32, #tpu.memory_space<vmem>>, %arg19: memref<1x128xf32, #tpu.memory_space<vmem>>, %arg20: memref<1x128xf32, #tpu.memory_space<vmem>>, %arg21: memref<128x128xf32, #tpu.memory_space<vmem>>, %arg22: memref<128x128xf32, #tpu.memory_space<vmem>>) attributes {dimension_semantics = [], scalar_prefetch = 0 : i64, scratch_operands = 0 : i64, tpu.core_type = #tpu.core_type<tc>} {
    %c0 = arith.constant 0 : index
    %c0_0 = arith.constant 0 : index
    %0 = vector.load %arg0[%c0, %c0_0] : memref<128x128xbf16, #tpu.memory_space<vmem>>, vector<128x128xbf16>
    %c0_1 = arith.constant 0 : index
    %c0_2 = arith.constant 0 : index
    %1 = vector.load %arg1[%c0_1, %c0_2] : memref<128x128xbf16, #tpu.memory_space<vmem>>, vector<128x128xbf16>
    %c0_3 = arith.constant 0 : index
    %c0_4 = arith.constant 0 : index
    %2 = vector.load %arg11[%c0_3, %c0_4] : memref<1x128xf32, #tpu.memory_space<vmem>>, vector<1x128xf32>
    %cst = arith.constant dense<0.000000e+00> : vector<128x128xf32>
    %3 = tpu.matmul %0, %1, %cst {dimension_numbers = #tpu.dot_dimension_numbers<[1], [0], [0], [1], [0, 0, 1, 1], [], []>} : vector<128x128xbf16>, vector<128x128xbf16>, vector<128x128xf32> -> vector<128x128xf32>
    %4 = vector.broadcast %2 : vector<1x128xf32> to vector<128x128xf32>
    %5 = arith.addf %3, %4 : vector<128x128xf32>
    %cst_5 = arith.constant 0.000000e+00 : f32
    %6 = vector.broadcast %cst_5 : f32 to vector<128x128xf32>
    %7 = arith.maximumf %5, %6 : vector<128x128xf32>
    %cst_6 = arith.constant dense<0.000000e+00> : vector<128xf32>
    %8 = vector.multi_reduction <add>, %7, %cst_6 [0] : vector<128x128xf32> to vector<128xf32>
    %9 = vector.shape_cast %8 : vector<128xf32> to vector<1x128xf32>
    %cst_7 = arith.constant 7.812500e-03 : f32
    %10 = vector.broadcast %cst_7 : f32 to vector<1x128xf32>
    %11 = arith.mulf %9, %10 : vector<1x128xf32>
    %12 = vector.broadcast %11 : vector<1x128xf32> to vector<128x128xf32>
    %13 = arith.subf %7, %12 : vector<128x128xf32>
    %14 = arith.mulf %13, %13 : vector<128x128xf32>
    %cst_8 = arith.constant dense<0.000000e+00> : vector<128xf32>
    %15 = vector.multi_reduction <add>, %14, %cst_8 [0] : vector<128x128xf32> to vector<128xf32>
    %16 = vector.shape_cast %15 : vector<128xf32> to vector<1x128xf32>
    %cst_9 = arith.constant 7.812500e-03 : f32
    %17 = vector.broadcast %cst_9 : f32 to vector<1x128xf32>
    %18 = arith.mulf %16, %17 : vector<1x128xf32>
    %cst_10 = arith.constant 9.99999974E-6 : f32
    %19 = vector.broadcast %cst_10 : f32 to vector<1x128xf32>
    %20 = arith.addf %18, %19 : vector<1x128xf32>
    %21 = math.rsqrt %20 : vector<1x128xf32>
    %22 = vector.broadcast %21 : vector<1x128xf32> to vector<128x128xf32>
    %23 = arith.mulf %13, %22 : vector<128x128xf32>
    %24 = arith.truncf %23 : vector<128x128xf32> to vector<128x128xbf16>
    %c0_11 = arith.constant 0 : index
    %c0_12 = arith.constant 0 : index
    %25 = vector.load %arg2[%c0_11, %c0_12] : memref<128x128xbf16, #tpu.memory_space<vmem>>, vector<128x128xbf16>
    %c0_13 = arith.constant 0 : index
    %c0_14 = arith.constant 0 : index
    %26 = vector.load %arg12[%c0_13, %c0_14] : memref<1x128xf32, #tpu.memory_space<vmem>>, vector<1x128xf32>
    %cst_15 = arith.constant dense<0.000000e+00> : vector<128x128xf32>
    %27 = tpu.matmul %24, %25, %cst_15 {dimension_numbers = #tpu.dot_dimension_numbers<[1], [0], [0], [1], [0, 0, 1, 1], [], []>} : vector<128x128xbf16>, vector<128x128xbf16>, vector<128x128xf32> -> vector<128x128xf32>
    %28 = vector.broadcast %26 : vector<1x128xf32> to vector<128x128xf32>
    %29 = arith.addf %27, %28 : vector<128x128xf32>
    %cst_16 = arith.constant dense<0.000000e+00> : vector<128xf32>
    %30 = vector.multi_reduction <add>, %29, %cst_16 [0] : vector<128x128xf32> to vector<128xf32>
    %31 = vector.shape_cast %30 : vector<128xf32> to vector<1x128xf32>
    %cst_17 = arith.constant 7.812500e-03 : f32
    %32 = vector.broadcast %cst_17 : f32 to vector<1x128xf32>
    %33 = arith.mulf %31, %32 : vector<1x128xf32>
    %34 = vector.broadcast %33 : vector<1x128xf32> to vector<128x128xf32>
    %35 = arith.subf %29, %34 : vector<128x128xf32>
    %36 = arith.mulf %35, %35 : vector<128x128xf32>
    %cst_18 = arith.constant dense<0.000000e+00> : vector<128xf32>
    %37 = vector.multi_reduction <add>, %36, %cst_18 [0] : vector<128x128xf32> to vector<128xf32>
    %38 = vector.shape_cast %37 : vector<128xf32> to vector<1x128xf32>
    %cst_19 = arith.constant 7.812500e-03 : f32
    %39 = vector.broadcast %cst_19 : f32 to vector<1x128xf32>
    %40 = arith.mulf %38, %39 : vector<1x128xf32>
    %cst_20 = arith.constant 9.99999974E-6 : f32
    %41 = vector.broadcast %cst_20 : f32 to vector<1x128xf32>
    %42 = arith.addf %40, %41 : vector<1x128xf32>
    %43 = math.rsqrt %42 : vector<1x128xf32>
    %44 = vector.broadcast %43 : vector<1x128xf32> to vector<128x128xf32>
    %45 = arith.mulf %35, %44 : vector<128x128xf32>
    %cst_21 = arith.constant 0.000000e+00 : f32
    %46 = vector.broadcast %cst_21 : f32 to vector<128x128xf32>
    %47 = arith.maximumf %45, %46 : vector<128x128xf32>
    %48 = arith.truncf %47 : vector<128x128xf32> to vector<128x128xbf16>
    %c0_22 = arith.constant 0 : index
    %c0_23 = arith.constant 0 : index
    %49 = vector.load %arg3[%c0_22, %c0_23] : memref<128x128xbf16, #tpu.memory_space<vmem>>, vector<128x128xbf16>
    %c0_24 = arith.constant 0 : index
    %c0_25 = arith.constant 0 : index
    %50 = vector.load %arg13[%c0_24, %c0_25] : memref<1x128xf32, #tpu.memory_space<vmem>>, vector<1x128xf32>
    %cst_26 = arith.constant dense<0.000000e+00> : vector<128x128xf32>
    %51 = tpu.matmul %48, %49, %cst_26 {dimension_numbers = #tpu.dot_dimension_numbers<[1], [0], [0], [1], [0, 0, 1, 1], [], []>} : vector<128x128xbf16>, vector<128x128xbf16>, vector<128x128xf32> -> vector<128x128xf32>
    %52 = vector.broadcast %50 : vector<1x128xf32> to vector<128x128xf32>
    %53 = arith.addf %51, %52 : vector<128x128xf32>
    %cst_27 = arith.constant dense<0.000000e+00> : vector<128xf32>
    %54 = vector.multi_reduction <add>, %53, %cst_27 [0] : vector<128x128xf32> to vector<128xf32>
    %55 = vector.shape_cast %54 : vector<128xf32> to vector<1x128xf32>
    %cst_28 = arith.constant 7.812500e-03 : f32
    %56 = vector.broadcast %cst_28 : f32 to vector<1x128xf32>
    %57 = arith.mulf %55, %56 : vector<1x128xf32>
    %58 = vector.broadcast %57 : vector<1x128xf32> to vector<128x128xf32>
    %59 = arith.subf %53, %58 : vector<128x128xf32>
    %60 = arith.mulf %59, %59 : vector<128x128xf32>
    %cst_29 = arith.constant dense<0.000000e+00> : vector<128xf32>
    %61 = vector.multi_reduction <add>, %60, %cst_29 [0] : vector<128x128xf32> to vector<128xf32>
    %62 = vector.shape_cast %61 : vector<128xf32> to vector<1x128xf32>
    %cst_30 = arith.constant 7.812500e-03 : f32
    %63 = vector.broadcast %cst_30 : f32 to vector<1x128xf32>
    %64 = arith.mulf %62, %63 : vector<1x128xf32>
    %cst_31 = arith.constant 9.99999974E-6 : f32
    %65 = vector.broadcast %cst_31 : f32 to vector<1x128xf32>
    %66 = arith.addf %64, %65 : vector<1x128xf32>
    %67 = math.rsqrt %66 : vector<1x128xf32>
    %68 = vector.broadcast %67 : vector<1x128xf32> to vector<128x128xf32>
    %69 = arith.mulf %59, %68 : vector<128x128xf32>
    %cst_32 = arith.constant 0.000000e+00 : f32
    %70 = vector.broadcast %cst_32 : f32 to vector<128x128xf32>
    %71 = arith.maximumf %69, %70 : vector<128x128xf32>
    %72 = arith.truncf %71 : vector<128x128xf32> to vector<128x128xbf16>
    %c0_33 = arith.constant 0 : index
    %c0_34 = arith.constant 0 : index
    %73 = vector.load %arg4[%c0_33, %c0_34] : memref<128x128xbf16, #tpu.memory_space<vmem>>, vector<128x128xbf16>
    %c0_35 = arith.constant 0 : index
    %c0_36 = arith.constant 0 : index
    %74 = vector.load %arg14[%c0_35, %c0_36] : memref<1x128xf32, #tpu.memory_space<vmem>>, vector<1x128xf32>
    %cst_37 = arith.constant dense<0.000000e+00> : vector<128x128xf32>
    %75 = tpu.matmul %72, %73, %cst_37 {dimension_numbers = #tpu.dot_dimension_numbers<[1], [0], [0], [1], [0, 0, 1, 1], [], []>} : vector<128x128xbf16>, vector<128x128xbf16>, vector<128x128xf32> -> vector<128x128xf32>
    %76 = vector.broadcast %74 : vector<1x128xf32> to vector<128x128xf32>
    %77 = arith.addf %75, %76 : vector<128x128xf32>
    %cst_38 = arith.constant dense<0.000000e+00> : vector<128xf32>
    %78 = vector.multi_reduction <add>, %77, %cst_38 [0] : vector<128x128xf32> to vector<128xf32>
    %79 = vector.shape_cast %78 : vector<128xf32> to vector<1x128xf32>
    %cst_39 = arith.constant 7.812500e-03 : f32
    %80 = vector.broadcast %cst_39 : f32 to vector<1x128xf32>
    %81 = arith.mulf %79, %80 : vector<1x128xf32>
    %82 = vector.broadcast %81 : vector<1x128xf32> to vector<128x128xf32>
    %83 = arith.subf %77, %82 : vector<128x128xf32>
    %84 = arith.mulf %83, %83 : vector<128x128xf32>
    %cst_40 = arith.constant dense<0.000000e+00> : vector<128xf32>
    %85 = vector.multi_reduction <add>, %84, %cst_40 [0] : vector<128x128xf32> to vector<128xf32>
    %86 = vector.shape_cast %85 : vector<128xf32> to vector<1x128xf32>
    %cst_41 = arith.constant 7.812500e-03 : f32
    %87 = vector.broadcast %cst_41 : f32 to vector<1x128xf32>
    %88 = arith.mulf %86, %87 : vector<1x128xf32>
    %cst_42 = arith.constant 9.99999974E-6 : f32
    %89 = vector.broadcast %cst_42 : f32 to vector<1x128xf32>
    %90 = arith.addf %88, %89 : vector<1x128xf32>
    %91 = math.rsqrt %90 : vector<1x128xf32>
    %92 = vector.broadcast %91 : vector<1x128xf32> to vector<128x128xf32>
    %93 = arith.mulf %83, %92 : vector<128x128xf32>
    %cst_43 = arith.constant 0.000000e+00 : f32
    %94 = vector.broadcast %cst_43 : f32 to vector<128x128xf32>
    %95 = arith.maximumf %93, %94 : vector<128x128xf32>
    %96 = arith.truncf %95 : vector<128x128xf32> to vector<128x128xbf16>
    %c0_44 = arith.constant 0 : index
    %c0_45 = arith.constant 0 : index
    %97 = vector.load %arg5[%c0_44, %c0_45] : memref<128x128xbf16, #tpu.memory_space<vmem>>, vector<128x128xbf16>
    %c0_46 = arith.constant 0 : index
    %c0_47 = arith.constant 0 : index
    %98 = vector.load %arg15[%c0_46, %c0_47] : memref<1x128xf32, #tpu.memory_space<vmem>>, vector<1x128xf32>
    %cst_48 = arith.constant dense<0.000000e+00> : vector<128x128xf32>
    %99 = tpu.matmul %96, %97, %cst_48 {dimension_numbers = #tpu.dot_dimension_numbers<[1], [0], [0], [1], [0, 0, 1, 1], [], []>} : vector<128x128xbf16>, vector<128x128xbf16>, vector<128x128xf32> -> vector<128x128xf32>
    %100 = vector.broadcast %98 : vector<1x128xf32> to vector<128x128xf32>
    %101 = arith.addf %99, %100 : vector<128x128xf32>
    %c0_49 = arith.constant 0 : index
    %c0_50 = arith.constant 0 : index
    %102 = vector.load %arg21[%c0_49, %c0_50] : memref<128x128xf32, #tpu.memory_space<vmem>>, vector<128x128xf32>
    tpu.vector_store %arg21[%c0_49, %c0_50], %101 {strides = array<i32>} : memref<128x128xf32, #tpu.memory_space<vmem>>, vector<128x128xf32>,
    %103 = arith.truncf %101 : vector<128x128xf32> to vector<128x128xbf16>
    %c0_51 = arith.constant 0 : index
    %c0_52 = arith.constant 0 : index
    %104 = vector.load %arg6[%c0_51, %c0_52] : memref<128x128xbf16, #tpu.memory_space<vmem>>, vector<128x128xbf16>
    %c0_53 = arith.constant 0 : index
    %c0_54 = arith.constant 0 : index
    %105 = vector.load %arg16[%c0_53, %c0_54] : memref<1x128xf32, #tpu.memory_space<vmem>>, vector<1x128xf32>
    %cst_55 = arith.constant dense<0.000000e+00> : vector<128x128xf32>
    %106 = tpu.matmul %103, %104, %cst_55 {dimension_numbers = #tpu.dot_dimension_numbers<[1], [0], [0], [1], [0, 0, 1, 1], [], []>} : vector<128x128xbf16>, vector<128x128xbf16>, vector<128x128xf32> -> vector<128x128xf32>
    %107 = vector.broadcast %105 : vector<1x128xf32> to vector<128x128xf32>
    %108 = arith.addf %106, %107 : vector<128x128xf32>
    %cst_56 = arith.constant 0.000000e+00 : f32
    %109 = vector.broadcast %cst_56 : f32 to vector<128x128xf32>
    %110 = arith.maximumf %108, %109 : vector<128x128xf32>
    %cst_57 = arith.constant dense<0.000000e+00> : vector<128xf32>
    %111 = vector.multi_reduction <add>, %110, %cst_57 [0] : vector<128x128xf32> to vector<128xf32>
    %112 = vector.shape_cast %111 : vector<128xf32> to vector<1x128xf32>
    %cst_58 = arith.constant 7.812500e-03 : f32
    %113 = vector.broadcast %cst_58 : f32 to vector<1x128xf32>
    %114 = arith.mulf %112, %113 : vector<1x128xf32>
    %115 = vector.broadcast %114 : vector<1x128xf32> to vector<128x128xf32>
    %116 = arith.subf %110, %115 : vector<128x128xf32>
    %117 = arith.mulf %116, %116 : vector<128x128xf32>
    %cst_59 = arith.constant dense<0.000000e+00> : vector<128xf32>
    %118 = vector.multi_reduction <add>, %117, %cst_59 [0] : vector<128x128xf32> to vector<128xf32>
    %119 = vector.shape_cast %118 : vector<128xf32> to vector<1x128xf32>
    %cst_60 = arith.constant 7.812500e-03 : f32
    %120 = vector.broadcast %cst_60 : f32 to vector<1x128xf32>
    %121 = arith.mulf %119, %120 : vector<1x128xf32>
    %cst_61 = arith.constant 9.99999974E-6 : f32
    %122 = vector.broadcast %cst_61 : f32 to vector<1x128xf32>
    %123 = arith.addf %121, %122 : vector<1x128xf32>
    %124 = math.rsqrt %123 : vector<1x128xf32>
    %125 = vector.broadcast %124 : vector<1x128xf32> to vector<128x128xf32>
    %126 = arith.mulf %116, %125 : vector<128x128xf32>
    %127 = arith.truncf %126 : vector<128x128xf32> to vector<128x128xbf16>
    %c0_62 = arith.constant 0 : index
    %c0_63 = arith.constant 0 : index
    %128 = vector.load %arg7[%c0_62, %c0_63] : memref<128x128xbf16, #tpu.memory_space<vmem>>, vector<128x128xbf16>
    %c0_64 = arith.constant 0 : index
    %c0_65 = arith.constant 0 : index
    %129 = vector.load %arg17[%c0_64, %c0_65] : memref<1x128xf32, #tpu.memory_space<vmem>>, vector<1x128xf32>
    %cst_66 = arith.constant dense<0.000000e+00> : vector<128x128xf32>
    %130 = tpu.matmul %127, %128, %cst_66 {dimension_numbers = #tpu.dot_dimension_numbers<[1], [0], [0], [1], [0, 0, 1, 1], [], []>} : vector<128x128xbf16>, vector<128x128xbf16>, vector<128x128xf32> -> vector<128x128xf32>
    %131 = vector.broadcast %129 : vector<1x128xf32> to vector<128x128xf32>
    %132 = arith.addf %130, %131 : vector<128x128xf32>
    %cst_67 = arith.constant dense<0.000000e+00> : vector<128xf32>
    %133 = vector.multi_reduction <add>, %132, %cst_67 [0] : vector<128x128xf32> to vector<128xf32>
    %134 = vector.shape_cast %133 : vector<128xf32> to vector<1x128xf32>
    %cst_68 = arith.constant 7.812500e-03 : f32
    %135 = vector.broadcast %cst_68 : f32 to vector<1x128xf32>
    %136 = arith.mulf %134, %135 : vector<1x128xf32>
    %137 = vector.broadcast %136 : vector<1x128xf32> to vector<128x128xf32>
    %138 = arith.subf %132, %137 : vector<128x128xf32>
    %139 = arith.mulf %138, %138 : vector<128x128xf32>
    %cst_69 = arith.constant dense<0.000000e+00> : vector<128xf32>
    %140 = vector.multi_reduction <add>, %139, %cst_69 [0] : vector<128x128xf32> to vector<128xf32>
    %141 = vector.shape_cast %140 : vector<128xf32> to vector<1x128xf32>
    %cst_70 = arith.constant 7.812500e-03 : f32
    %142 = vector.broadcast %cst_70 : f32 to vector<1x128xf32>
    %143 = arith.mulf %141, %142 : vector<1x128xf32>
    %cst_71 = arith.constant 9.99999974E-6 : f32
    %144 = vector.broadcast %cst_71 : f32 to vector<1x128xf32>
    %145 = arith.addf %143, %144 : vector<1x128xf32>
    %146 = math.rsqrt %145 : vector<1x128xf32>
    %147 = vector.broadcast %146 : vector<1x128xf32> to vector<128x128xf32>
    %148 = arith.mulf %138, %147 : vector<128x128xf32>
    %cst_72 = arith.constant 0.000000e+00 : f32
    %149 = vector.broadcast %cst_72 : f32 to vector<128x128xf32>
    %150 = arith.maximumf %148, %149 : vector<128x128xf32>
    %151 = arith.truncf %150 : vector<128x128xf32> to vector<128x128xbf16>
    %c0_73 = arith.constant 0 : index
    %c0_74 = arith.constant 0 : index
    %152 = vector.load %arg8[%c0_73, %c0_74] : memref<128x128xbf16, #tpu.memory_space<vmem>>, vector<128x128xbf16>
    %c0_75 = arith.constant 0 : index
    %c0_76 = arith.constant 0 : index
    %153 = vector.load %arg18[%c0_75, %c0_76] : memref<1x128xf32, #tpu.memory_space<vmem>>, vector<1x128xf32>
    %cst_77 = arith.constant dense<0.000000e+00> : vector<128x128xf32>
    %154 = tpu.matmul %151, %152, %cst_77 {dimension_numbers = #tpu.dot_dimension_numbers<[1], [0], [0], [1], [0, 0, 1, 1], [], []>} : vector<128x128xbf16>, vector<128x128xbf16>, vector<128x128xf32> -> vector<128x128xf32>
    %155 = vector.broadcast %153 : vector<1x128xf32> to vector<128x128xf32>
    %156 = arith.addf %154, %155 : vector<128x128xf32>
    %cst_78 = arith.constant dense<0.000000e+00> : vector<128xf32>
    %157 = vector.multi_reduction <add>, %156, %cst_78 [0] : vector<128x128xf32> to vector<128xf32>
    %158 = vector.shape_cast %157 : vector<128xf32> to vector<1x128xf32>
    %cst_79 = arith.constant 7.812500e-03 : f32
    %159 = vector.broadcast %cst_79 : f32 to vector<1x128xf32>
    %160 = arith.mulf %158, %159 : vector<1x128xf32>
    %161 = vector.broadcast %160 : vector<1x128xf32> to vector<128x128xf32>
    %162 = arith.subf %156, %161 : vector<128x128xf32>
    %163 = arith.mulf %162, %162 : vector<128x128xf32>
    %cst_80 = arith.constant dense<0.000000e+00> : vector<128xf32>
    %164 = vector.multi_reduction <add>, %163, %cst_80 [0] : vector<128x128xf32> to vector<128xf32>
    %165 = vector.shape_cast %164 : vector<128xf32> to vector<1x128xf32>
    %cst_81 = arith.constant 7.812500e-03 : f32
    %166 = vector.broadcast %cst_81 : f32 to vector<1x128xf32>
    %167 = arith.mulf %165, %166 : vector<1x128xf32>
    %cst_82 = arith.constant 9.99999974E-6 : f32
    %168 = vector.broadcast %cst_82 : f32 to vector<1x128xf32>
    %169 = arith.addf %167, %168 : vector<1x128xf32>
    %170 = math.rsqrt %169 : vector<1x128xf32>
    %171 = vector.broadcast %170 : vector<1x128xf32> to vector<128x128xf32>
    %172 = arith.mulf %162, %171 : vector<128x128xf32>
    %cst_83 = arith.constant 0.000000e+00 : f32
    %173 = vector.broadcast %cst_83 : f32 to vector<128x128xf32>
    %174 = arith.maximumf %172, %173 : vector<128x128xf32>
    %175 = arith.truncf %174 : vector<128x128xf32> to vector<128x128xbf16>
    %c0_84 = arith.constant 0 : index
    %c0_85 = arith.constant 0 : index
    %176 = vector.load %arg9[%c0_84, %c0_85] : memref<128x128xbf16, #tpu.memory_space<vmem>>, vector<128x128xbf16>
    %c0_86 = arith.constant 0 : index
    %c0_87 = arith.constant 0 : index
    %177 = vector.load %arg19[%c0_86, %c0_87] : memref<1x128xf32, #tpu.memory_space<vmem>>, vector<1x128xf32>
    %cst_88 = arith.constant dense<0.000000e+00> : vector<128x128xf32>
    %178 = tpu.matmul %175, %176, %cst_88 {dimension_numbers = #tpu.dot_dimension_numbers<[1], [0], [0], [1], [0, 0, 1, 1], [], []>} : vector<128x128xbf16>, vector<128x128xbf16>, vector<128x128xf32> -> vector<128x128xf32>
    %179 = vector.broadcast %177 : vector<1x128xf32> to vector<128x128xf32>
    %180 = arith.addf %178, %179 : vector<128x128xf32>
    %cst_89 = arith.constant dense<0.000000e+00> : vector<128xf32>
    %181 = vector.multi_reduction <add>, %180, %cst_89 [0] : vector<128x128xf32> to vector<128xf32>
    %182 = vector.shape_cast %181 : vector<128xf32> to vector<1x128xf32>
    %cst_90 = arith.constant 7.812500e-03 : f32
    %183 = vector.broadcast %cst_90 : f32 to vector<1x128xf32>
    %184 = arith.mulf %182, %183 : vector<1x128xf32>
    %185 = vector.broadcast %184 : vector<1x128xf32> to vector<128x128xf32>
    %186 = arith.subf %180, %185 : vector<128x128xf32>
    %187 = arith.mulf %186, %186 : vector<128x128xf32>
    %cst_91 = arith.constant dense<0.000000e+00> : vector<128xf32>
    %188 = vector.multi_reduction <add>, %187, %cst_91 [0] : vector<128x128xf32> to vector<128xf32>
    %189 = vector.shape_cast %188 : vector<128xf32> to vector<1x128xf32>
    %cst_92 = arith.constant 7.812500e-03 : f32
    %190 = vector.broadcast %cst_92 : f32 to vector<1x128xf32>
    %191 = arith.mulf %189, %190 : vector<1x128xf32>
    %cst_93 = arith.constant 9.99999974E-6 : f32
    %192 = vector.broadcast %cst_93 : f32 to vector<1x128xf32>
    %193 = arith.addf %191, %192 : vector<1x128xf32>
    %194 = math.rsqrt %193 : vector<1x128xf32>
    %195 = vector.broadcast %194 : vector<1x128xf32> to vector<128x128xf32>
    %196 = arith.mulf %186, %195 : vector<128x128xf32>
    %cst_94 = arith.constant 0.000000e+00 : f32
    %197 = vector.broadcast %cst_94 : f32 to vector<128x128xf32>
    %198 = arith.maximumf %196, %197 : vector<128x128xf32>
    %199 = arith.truncf %198 : vector<128x128xf32> to vector<128x128xbf16>
    %c0_95 = arith.constant 0 : index
    %c0_96 = arith.constant 0 : index
    %200 = vector.load %arg10[%c0_95, %c0_96] : memref<128x128xbf16, #tpu.memory_space<vmem>>, vector<128x128xbf16>
    %c0_97 = arith.constant 0 : index
    %c0_98 = arith.constant 0 : index
    %201 = vector.load %arg20[%c0_97, %c0_98] : memref<1x128xf32, #tpu.memory_space<vmem>>, vector<1x128xf32>
    %cst_99 = arith.constant dense<0.000000e+00> : vector<128x128xf32>
    %202 = tpu.matmul %199, %200, %cst_99 {dimension_numbers = #tpu.dot_dimension_numbers<[1], [0], [0], [1], [0, 0, 1, 1], [], []>} : vector<128x128xbf16>, vector<128x128xbf16>, vector<128x128xf32> -> vector<128x128xf32>
    %203 = vector.broadcast %201 : vector<1x128xf32> to vector<128x128xf32>
    %204 = arith.addf %202, %203 : vector<128x128xf32>
    %c0_100 = arith.constant 0 : index
    %c0_101 = arith.constant 0 : index
    %205 = vector.load %arg22[%c0_100, %c0_101] : memref<128x128xf32, #tpu.memory_space<vmem>>, vector<128x128xf32>
    tpu.vector_store %arg22[%c0_100, %c0_101], %204 {strides = array<i32>} : memref<128x128xf32, #tpu.memory_space<vmem>>, vector<128x128xf32>,
    return
  }
}

</mosaic_0001>

<bundles_post_ra>
// kernel: fused_forward.1
= control target key start
LH: loop header
LB: loop body
LE: loop exit
PB: predicated region body
PF: predicated region fallthrough
CT: control target
= control target key end

     0   :  { %s4283_s0 = inlined_call_operand.hbm [shape: bf16[128,128], index: 0, kind: input, shape index: {}]   ;;  %s4284_s1 = inlined_call_operand.hbm [shape: bf16[128,128], index: 1, kind: input, shape index: {}]   ;;  %s4285_s2 = inlined_call_operand.hbm [shape: bf16[128,128], index: 2, kind: input, shape index: {}]   ;;  %s4286_s3 = inlined_call_operand.hbm [shape: bf16[128,128], index: 3, kind: input, shape index: {}]   ;;  %s4287_s4 = inlined_call_operand.hbm [shape: bf16[128,128], index: 4, kind: input, shape index: {}]   ;;  %s4288_s5 = inlined_call_operand.hbm [shape: bf16[128,128], index: 5, kind: input, shape index: {}]   ;;  %s4289_s6 = inlined_call_operand.hbm [shape: bf16[128,128], index: 6, kind: input, shape index: {}]   ;;  %s4290_s7 = inlined_call_operand.hbm [shape: bf16[128,128], index: 7, kind: input, shape index: {}]   ;;  %s4291_s8 = inlined_call_operand.hbm [shape: bf16[128,128], index: 8, kind: input, shape index: {}]   ;;  %s4292_s9 = inlined_call_operand.hbm [shape: bf16[128,128], index: 9, kind: input, shape index: {}]   ;;  %s4293_s10 = inlined_call_operand.hbm [shape: bf16[128,128], index: 10, kind: input, shape index: {}]   ;;  %s4294_s11 = inlined_call_operand.vmem [shape: f32[1,128], index: 11, kind: input, shape index: {}]   ;;  %s4295_s12 = inlined_call_operand.vmem [shape: f32[1,128], index: 12, kind: input, shape index: {}]   ;;  %s4296_s13 = inlined_call_operand.vmem [shape: f32[1,128], index: 13, kind: input, shape index: {}]   ;;  %s4297_s14 = inlined_call_operand.vmem [shape: f32[1,128], index: 14, kind: input, shape index: {}]   ;;  %s4298_s15 = inlined_call_operand.vmem [shape: f32[1,128], index: 15, kind: input, shape index: {}]   ;;  %s4299_s16 = inlined_call_operand.vmem [shape: f32[1,128], index: 16, kind: input, shape index: {}]   ;;  %s4300_s17 = inlined_call_operand.vmem [shape: f32[1,128], index: 17, kind: input, shape index: {}]   ;;  %s4301_s18 = inlined_call_operand.vmem [shape: f32[1,128], index: 18, kind: input, shape index: {}]   ;;  %s4302_s19 = inlined_call_operand.vmem [shape: f32[1,128], index: 19, kind: input, shape index: {}]   ;;  %s4303_s20 = inlined_call_operand.vmem [shape: f32[1,128], index: 20, kind: input, shape index: {}]   ;;  %s4304_s21 = inlined_call_operand.hbm [shape: f32[128,128], index: 21, kind: output, shape index: {0}]   ;;  %s4305_s22 = inlined_call_operand.hbm [shape: f32[128,128], index: 22, kind: output, shape index: {1}]  }
   0x1   :  { %4306 = sst [smem:[#allocation31_spill]] %s4283_s0 }
   0x2   :  { %4307 = sst [smem:[#allocation32_spill]] %s4284_s1 }
   0x3   :  { %4308 = sst [smem:[#allocation33_spill]] %s4285_s2 }
   0x4   :  { %4309 = sst [smem:[#allocation34_spill]] %s4286_s3 }
   0x5   :  { %4310 = sst [smem:[#allocation35_spill]] %s4287_s4 }
   0x6   :  { %4311 = sst [smem:[#allocation36_spill]] %s4288_s5 }
   0x7   :  { %4312 = sst [smem:[#allocation37_spill]] %s4289_s6 }
   0x8   :  { %28 = vsyncpa [#allocation3], 0 }
   0x9   :  { %29 = vsyncpa [#allocation6], 0 }
   0xa   :  { %30 = vsyncpa [#allocation9], 0 }
   0xb   :  { %31 = vsyncpa [#allocation12], 0 }
   0xc   :  { %32 = vsyncpa [#allocation15], 0 }
   0xd   :  { %33 = vsyncpa [#allocation18], 0 }
   0xe   :  { %34 = vsyncpa [#allocation4], 0 }
   0xf   :  { %35 = vsyncpa [#allocation22], 0  ;;  %s3963_s3 = smov [#allocation5]   ;;  %s3964_s29 = smov [#allocation8]  }
  0x10   :  { %s53_s28 = sshll.u32 %s3963_s3, 4  ;;  %s77_s30 = sshll.u32 %s3964_s29, 4  ;;  %s54_s28 = int_to_ptr.vmem [resolvable:$true] %s53_s28  ;;  %s78_s30 = int_to_ptr.vmem [resolvable:$true] %s77_s30 }
  0x11   :  { %s3695_s4 = scalar_lea.vmem %s54_s28, 1024  ;;  %p3700_p1 = scmp.lt.s32.totalorder %s54_s28, %s54_s28 }
  0x12   :  { %p3696_p0 = scmp.ne.s32.totalorder %s54_s28, %s3695_s4  ;;  %p3701_p2 = scmp.lt.s32.totalorder %s3695_s4, %s3695_s4 }
  0x14   :  { %p3702_p3 = por %p3701_p2, %p3700_p1 }
  0x16   :  { %p3703_p4 = pnand %p3702_p3, %p3696_p0 }
  0x18   :  { %3706 = shalt.err (!%p3703_p4)
}
  0x19   :  { %s3965_s0 = smov 64   ;;  %s3966_s23 = smov 4  }
  0x1a   :  { %s4313_s24 = sld [smem:[#allocation32_spill]]  ;;  %s3715_s6 = scalar_lea.vmem %s78_s30, 1024 }
  0x1b   :  { %p3716_p5 = scmp.ne.s32.totalorder %s78_s30, %s3715_s6  ;;  %p3720_p6 = scmp.lt.s32.totalorder %s78_s30, %s78_s30 }
  0x1c   :  { %p3721_p7 = scmp.lt.s32.totalorder %s3715_s6, %s3715_s6 }
  0x1e   :  { %p3722_p8 = por %p3721_p7, %p3720_p6 }
  0x20   :  { %59 = dma.hbm_to_vmem [thread:$0]  %s4313_s24, 1024, %s54_s28, [#allocation6], %s3965_s0, %s3965_s0, %s3966_s23  }
  0x21   :  { %p3723_p9 = pnand %p3722_p8, %p3716_p5 }
  0x23   :  { %3726 = shalt.err (!%p3723_p9)
}
  0x24   :  { %s4314_s2 = sld [smem:[#allocation34_spill]]  ;;  %s3967_s27 = smov [#allocation11]  }
  0x25   :  { %s101_s3 = sshll.u32 %s3967_s27, 4  ;;  %s3968_s29 = smov [#allocation14]   ;;  %s102_s3 = int_to_ptr.vmem [resolvable:$true] %s101_s3 }
  0x26   :  { %s125_s4 = sshll.u32 %s3968_s29, 4  ;;  %s3735_s28 = scalar_lea.vmem %s102_s3, 1024  ;;  %s126_s4 = int_to_ptr.vmem [resolvable:$true] %s125_s4 }
  0x27   :  { %p3736_p10 = scmp.ne.s32.totalorder %s102_s3, %s3735_s28  ;;  %p3740_p11 = scmp.lt.s32.totalorder %s102_s3, %s102_s3 }
  0x28   :  { %p3741_p12 = scmp.lt.s32.totalorder %s3735_s28, %s3735_s28 }
  0x2a   :  { %83 = dma.hbm_to_vmem [thread:$0]  %s4314_s2, 1024, %s78_s30, [#allocation9], %s3965_s0, %s3965_s0, %s3966_s23  }
  0x2b   :  { %p3742_p13 = por %p3741_p12, %p3740_p11 }
  0x2d   :  { %p3743_p0 = pnand %p3742_p13, %p3736_p10 }
  0x2f   :  { %3746 = shalt.err (!%p3743_p0)
}
  0x30   :  { %s4315_s24 = sld [smem:[#allocation36_spill]]  ;;  %s3755_s30 = scalar_lea.vmem %s126_s4, 1024 }
  0x31   :  { %p3756_p1 = scmp.ne.s32.totalorder %s126_s4, %s3755_s30  ;;  %p3760_p2 = scmp.lt.s32.totalorder %s126_s4, %s126_s4 }
  0x32   :  { %p3761_p3 = scmp.lt.s32.totalorder %s3755_s30, %s3755_s30 }
  0x34   :  { %p3762_p4 = por %p3761_p3, %p3760_p2 }
  0x36   :  { %107 = dma.hbm_to_vmem [thread:$0]  %s4315_s24, 1024, %s102_s3, [#allocation12], %s3965_s0, %s3965_s0, %s3966_s23  }
  0x37   :  { %p3763_p5 = pnand %p3762_p4, %p3756_p1 }
  0x39   :  { %3766 = shalt.err (!%p3763_p5)
}
  0x3a   :  { %131 = dma.hbm_to_vmem [thread:$0]  %s4290_s7, 1024, %s126_s4, [#allocation15], %s3965_s0, %s3965_s0, %s3966_s23  }
  0x3b   :  { %s3969_s26 = smov [#allocation17]   ;;  %s3970_s27 = smov [#allocation2]  }
  0x3c   :  { %s149_s2 = sshll.u32 %s3969_s26, 4  ;;  %s41_s29 = sshll.u32 %s3970_s27, 4  ;;  %s150_s2 = int_to_ptr.vmem [resolvable:$true] %s149_s2  ;;  %s42_s29 = int_to_ptr.vmem [resolvable:$true] %s41_s29 }
  0x3d   :  { %s3775_s3 = scalar_lea.vmem %s150_s2, 1024  ;;  %p3780_p7 = scmp.lt.s32.totalorder %s150_s2, %s150_s2 }
  0x3e   :  { %p3776_p6 = scmp.ne.s32.totalorder %s150_s2, %s3775_s3  ;;  %p3781_p8 = scmp.lt.s32.totalorder %s3775_s3, %s3775_s3 }
  0x40   :  { %p3782_p9 = por %p3781_p8, %p3780_p7 }
  0x42   :  { %p3783_p10 = pnand %p3782_p9, %p3776_p6 }
  0x44   :  { %3786 = shalt.err (!%p3783_p10)
}
  0x45   :  { %155 = dma.hbm_to_vmem [thread:$0]  %s4292_s9, 1024, %s150_s2, [#allocation18], %s3965_s0, %s3965_s0, %s3966_s23  }
  0x46   :  { %s3795_s7 = scalar_lea.vmem %s42_s29, 1024  ;;  %p3800_p12 = scmp.lt.s32.totalorder %s42_s29, %s42_s29 }
  0x47   :  { %p3796_p11 = scmp.ne.s32.totalorder %s42_s29, %s3795_s7  ;;  %p3801_p13 = scmp.lt.s32.totalorder %s3795_s7, %s3795_s7 }
  0x49   :  { %p3802_p0 = por %p3801_p13, %p3800_p12 }
  0x4b   :  { %p3803_p1 = pnand %p3802_p0, %p3796_p11 }
  0x4d   :  { %3806 = shalt.err (!%p3803_p1)
}
  0x4e   :  { %s4316_s24 = sld [smem:[#allocation31_spill]]  ;;  %s3971_s30 = smov [#allocation7]  }
  0x4f   :  { %s65_s6 = sshll.u32 %s3971_s30, 4  ;;  %s3972_s25 = smov [#allocation10]   ;;  %s66_s6 = int_to_ptr.vmem [resolvable:$true] %s65_s6 }
  0x50   :  { %s89_s26 = sshll.u32 %s3972_s25, 4  ;;  %s3815_s9 = scalar_lea.vmem %s66_s6, 1024  ;;  %s90_s26 = int_to_ptr.vmem [resolvable:$true] %s89_s26 }
  0x51   :  { %p3816_p2 = scmp.ne.s32.totalorder %s66_s6, %s3815_s9  ;;  %p3820_p3 = scmp.lt.s32.totalorder %s66_s6, %s66_s6 }
  0x52   :  { %p3821_p4 = scmp.lt.s32.totalorder %s3815_s9, %s3815_s9 }
  0x54   :  { %47 = dma.hbm_to_vmem [thread:$0]  %s4316_s24, 1024, %s42_s29, [#allocation3], %s3965_s0, %s3965_s0, %s3966_s23  }
  0x55   :  { %p3822_p5 = por %p3821_p4, %p3820_p3 }
  0x57   :  { %p3823_p6 = pnand %p3822_p5, %p3816_p2 }
  0x59   :  { %3826 = shalt.err (!%p3823_p6)
}
  0x5a   :  { %s4317_s3 = sld [smem:[#allocation33_spill]]  ;;  %s3835_s29 = scalar_lea.vmem %s90_s26, 1024 }
  0x5b   :  { %p3836_p7 = scmp.ne.s32.totalorder %s90_s26, %s3835_s29  ;;  %p3840_p8 = scmp.lt.s32.totalorder %s90_s26, %s90_s26 }
  0x5c   :  { %p3841_p9 = scmp.lt.s32.totalorder %s3835_s29, %s3835_s29 }
  0x5e   :  { %p3842_p10 = por %p3841_p9, %p3840_p8 }
  0x60   :  { %71 = dma.hbm_to_vmem [thread:$0]  %s4317_s3, 1024, %s66_s6, [#allocation6], %s3965_s0, %s3965_s0, %s3966_s23  }
  0x61   :  { %p3843_p11 = pnand %p3842_p10, %p3836_p7 }
  0x63   :  { %3846 = shalt.err (!%p3843_p11)
}
  0x64   :  { %s4318_s7 = sld [smem:[#allocation35_spill]]  ;;  %s3973_s4 = smov [#allocation13]  }
  0x65   :  { %s113_s5 = sshll.u32 %s3973_s4, 4  ;;  %s3974_s24 = smov [#allocation16]   ;;  %s114_s5 = int_to_ptr.vmem [resolvable:$true] %s113_s5 }
  0x66   :  { %s137_s30 = sshll.u32 %s3974_s24, 4  ;;  %s3855_s6 = scalar_lea.vmem %s114_s5, 1024  ;;  %s138_s30 = int_to_ptr.vmem [resolvable:$true] %s137_s30 }
  0x67   :  { %p3856_p12 = scmp.ne.s32.totalorder %s114_s5, %s3855_s6  ;;  %p3860_p13 = scmp.lt.s32.totalorder %s114_s5, %s114_s5 }
  0x68   :  { %p3861_p0 = scmp.lt.s32.totalorder %s3855_s6, %s3855_s6 }
  0x6a   :  { %95 = dma.hbm_to_vmem [thread:$0]  %s4318_s7, 1024, %s90_s26, [#allocation9], %s3965_s0, %s3965_s0, %s3966_s23  }
  0x6b   :  { %p3862_p1 = por %p3861_p0, %p3860_p13 }
  0x6d   :  { %p3863_p2 = pnand %p3862_p1, %p3856_p12 }
  0x6f   :  { %3866 = shalt.err (!%p3863_p2)
}
  0x70   :  { %s4319_s2 = sld [smem:[#allocation37_spill]]  ;;  %s3875_s26 = scalar_lea.vmem %s138_s30, 1024 }
  0x71   :  { %p3876_p3 = scmp.ne.s32.totalorder %s138_s30, %s3875_s26  ;;  %p3880_p4 = scmp.lt.s32.totalorder %s138_s30, %s138_s30 }
  0x72   :  { %p3881_p5 = scmp.lt.s32.totalorder %s3875_s26, %s3875_s26 }
  0x74   :  { %p3882_p6 = por %p3881_p5, %p3880_p4 }
  0x76   :  { %119 = dma.hbm_to_vmem [thread:$0]  %s4319_s2, 1024, %s114_s5, [#allocation12], %s3965_s0, %s3965_s0, %s3966_s23  }
  0x77   :  { %p3883_p7 = pnand %p3882_p6, %p3876_p3 }
  0x79   :  { %3886 = shalt.err (!%p3883_p7)
}
  0x7a   :  { %143 = dma.hbm_to_vmem [thread:$0]  %s4291_s8, 1024, %s138_s30, [#allocation15], %s3965_s0, %s3965_s0, %s3966_s23  }
  0x7b   :  { %s3975_s29 = smov [#allocation19]  }
  0x7c   :  { %s161_s28 = sshll.u32 %s3975_s29, 4  ;;  %s162_s28 = int_to_ptr.vmem [resolvable:$true] %s161_s28 }
  0x7d   :  { %s3895_s1 = scalar_lea.vmem %s162_s28, 1024  ;;  %p3900_p9 = scmp.lt.s32.totalorder %s162_s28, %s162_s28 }
  0x7e   :  { %p3896_p8 = scmp.ne.s32.totalorder %s162_s28, %s3895_s1  ;;  %p3901_p10 = scmp.lt.s32.totalorder %s3895_s1, %s3895_s1 }
  0x80   :  { %p3902_p11 = por %p3901_p10, %p3900_p9 }
  0x82   :  { %p3903_p12 = pnand %p3902_p11, %p3896_p8 }
  0x84   :  { %3906 = shalt.err (!%p3903_p12)
}
  0x85   :  { %167 = dma.hbm_to_vmem [thread:$0]  %s4293_s10, 1024, %s162_s28, [#allocation18], %s3965_s0, %s3965_s0, %s3966_s23  }
  0x86   :  { %3947 = dma.done.wait [#allocation3], 1024  }
  0x87   :  { %3948 = vsyncadd [#allocation3], 4294966272 }
  0x88   :  { %3949 = dma.done.wait [#allocation6], 2048  }
  0x89   :  { %3950 = vsyncadd [#allocation6], 4294965248 }
  0x8a   :  { %3951 = dma.done.wait [#allocation9], 2048  }
  0x8b   :  { %3952 = vsyncadd [#allocation9], 4294965248 }
  0x8c   :  { %3953 = dma.done.wait [#allocation12], 2048  }
  0x8d   :  { %3954 = vsyncadd [#allocation12], 4294965248 }
  0x8e   :  { %3955 = dma.done.wait [#allocation15], 2048  }
  0x8f   :  { %3956 = vsyncadd [#allocation15], 4294965248 }
  0x90   :  { %3957 = dma.done.wait [#allocation18], 2048  }
  0x91   :  { %3958 = vsyncadd [#allocation18], 4294965248  ;;  %v3583_v0 = vld [vmem:[#allocation5 + $0x38] sm:$0xff]   ;;  %v3584_v1 = vld [vmem:[#allocation5 + $0x30] sm:$0xff]  }
  0x92   :  { %3246 = vmatprep.subr.bf16.mxu0 %v3583_v0  ;;  %v3585_v2 = vld [vmem:[#allocation5 + $0x28] sm:$0xff]   ;;  %v3586_v3 = vld [vmem:[#allocation5 + $0x20] sm:$0xff]   ;;  %v3587_v5 = vld [vmem:[#allocation5 + $0x18] sm:$0xff]  }
  0x93   :  { %3247 = vmatpush3.bf16.msra.mxu0 %v3583_v0  ;;  %v3591_v4 = vld [vmem:[#allocation2] sm:$0xff]   ;;  %v3588_v6 = vld [vmem:[#allocation5 + $0x10] sm:$0xff]   ;;  %v3589_v7 = vld [vmem:[#allocation5 + $0x8] sm:$0xff]  }
  0x94   :  { %3248 = vmatprep.subr.bf16.mxu0 %v3584_v1  ;;  %3262 = vmatprep.mubr.bf16.mxu0 %v3591_v4  ;;  %v3590_v8 = vld [vmem:[#allocation5] sm:$0xff]   ;;  %v3592_v9 = vld [vmem:[#allocation2 + $0x8] sm:$0xff]   ;;  %v3593_v10 = vld [vmem:[#allocation2 + $0x10] sm:$0xff]  }
  0x95   :  { %v3594_v11 = vld [vmem:[#allocation2 + $0x18] sm:$0xff]   ;;  %v3595_v12 = vld [vmem:[#allocation2 + $0x20] sm:$0xff]   ;;  %v3596_v13 = vld [vmem:[#allocation2 + $0x28] sm:$0xff]  }
  0x96   :  { %v3597_v14 = vld [vmem:[#allocation2 + $0x30] sm:$0xff]   ;;  %v3598_v15 = vld [vmem:[#allocation2 + $0x38] sm:$0xff]   ;;  %v3601_v18 = vld [vmem:[#allocation7 + $0x28] sm:$0xff]  }
  0x97   :  { %3249 = vmatpush3.bf16.msra.mxu0 %v3584_v1  ;;  %v3599_v16 = vld [vmem:[#allocation7 + $0x38] sm:$0xff]   ;;  %v3600_v17 = vld [vmem:[#allocation7 + $0x30] sm:$0xff]   ;;  %v3602_v19 = vld [vmem:[#allocation7 + $0x20] sm:$0xff]  }
  0x98   :  { %3250 = vmatprep.subr.bf16.mxu0 %v3585_v2  ;;  %3278 = vmatprep.subr.bf16.mxu1 %v3599_v16  ;;  %v3603_v20 = vld [vmem:[#allocation7 + $0x18] sm:$0xff]   ;;  %v3604_v21 = vld [vmem:[#allocation7 + $0x10] sm:$0xff]   ;;  %v3605_v22 = vld [vmem:[#allocation7 + $0x8] sm:$0xff]  }
  0x99   :  { %3279 = vmatpush3.bf16.msra.mxu1 %v3599_v16  ;;  %v3606_v23 = vld [vmem:[#allocation7] sm:$0xff]  }
  0x9a   :  { %3280 = vmatprep.subr.bf16.mxu1 %v3600_v17  ;;  %v2988_v26 = vld [vmem:[%s4294_s11] ss:$0 sm:$0xff] }
  0x9b   :  { %3251 = vmatpush3.bf16.msra.mxu0 %v3585_v2 }
  0x9c   :  { %3252 = vmatprep.subr.bf16.mxu0 %v3586_v3 }
  0x9d   :  { %3281 = vmatpush3.bf16.msra.mxu1 %v3600_v17 }
  0x9e   :  { %3282 = vmatprep.subr.bf16.mxu1 %v3601_v18 }
  0x9f   :  { %3253 = vmatpush3.bf16.msra.mxu0 %v3586_v3 }
  0xa0   :  { %3254 = vmatprep.subr.bf16.mxu0 %v3587_v5 }
  0xa1   :  { %3283 = vmatpush3.bf16.msra.mxu1 %v3601_v18 }
  0xa2   :  { %3284 = vmatprep.subr.bf16.mxu1 %v3602_v19 }
  0xa3   :  { %3255 = vmatpush3.bf16.msra.mxu0 %v3587_v5 }
  0xa4   :  { %3256 = vmatprep.subr.bf16.mxu0 %v3588_v6 }
  0xa5   :  { %3285 = vmatpush3.bf16.msra.mxu1 %v3602_v19 }
  0xa6   :  { %3286 = vmatprep.subr.bf16.mxu1 %v3603_v20 }
  0xa7   :  { %3257 = vmatpush3.bf16.msra.mxu0 %v3588_v6 }
  0xa8   :  { %3258 = vmatprep.subr.bf16.mxu0 %v3589_v7 }
  0xa9   :  { %3287 = vmatpush3.bf16.msra.mxu1 %v3603_v20 }
  0xaa   :  { %3288 = vmatprep.subr.bf16.mxu1 %v3604_v21 }
  0xab   :  { %3259 = vmatpush3.bf16.msra.mxu0 %v3589_v7 }
  0xac   :  { %3260 = vmatprep.subr.bf16.mxu0 %v3590_v8 }
  0xad   :  { %3289 = vmatpush3.bf16.msra.mxu1 %v3604_v21 }
  0xae   :  { %3290 = vmatprep.subr.bf16.mxu1 %v3605_v22 }
  0xaf   :  { %3261 = vmatpush3.bf16.msra.mxu0 %v3590_v8 }
  0xb1   :  { %3291 = vmatpush3.bf16.msra.mxu1 %v3605_v22 }
  0xb2   :  { %3263 = vmatmul.mubr.bf16.vlgmr.msra.gmra.mxu0 %v3592_v9  ;;  %3292 = vmatprep.subr.bf16.mxu1 %v3606_v23 }
  0xb3   :  { %3266 = vmatprep.mubr.bf16.mxu0 %v3593_v10 }
  0xb5   :  { %3293 = vmatpush3.bf16.msra.mxu1 %v3606_v23 }
  0xba   :  { %3267 = vmatmul.mubr.bf16.gmra.mxu0 %v3594_v11 }
  0xbb   :  { %3270 = vmatprep.mubr.bf16.mxu0 %v3595_v12 }
  0xc2   :  { %3271 = vmatmul.mubr.bf16.gmra.mxu0 %v3596_v13 }
  0xc3   :  { %3274 = vmatprep.mubr.bf16.mxu0 %v3597_v14 }
  0xca   :  { %3275 = vmatmul.mubr.bf16.gmra.mxu0 %v3598_v15 }
 0x172   :  { %v3264_v24 = vpop.f32.mrf.mxu0 }
 0x173   :  { %v4166_v30 = vadd.f32 %v3264_v24, %v2988_v26 }
 0x174   :  { %v391_v25 = vpop.f32.mrf.mxu0 }
 0x175   :  { %v4164_v28 = vadd.f32 %v2988_v26, %v391_v25  ;;  %v456_v37 = vmax.f32 %v4166_v30, 0.0 }
 0x176   :  { %v3265_v27 = vpop.f32.mrf.mxu0 }
 0x177   :  { %v454_v33 = vmax.f32 %v4164_v28, 0.0  ;;  %v4171_v34 = vadd.f32 %v3265_v27, %v2988_v26 }
 0x178   :  { %v394_v29 = vpop.f32.mrf.mxu0 }
 0x179   :  { %v4168_v31 = vadd.f32 %v2988_v26, %v394_v29  ;;  %v457_v41 = vmax.f32 %v4171_v34, 0.0 }
 0x17a   :  { %v3268_v32 = vpop.f32.mrf.mxu0 }
 0x17b   :  { %v455_v35 = vmax.f32 %v4168_v31, 0.0  ;;  %v4178_v44 = vadd.f32 %v3268_v32, %v2988_v26 }
 0x17c   :  { %v407_v36 = vpop.f32.mrf.mxu0 }
 0x17d   :  { %v470_v38 = vadd.f32 %v455_v35, %v454_v33  ;;  %v4175_v39 = vadd.f32 %v2988_v26, %v407_v36  ;;  %v460_v53 = vmax.f32 %v4178_v44, 0.0 }
 0x17e   :  { %v3269_v40 = vpop.f32.mrf.mxu0 }
 0x17f   :  { %v471_v42 = vadd.f32 %v470_v38, %v456_v37  ;;  %v458_v45 = vmax.f32 %v4175_v39, 0.0  ;;  %v419_v50 = vadd.f32 %v3269_v40, %v2988_v26 }
 0x180   :  { %v410_v43 = vpop.f32.mrf.mxu0 }
 0x181   :  { %v472_v46 = vadd.f32 %v471_v42, %v457_v41  ;;  %v411_v47 = vadd.f32 %v2988_v26, %v410_v43  ;;  %v461_v57 = vmax.f32 %v419_v50, 0.0 }
 0x182   :  { %v3272_v48 = vpop.f32.mrf.mxu0 }
 0x183   :  { %v473_v49 = vadd.f32 %v472_v46, %v458_v45  ;;  %v459_v51 = vmax.f32 %v411_v47, 0.0  ;;  %v432_v60 = vadd.f32 %v3272_v48, %v2988_v26 }
 0x184   :  { %v423_v52 = vpop.f32.mrf.mxu0 }
 0x185   :  { %v474_v54 = vadd.f32 %v473_v49, %v459_v51  ;;  %v424_v55 = vadd.f32 %v2988_v26, %v423_v52  ;;  %v464_v5 = vmax.f32 %v432_v60, 0.0 }
 0x186   :  { %v3273_v56 = vpop.f32.mrf.mxu0 }
 0x187   :  { %v475_v58 = vadd.f32 %v474_v54, %v460_v53  ;;  %v462_v61 = vmax.f32 %v424_v55, 0.0  ;;  %v435_v2 = vadd.f32 %v3273_v56, %v2988_v26 }
 0x188   :  { %v426_v59 = vpop.f32.mrf.mxu0 }
 0x189   :  { %v476_v62 = vadd.f32 %v475_v58, %v461_v57  ;;  %v427_v63 = vadd.f32 %v2988_v26, %v426_v59  ;;  %v465_v9 = vmax.f32 %v435_v2, 0.0 }
 0x18a   :  { %v3276_v0 = vpop.f32.mrf.mxu0 }
 0x18b   :  { %v477_v1 = vadd.f32 %v476_v62, %v462_v61  ;;  %v463_v3 = vmax.f32 %v427_v63, 0.0  ;;  %v448_v12 = vadd.f32 %v3276_v0, %v2988_v26 }
 0x18c   :  { %v439_v4 = vpop.f32.mrf.mxu0 }
 0x18d   :  { %v478_v6 = vadd.f32 %v477_v1, %v463_v3  ;;  %v440_v7 = vadd.f32 %v2988_v26, %v439_v4  ;;  %v468_v19 = vmax.f32 %v448_v12, 0.0 }
 0x18e   :  { %v3277_v8 = vpop.f32.mrf.mxu0 }
 0x18f   :  { %v479_v10 = vadd.f32 %v478_v6, %v464_v5  ;;  %v466_v13 = vmax.f32 %v440_v7, 0.0  ;;  %v451_v17 = vadd.f32 %v3277_v8, %v2988_v26 }
 0x190   :  { %v442_v11 = vpop.f32.mrf.mxu0 }
 0x191   :  { %v480_v14 = vadd.f32 %v479_v10, %v465_v9  ;;  %v443_v15 = vadd.f32 %v2988_v26, %v442_v11  ;;  %v469_v21 = vmax.f32 %v451_v17, 0.0 }
 0x193   :  { %v481_v16 = vadd.f32 %v480_v14, %v466_v13  ;;  %v467_v18 = vmax.f32 %v443_v15, 0.0 }
 0x195   :  { %v482_v20 = vadd.f32 %v481_v16, %v467_v18 }
 0x197   :  { %v483_v22 = vadd.f32 %v482_v20, %v468_v19 }
 0x199   :  { %v484_v23 = vadd.f32 %v483_v22, %v469_v21 }
 0x19b   :  { %v485_v24 = vrot.slane %v484_v23, 4 }
 0x19d   :  { %v486_v25 = vadd.f32 %v485_v24, %v484_v23 }
 0x19f   :  { %v487_v27 = vrot.slane %v486_v25, 2 }
 0x1a1   :  { %v488_v28 = vadd.f32 %v487_v27, %v486_v25 }
 0x1a3   :  { %v489_v29 = vrot.slane %v488_v28, 1 }
 0x1a5   :  { %v490_v30 = vadd.f32 %v489_v29, %v488_v28 }
 0x1a7   :  { %v491_v31 = vmul.f32 0.0078125, %v490_v30 }
 0x1a9   :  { %v492_v32 = vsub.f32 %v454_v33, %v491_v31  ;;  %v493_v34 = vsub.f32 %v455_v35, %v491_v31  ;;  %v494_v36 = vsub.f32 %v456_v37, %v491_v31  ;;  %v495_v40 = vsub.f32 %v457_v41, %v491_v31 }
 0x1aa   :  { %v496_v26 = vsub.f32 %v458_v45, %v491_v31  ;;  %v497_v44 = vsub.f32 %v459_v51, %v491_v31  ;;  %v498_v48 = vsub.f32 %v460_v53, %v491_v31  ;;  %v499_v52 = vsub.f32 %v461_v57, %v491_v31 }
 0x1ab   :  { %v508_v38 = vmul.f32 %v492_v32, %v492_v32  ;;  %v509_v39 = vmul.f32 %v493_v34, %v493_v34  ;;  %v510_v42 = vmul.f32 %v494_v36, %v494_v36  ;;  %v511_v46 = vmul.f32 %v495_v40, %v495_v40 }
 0x1ac   :  { %v512_v49 = vmul.f32 %v496_v26, %v496_v26  ;;  %v513_v54 = vmul.f32 %v497_v44, %v497_v44  ;;  %v500_v56 = vsub.f32 %v462_v61, %v491_v31  ;;  %v514_v58 = vmul.f32 %v498_v48, %v498_v48 }
 0x1ad   :  { %v524_v43 = vadd.f32 %v509_v39, %v508_v38  ;;  %v501_v35 = vsub.f32 %v463_v3, %v491_v31  ;;  %v515_v37 = vmul.f32 %v499_v52, %v499_v52  ;;  %v502_v60 = vsub.f32 %v464_v5, %v491_v31 }
 0x1ae   :  { %v516_v41 = vmul.f32 %v500_v56, %v500_v56  ;;  %v503_v62 = vsub.f32 %v465_v9, %v491_v31  ;;  %v504_v0 = vsub.f32 %v466_v13, %v491_v31  ;;  %v505_v2 = vsub.f32 %v467_v18, %v491_v31 }
 0x1af   :  { %v525_v47 = vadd.f32 %v524_v43, %v510_v42  ;;  %v517_v63 = vmul.f32 %v501_v35, %v501_v35  ;;  %v518_v1 = vmul.f32 %v502_v60, %v502_v60  ;;  %v506_v6 = vsub.f32 %v468_v19, %v491_v31 }
 0x1b0   :  { %v519_v4 = vmul.f32 %v503_v62, %v503_v62  ;;  %v520_v7 = vmul.f32 %v504_v0, %v504_v0  ;;  %v521_v8 = vmul.f32 %v505_v2, %v505_v2  ;;  %v507_v10 = vsub.f32 %v469_v21, %v491_v31 }
 0x1b1   :  { %v526_v50 = vadd.f32 %v525_v47, %v511_v46  ;;  %v522_v11 = vmul.f32 %v506_v6, %v506_v6 }
 0x1b2   :  { %v523_v5 = vmul.f32 %v507_v10, %v507_v10 }
 0x1b3   :  { %v527_v55 = vadd.f32 %v526_v50, %v512_v49 }
 0x1b5   :  { %v528_v33 = vadd.f32 %v527_v55, %v513_v54 }
 0x1b7   :  { %v529_v59 = vadd.f32 %v528_v33, %v514_v58  ;;  %v3610_v58 = vld [vmem:[#allocation8 + $0x20] sm:$0xff]   ;;  %v3611_v33 = vld [vmem:[#allocation8 + $0x18] sm:$0xff]  }
 0x1b9   :  { %v530_v45 = vadd.f32 %v529_v59, %v515_v37  ;;  %v3613_v37 = vld [vmem:[#allocation8 + $0x8] sm:$0xff]   ;;  %v3614_v59 = vld [vmem:[#allocation8] sm:$0xff]  }
 0x1bb   :  { %v531_v51 = vadd.f32 %v530_v45, %v516_v41 }
 0x1bd   :  { %v532_v53 = vadd.f32 %v531_v51, %v517_v63 }
 0x1bf   :  { %v533_v57 = vadd.f32 %v532_v53, %v518_v1 }
 0x1c1   :  { %v534_v61 = vadd.f32 %v533_v57, %v519_v4 }
 0x1c3   :  { %v535_v3 = vadd.f32 %v534_v61, %v520_v7 }
 0x1c5   :  { %v536_v12 = vadd.f32 %v535_v3, %v521_v8 }
 0x1c7   :  { %v537_v14 = vadd.f32 %v536_v12, %v522_v11 }
 0x1c9   :  { %v538_v15 = vadd.f32 %v537_v14, %v523_v5 }
 0x1cb   :  { %v539_v9 = vrot.slane %v538_v15, 4 }
 0x1cd   :  { %v540_v16 = vadd.f32 %v539_v9, %v538_v15 }
 0x1cf   :  { %v541_v17 = vrot.slane %v540_v16, 2 }
 0x1d1   :  { %v542_v13 = vadd.f32 %v541_v17, %v540_v16 }
 0x1d3   :  { %v543_v20 = vrot.slane %v542_v13, 1 }
 0x1d5   :  { %v544_v22 = vadd.f32 %v543_v20, %v542_v13 }
 0x1d7   :  { %v545_v18 = vmul.f32 0.0078125, %v544_v22 }
 0x1d9   :  { %v546_v23 = vadd.f32 1e-05, %v545_v18 }
 0x1db   :  { %3671 = vrsqrt.f32 %v546_v23 }
 0x1e8   :  { %v3672_v19 = vpop.eup %3671 }
 0x1e9   :  { %v548_v24 = vmul.f32 %v3672_v19, %v492_v32  ;;  %v549_v25 = vmul.f32 %v3672_v19, %v493_v34  ;;  %v550_v27 = vmul.f32 %v3672_v19, %v494_v36  ;;  %v551_v21 = vmul.f32 %v3672_v19, %v495_v40 }
 0x1ea   :  { %v552_v28 = vmul.f32 %v3672_v19, %v496_v26  ;;  %v553_v29 = vmul.f32 %v3672_v19, %v497_v44  ;;  %v554_v39 = vmul.f32 %v3672_v19, %v498_v48  ;;  %v555_v42 = vmul.f32 %v3672_v19, %v499_v52  ;;  %v3607_v48 = vld [vmem:[#allocation8 + $0x38] sm:$0xff]   ;;  %v3608_v52 = vld [vmem:[#allocation8 + $0x30] sm:$0xff]  }
 0x1eb   :  { %v564_v30 = vpack.c.bf16 %v549_v25, %v548_v24  ;;  %v565_v31 = vpack.c.bf16 %v551_v21, %v550_v27  ;;  %v556_v43 = vmul.f32 %v3672_v19, %v500_v56  ;;  %v557_v46 = vmul.f32 %v3672_v19, %v501_v35  ;;  %3310 = vmatprep.subr.bf16.mxu0 %v3607_v48  ;;  %v3609_v56 = vld [vmem:[#allocation8 + $0x28] sm:$0xff]   ;;  %v3612_v35 = vld [vmem:[#allocation8 + $0x10] sm:$0xff]  }
 0x1ec   :  { %v566_v38 = vpack.c.bf16 %v553_v29, %v552_v28  ;;  %v567_v47 = vpack.c.bf16 %v555_v42, %v554_v39  ;;  %v558_v32 = vmul.f32 %v3672_v19, %v502_v60  ;;  %v559_v34 = vmul.f32 %v3672_v19, %v503_v62  ;;  %3311 = vmatpush3.bf16.msra.mxu0 %v3607_v48  ;;  %v3005_v62 = vld [vmem:[%s4295_s12] ss:$0 sm:$0xff] }
 0x1ed   :  { %3294 = vmatprep.mubr.bf16.mxu1 %v564_v30  ;;  %v568_v49 = vpack.c.bf16 %v557_v46, %v556_v43  ;;  %v560_v36 = vmul.f32 %v3672_v19, %v504_v0  ;;  %v561_v40 = vmul.f32 %v3672_v19, %v505_v2  ;;  %v562_v50 = vmul.f32 %v3672_v19, %v506_v6 }
 0x1ee   :  { %3295 = vmatmul.mubr.bf16.vlgmr.msra.gmra.mxu1 %v565_v31  ;;  %v569_v26 = vpack.c.bf16 %v559_v34, %v558_v32  ;;  %v563_v54 = vmul.f32 %v3672_v19, %v507_v10  ;;  %3312 = vmatprep.subr.bf16.mxu0 %v3608_v52 }
 0x1ef   :  { %3298 = vmatprep.mubr.bf16.mxu1 %v566_v38  ;;  %v570_v44 = vpack.c.bf16 %v561_v40, %v560_v36 }
 0x1f0   :  { %v571_v55 = vpack.c.bf16 %v563_v54, %v562_v50  ;;  %3313 = vmatpush3.bf16.msra.mxu0 %v3608_v52 }
 0x1f1   :  { %3314 = vmatprep.subr.bf16.mxu0 %v3609_v56 }
 0x1f4   :  { %3315 = vmatpush3.bf16.msra.mxu0 %v3609_v56 }
 0x1f5   :  { %3316 = vmatprep.subr.bf16.mxu0 %v3610_v58 }
 0x1f6   :  { %3299 = vmatmul.mubr.bf16.gmra.mxu1 %v567_v47 }
 0x1f7   :  { %3302 = vmatprep.mubr.bf16.mxu1 %v568_v49 }
 0x1f8   :  { %3317 = vmatpush3.bf16.msra.mxu0 %v3610_v58 }
 0x1f9   :  { %3318 = vmatprep.subr.bf16.mxu0 %v3611_v33 }
 0x1fc   :  { %3319 = vmatpush3.bf16.msra.mxu0 %v3611_v33 }
 0x1fd   :  { %3320 = vmatprep.subr.bf16.mxu0 %v3612_v35 }
 0x1fe   :  { %3303 = vmatmul.mubr.bf16.gmra.mxu1 %v569_v26 }
 0x1ff   :  { %3306 = vmatprep.mubr.bf16.mxu1 %v570_v44 }
 0x200   :  { %3321 = vmatpush3.bf16.msra.mxu0 %v3612_v35 }
 0x201   :  { %3322 = vmatprep.subr.bf16.mxu0 %v3613_v37 }
 0x204   :  { %3323 = vmatpush3.bf16.msra.mxu0 %v3613_v37 }
 0x205   :  { %3324 = vmatprep.subr.bf16.mxu0 %v3614_v59 }
 0x206   :  { %3307 = vmatmul.mubr.bf16.gmra.mxu1 %v571_v55 }
 0x208   :  { %3325 = vmatpush3.bf16.msra.mxu0 %v3614_v59 }
 0x2ae   :  { %v3296_v60 = vpop.f32.mrf.mxu1 }
 0x2af   :  { %v686_v53 = vadd.f32 %v3296_v60, %v3005_v62 }
 0x2b0   :  { %v677_v41 = vpop.f32.mrf.mxu1 }
 0x2b1   :  { %v678_v51 = vadd.f32 %v3005_v62, %v677_v41 }
 0x2b2   :  { %v3297_v45 = vpop.f32.mrf.mxu1 }
 0x2b3   :  { %v689_v57 = vadd.f32 %v3297_v45, %v3005_v62 }
 0x2b4   :  { %v680_v63 = vpop.f32.mrf.mxu1 }
 0x2b5   :  { %v681_v0 = vadd.f32 %v3005_v62, %v680_v63 }
 0x2b6   :  { %v3300_v1 = vpop.f32.mrf.mxu1 }
 0x2b7   :  { %v740_v2 = vadd.f32 %v681_v0, %v678_v51  ;;  %v702_v5 = vadd.f32 %v3300_v1, %v3005_v62 }
 0x2b8   :  { %v693_v4 = vpop.f32.mrf.mxu1 }
 0x2b9   :  { %v741_v6 = vadd.f32 %v740_v2, %v686_v53  ;;  %v694_v61 = vadd.f32 %v3005_v62, %v693_v4 }
 0x2ba   :  { %v3301_v7 = vpop.f32.mrf.mxu1 }
 0x2bb   :  { %v742_v8 = vadd.f32 %v741_v6, %v689_v57  ;;  %v705_v9 = vadd.f32 %v3301_v7, %v3005_v62 }
 0x2bc   :  { %v696_v10 = vpop.f32.mrf.mxu1 }
 0x2bd   :  { %v743_v3 = vadd.f32 %v742_v8, %v694_v61  ;;  %v697_v11 = vadd.f32 %v3005_v62, %v696_v10 }
 0x2be   :  { %v3304_v12 = vpop.f32.mrf.mxu1 }
 0x2bf   :  { %v744_v14 = vadd.f32 %v743_v3, %v697_v11  ;;  %v718_v24 = vadd.f32 %v3304_v12, %v3005_v62 }
 0x2c0   :  { %v709_v15 = vpop.f32.mrf.mxu1 }
 0x2c1   :  { %v745_v16 = vadd.f32 %v744_v14, %v702_v5  ;;  %v710_v13 = vadd.f32 %v3005_v62, %v709_v15 }
 0x2c2   :  { %v3305_v17 = vpop.f32.mrf.mxu1 }
 0x2c3   :  { %v746_v20 = vadd.f32 %v745_v16, %v705_v9  ;;  %v721_v21 = vadd.f32 %v3305_v17, %v3005_v62 }
 0x2c4   :  { %v712_v22 = vpop.f32.mrf.mxu1 }
 0x2c5   :  { %v747_v18 = vadd.f32 %v746_v20, %v710_v13  ;;  %v713_v23 = vadd.f32 %v3005_v62, %v712_v22 }
 0x2c6   :  { %v3308_v19 = vpop.f32.mrf.mxu1 }
 0x2c7   :  { %v748_v25 = vadd.f32 %v747_v18, %v713_v23  ;;  %v734_v43 = vadd.f32 %v3308_v19, %v3005_v62 }
 0x2c8   :  { %v725_v27 = vpop.f32.mrf.mxu1 }
 0x2c9   :  { %v749_v28 = vadd.f32 %v748_v25, %v718_v24  ;;  %v726_v30 = vadd.f32 %v3005_v62, %v725_v27 }
 0x2ca   :  { %v3309_v29 = vpop.f32.mrf.mxu1 }
 0x2cb   :  { %v750_v31 = vadd.f32 %v749_v28, %v721_v21  ;;  %v737_v47 = vadd.f32 %v3309_v29, %v3005_v62 }
 0x2cc   :  { %v728_v38 = vpop.f32.mrf.mxu1 }
 0x2cd   :  { %v751_v39 = vadd.f32 %v750_v31, %v726_v30  ;;  %v729_v42 = vadd.f32 %v3005_v62, %v728_v38 }
 0x2cf   :  { %v752_v46 = vadd.f32 %v751_v39, %v729_v42 }
 0x2d1   :  { %v753_v49 = vadd.f32 %v752_v46, %v734_v43 }
 0x2d3   :  { %v754_v32 = vadd.f32 %v753_v49, %v737_v47 }
 0x2d5   :  { %v755_v34 = vrot.slane %v754_v32, 4 }
 0x2d7   :  { %v756_v36 = vadd.f32 %v755_v34, %v754_v32 }
 0x2d9   :  { %v757_v40 = vrot.slane %v756_v36, 2 }
 0x2db   :  { %v758_v26 = vadd.f32 %v757_v40, %v756_v36 }
 0x2dd   :  { %v759_v44 = vrot.slane %v758_v26, 1 }
 0x2df   :  { %v760_v50 = vadd.f32 %v759_v44, %v758_v26 }
 0x2e1   :  { %v761_v54 = vmul.f32 0.0078125, %v760_v50 }
 0x2e3   :  { %v762_v55 = vsub.f32 %v678_v51, %v761_v54  ;;  %v763_v48 = vsub.f32 %v681_v0, %v761_v54  ;;  %v764_v52 = vsub.f32 %v686_v53, %v761_v54  ;;  %v765_v33 = vsub.f32 %v689_v57, %v761_v54 }
 0x2e4   :  { %v766_v35 = vsub.f32 %v694_v61, %v761_v54  ;;  %v767_v60 = vsub.f32 %v697_v11, %v761_v54  ;;  %v768_v62 = vsub.f32 %v702_v5, %v761_v54  ;;  %v769_v2 = vsub.f32 %v705_v9, %v761_v54 }
 0x2e5   :  { %v778_v56 = vmul.f32 %v762_v55, %v762_v55  ;;  %v779_v58 = vmul.f32 %v763_v48, %v763_v48  ;;  %v780_v37 = vmul.f32 %v764_v52, %v764_v52  ;;  %v781_v41 = vmul.f32 %v765_v33, %v765_v33 }
 0x2e6   :  { %v782_v63 = vmul.f32 %v766_v35, %v766_v35  ;;  %v783_v4 = vmul.f32 %v767_v60, %v767_v60  ;;  %v770_v7 = vsub.f32 %v710_v13, %v761_v54  ;;  %v784_v8 = vmul.f32 %v768_v62, %v768_v62 }
 0x2e7   :  { %v794_v59 = vadd.f32 %v779_v58, %v778_v56  ;;  %v771_v0 = vsub.f32 %v713_v23, %v761_v54  ;;  %v785_v53 = vmul.f32 %v769_v2, %v769_v2  ;;  %v772_v3 = vsub.f32 %v718_v24, %v761_v54 }
 0x2e8   :  { %v786_v57 = vmul.f32 %v770_v7, %v770_v7  ;;  %v773_v12 = vsub.f32 %v721_v21, %v761_v54  ;;  %v774_v15 = vsub.f32 %v726_v30, %v761_v54  ;;  %v775_v17 = vsub.f32 %v729_v42, %v761_v54 }
 0x2e9   :  { %v795_v45 = vadd.f32 %v794_v59, %v780_v37  ;;  %v787_v14 = vmul.f32 %v771_v0, %v771_v0  ;;  %v788_v16 = vmul.f32 %v772_v3, %v772_v3  ;;  %v776_v22 = vsub.f32 %v734_v43, %v761_v54 }
 0x2ea   :  { %v789_v20 = vmul.f32 %v773_v12, %v773_v12  ;;  %v790_v18 = vmul.f32 %v774_v15, %v774_v15  ;;  %v777_v19 = vsub.f32 %v737_v47, %v761_v54  ;;  %v791_v25 = vmul.f32 %v775_v17, %v775_v17 }
 0x2eb   :  { %v796_v1 = vadd.f32 %v795_v45, %v781_v41  ;;  %v792_v27 = vmul.f32 %v776_v22, %v776_v22 }
 0x2ec   :  { %v793_v24 = vmul.f32 %v777_v19, %v777_v19 }
 0x2ed   :  { %v797_v6 = vadd.f32 %v796_v1, %v782_v63 }
 0x2ef   :  { %v798_v51 = vadd.f32 %v797_v6, %v783_v4 }
 0x2f1   :  { %v799_v10 = vadd.f32 %v798_v51, %v784_v8 }
 0x2f3   :  { %v800_v61 = vadd.f32 %v799_v10, %v785_v53 }
 0x2f5   :  { %v801_v11 = vadd.f32 %v800_v61, %v786_v57 }
 0x2f7   :  { %v802_v5 = vadd.f32 %v801_v11, %v787_v14 }
 0x2f9   :  { %v803_v9 = vadd.f32 %v802_v5, %v788_v16 }
 0x2fb   :  { %v804_v13 = vadd.f32 %v803_v9, %v789_v20 }
 0x2fd   :  { %v805_v23 = vadd.f32 %v804_v13, %v790_v18  ;;  %v3620_v18 = vld [vmem:[#allocation10 + $0x10] sm:$0xff]   ;;  %v3621_v13 = vld [vmem:[#allocation10 + $0x8] sm:$0xff]  }
 0x2ff   :  { %v806_v28 = vadd.f32 %v805_v23, %v791_v25 }
 0x301   :  { %v807_v29 = vadd.f32 %v806_v28, %v792_v27  ;;  %v3014_v28 = vld [vmem:[%s4296_s13] ss:$0 sm:$0xff] }
 0x303   :  { %v808_v31 = vadd.f32 %v807_v29, %v793_v24 }
 0x305   :  { %v809_v21 = vrot.slane %v808_v31, 4 }
 0x307   :  { %v810_v38 = vadd.f32 %v809_v21, %v808_v31 }
 0x309   :  { %v811_v39 = vrot.slane %v810_v38, 2 }
 0x30b   :  { %v812_v30 = vadd.f32 %v811_v39, %v810_v38 }
 0x30d   :  { %v813_v46 = vrot.slane %v812_v30, 1 }
 0x30f   :  { %v814_v49 = vadd.f32 %v813_v46, %v812_v30 }
 0x311   :  { %v815_v42 = vmul.f32 0.0078125, %v814_v49 }
 0x313   :  { %v816_v32 = vadd.f32 1e-05, %v815_v42 }
 0x315   :  { %3673 = vrsqrt.f32 %v816_v32 }
 0x322   :  { %v3674_v43 = vpop.eup %3673 }
 0x323   :  { %v818_v34 = vmul.f32 %v3674_v43, %v762_v55  ;;  %v819_v36 = vmul.f32 %v3674_v43, %v763_v48  ;;  %v820_v47 = vmul.f32 %v3674_v43, %v764_v52  ;;  %v821_v40 = vmul.f32 %v3674_v43, %v765_v33 }
 0x324   :  { %v822_v26 = vmul.f32 %v3674_v43, %v766_v35  ;;  %v823_v44 = vmul.f32 %v3674_v43, %v767_v60  ;;  %v824_v63 = vmul.f32 %v3674_v43, %v768_v62  ;;  %v825_v1 = vmul.f32 %v3674_v43, %v769_v2 }
 0x325   :  { %v834_v50 = vmax.f32 %v818_v34, 0.0  ;;  %v835_v54 = vmax.f32 %v819_v36, 0.0  ;;  %v836_v56 = vmax.f32 %v820_v47, 0.0  ;;  %v837_v58 = vmax.f32 %v821_v40, 0.0 }
 0x326   :  { %v838_v37 = vmax.f32 %v822_v26, 0.0  ;;  %v839_v59 = vmax.f32 %v823_v44, 0.0  ;;  %v826_v6 = vmul.f32 %v3674_v43, %v770_v7  ;;  %v827_v8 = vmul.f32 %v3674_v43, %v771_v0 }
 0x327   :  { %v850_v41 = vpack.c.bf16 %v835_v54, %v834_v50  ;;  %v851_v45 = vpack.c.bf16 %v837_v58, %v836_v56  ;;  %v840_v55 = vmax.f32 %v824_v63, 0.0  ;;  %v841_v48 = vmax.f32 %v825_v1, 0.0 }
 0x328   :  { %v852_v4 = vpack.c.bf16 %v839_v59, %v838_v37  ;;  %v842_v52 = vmax.f32 %v826_v6, 0.0  ;;  %v843_v33 = vmax.f32 %v827_v8, 0.0  ;;  %v828_v60 = vmul.f32 %v3674_v43, %v772_v3  ;;  %v3615_v3 = vld [vmem:[#allocation10 + $0x38] sm:$0xff]  }
 0x329   :  { %3326 = vmatprep.mubr.bf16.mxu0 %v850_v41  ;;  %v853_v35 = vpack.c.bf16 %v841_v48, %v840_v55  ;;  %v829_v51 = vmul.f32 %v3674_v43, %v773_v12  ;;  %v831_v53 = vmul.f32 %v3674_v43, %v775_v17  ;;  %v830_v57 = vmul.f32 %v3674_v43, %v774_v15  ;;  %v3616_v12 = vld [vmem:[#allocation10 + $0x30] sm:$0xff]   ;;  %v3617_v15 = vld [vmem:[#allocation10 + $0x28] sm:$0xff]   ;;  %v3618_v17 = vld [vmem:[#allocation10 + $0x20] sm:$0xff]  }
 0x32a   :  { %3327 = vmatmul.mubr.bf16.vlgmr.msra.gmra.mxu0 %v851_v45  ;;  %v854_v10 = vpack.c.bf16 %v843_v33, %v842_v52  ;;  %v844_v62 = vmax.f32 %v828_v60, 0.0  ;;  %v832_v0 = vmul.f32 %v3674_v43, %v776_v22  ;;  %v833_v11 = vmul.f32 %v3674_v43, %v777_v19  ;;  %3342 = vmatprep.subr.bf16.mxu1 %v3615_v3  ;;  %v3619_v22 = vld [vmem:[#allocation10 + $0x18] sm:$0xff]   ;;  %v3622_v19 = vld [vmem:[#allocation10] sm:$0xff]  }
 0x32b   :  { %3330 = vmatprep.mubr.bf16.mxu0 %v852_v4  ;;  %v845_v2 = vmax.f32 %v829_v51, 0.0  ;;  %v847_v61 = vmax.f32 %v831_v53, 0.0  ;;  %v846_v14 = vmax.f32 %v830_v57, 0.0  ;;  %3343 = vmatpush3.bf16.msra.mxu1 %v3615_v3 }
 0x32c   :  { %v848_v5 = vmax.f32 %v832_v0, 0.0  ;;  %v849_v20 = vmax.f32 %v833_v11, 0.0  ;;  %3344 = vmatprep.subr.bf16.mxu1 %v3616_v12 }
 0x32d   :  { %v855_v7 = vpack.c.bf16 %v845_v2, %v844_v62  ;;  %v856_v16 = vpack.c.bf16 %v847_v61, %v846_v14 }
 0x32e   :  { %v857_v9 = vpack.c.bf16 %v849_v20, %v848_v5 }
 0x32f   :  { %3345 = vmatpush3.bf16.msra.mxu1 %v3616_v12 }
 0x330   :  { %3346 = vmatprep.subr.bf16.mxu1 %v3617_v15 }
 0x332   :  { %3331 = vmatmul.mubr.bf16.gmra.mxu0 %v853_v35 }
 0x333   :  { %3334 = vmatprep.mubr.bf16.mxu0 %v854_v10  ;;  %3347 = vmatpush3.bf16.msra.mxu1 %v3617_v15 }
 0x334   :  { %3348 = vmatprep.subr.bf16.mxu1 %v3618_v17 }
 0x337   :  { %3349 = vmatpush3.bf16.msra.mxu1 %v3618_v17 }
 0x338   :  { %3350 = vmatprep.subr.bf16.mxu1 %v3619_v22 }
 0x33a   :  { %3335 = vmatmul.mubr.bf16.gmra.mxu0 %v855_v7 }
 0x33b   :  { %3338 = vmatprep.mubr.bf16.mxu0 %v856_v16  ;;  %3351 = vmatpush3.bf16.msra.mxu1 %v3619_v22 }
 0x33c   :  { %3352 = vmatprep.subr.bf16.mxu1 %v3620_v18 }
 0x33f   :  { %3353 = vmatpush3.bf16.msra.mxu1 %v3620_v18 }
 0x340   :  { %3354 = vmatprep.subr.bf16.mxu1 %v3621_v13 }
 0x342   :  { %3339 = vmatmul.mubr.bf16.gmra.mxu0 %v857_v9 }
 0x343   :  { %3355 = vmatpush3.bf16.msra.mxu1 %v3621_v13 }
 0x344   :  { %3356 = vmatprep.subr.bf16.mxu1 %v3622_v19 }
 0x347   :  { %3357 = vmatpush3.bf16.msra.mxu1 %v3622_v19 }
 0x3ea   :  { %v3328_v25 = vpop.f32.mrf.mxu0 }
 0x3eb   :  { %v972_v38 = vadd.f32 %v3328_v25, %v3014_v28 }
 0x3ec   :  { %v963_v23 = vpop.f32.mrf.mxu0 }
 0x3ed   :  { %v964_v29 = vadd.f32 %v3014_v28, %v963_v23 }
 0x3ee   :  { %v3329_v27 = vpop.f32.mrf.mxu0 }
 0x3ef   :  { %v975_v46 = vadd.f32 %v3329_v27, %v3014_v28 }
 0x3f0   :  { %v966_v24 = vpop.f32.mrf.mxu0 }
 0x3f1   :  { %v967_v31 = vadd.f32 %v3014_v28, %v966_v24 }
 0x3f2   :  { %v3332_v21 = vpop.f32.mrf.mxu0 }
 0x3f3   :  { %v1026_v39 = vadd.f32 %v967_v31, %v964_v29  ;;  %v988_v26 = vadd.f32 %v3332_v21, %v3014_v28 }
 0x3f4   :  { %v979_v30 = vpop.f32.mrf.mxu0 }
 0x3f5   :  { %v1027_v49 = vadd.f32 %v1026_v39, %v972_v38  ;;  %v980_v32 = vadd.f32 %v3014_v28, %v979_v30 }
 0x3f6   :  { %v3333_v42 = vpop.f32.mrf.mxu0 }
 0x3f7   :  { %v1028_v43 = vadd.f32 %v1027_v49, %v975_v46  ;;  %v991_v54 = vadd.f32 %v3333_v42, %v3014_v28 }
 0x3f8   :  { %v982_v34 = vpop.f32.mrf.mxu0 }
 0x3f9   :  { %v1029_v36 = vadd.f32 %v1028_v43, %v980_v32  ;;  %v983_v47 = vadd.f32 %v3014_v28, %v982_v34 }
 0x3fa   :  { %v3336_v40 = vpop.f32.mrf.mxu0 }
 0x3fb   :  { %v1030_v44 = vadd.f32 %v1029_v36, %v983_v47  ;;  %v1004_v4 = vadd.f32 %v3336_v40, %v3014_v28 }
 0x3fc   :  { %v995_v50 = vpop.f32.mrf.mxu0 }
 0x3fd   :  { %v1031_v56 = vadd.f32 %v1030_v44, %v988_v26  ;;  %v996_v37 = vadd.f32 %v3014_v28, %v995_v50 }
 0x3fe   :  { %v3337_v58 = vpop.f32.mrf.mxu0 }
 0x3ff   :  { %v1032_v59 = vadd.f32 %v1031_v56, %v991_v54  ;;  %v1007_v55 = vadd.f32 %v3337_v58, %v3014_v28 }
 0x400   :  { %v998_v41 = vpop.f32.mrf.mxu0 }
 0x401   :  { %v1033_v45 = vadd.f32 %v1032_v59, %v996_v37  ;;  %v999_v63 = vadd.f32 %v3014_v28, %v998_v41 }
 0x402   :  { %v3340_v1 = vpop.f32.mrf.mxu0 }
 0x403   :  { %v1034_v6 = vadd.f32 %v1033_v45, %v999_v63  ;;  %v1020_v10 = vadd.f32 %v3340_v1, %v3014_v28 }
 0x404   :  { %v1011_v8 = vpop.f32.mrf.mxu0 }
 0x405   :  { %v1035_v48 = vadd.f32 %v1034_v6, %v1004_v4  ;;  %v1012_v33 = vadd.f32 %v3014_v28, %v1011_v8 }
 0x406   :  { %v3341_v52 = vpop.f32.mrf.mxu0 }
 0x407   :  { %v1036_v35 = vadd.f32 %v1035_v48, %v1007_v55  ;;  %v1023_v62 = vadd.f32 %v3341_v52, %v3014_v28 }
 0x408   :  { %v1014_v60 = vpop.f32.mrf.mxu0 }
 0x409   :  { %v1037_v51 = vadd.f32 %v1036_v35, %v1012_v33  ;;  %v1015_v53 = vadd.f32 %v3014_v28, %v1014_v60 }
 0x40b   :  { %v1038_v57 = vadd.f32 %v1037_v51, %v1015_v53 }
 0x40d   :  { %v1039_v2 = vadd.f32 %v1038_v57, %v1020_v10 }
 0x40f   :  { %v1040_v61 = vadd.f32 %v1039_v2, %v1023_v62 }
 0x411   :  { %v1041_v14 = vrot.slane %v1040_v61, 4 }
 0x413   :  { %v1042_v7 = vadd.f32 %v1041_v14, %v1040_v61 }
 0x415   :  { %v1043_v0 = vrot.slane %v1042_v7, 2 }
 0x417   :  { %v1044_v11 = vadd.f32 %v1043_v0, %v1042_v7 }
 0x419   :  { %v1045_v16 = vrot.slane %v1044_v11, 1 }
 0x41b   :  { %v1046_v5 = vadd.f32 %v1045_v16, %v1044_v11 }
 0x41d   :  { %v1047_v20 = vmul.f32 0.0078125, %v1046_v5 }
 0x41f   :  { %v1048_v9 = vsub.f32 %v964_v29, %v1047_v20  ;;  %v1049_v3 = vsub.f32 %v967_v31, %v1047_v20  ;;  %v1050_v12 = vsub.f32 %v972_v38, %v1047_v20  ;;  %v1051_v22 = vsub.f32 %v975_v46, %v1047_v20 }
 0x420   :  { %v1052_v18 = vsub.f32 %v980_v32, %v1047_v20  ;;  %v1053_v25 = vsub.f32 %v983_v47, %v1047_v20  ;;  %v1054_v28 = vsub.f32 %v988_v26, %v1047_v20  ;;  %v1055_v39 = vsub.f32 %v991_v54, %v1047_v20 }
 0x421   :  { %v1064_v15 = vmul.f32 %v1048_v9, %v1048_v9  ;;  %v1065_v17 = vmul.f32 %v1049_v3, %v1049_v3  ;;  %v1066_v13 = vmul.f32 %v1050_v12, %v1050_v12  ;;  %v1067_v23 = vmul.f32 %v1051_v22, %v1051_v22 }
 0x422   :  { %v1068_v24 = vmul.f32 %v1052_v18, %v1052_v18  ;;  %v1069_v30 = vmul.f32 %v1053_v25, %v1053_v25  ;;  %v1056_v42 = vsub.f32 %v996_v37, %v1047_v20  ;;  %v1070_v43 = vmul.f32 %v1054_v28, %v1054_v28 }
 0x423   :  { %v1080_v19 = vadd.f32 %v1065_v17, %v1064_v15  ;;  %v1057_v31 = vsub.f32 %v999_v63, %v1047_v20  ;;  %v1071_v38 = vmul.f32 %v1055_v39, %v1055_v39  ;;  %v1058_v36 = vsub.f32 %v1004_v4, %v1047_v20 }
 0x424   :  { %v1072_v46 = vmul.f32 %v1056_v42, %v1056_v42  ;;  %v1059_v40 = vsub.f32 %v1007_v55, %v1047_v20  ;;  %v1060_v50 = vsub.f32 %v1012_v33, %v1047_v20  ;;  %v1061_v58 = vsub.f32 %v1015_v53, %v1047_v20 }
 0x425   :  { %v1081_v27 = vadd.f32 %v1080_v19, %v1066_v13  ;;  %v1073_v44 = vmul.f32 %v1057_v31, %v1057_v31  ;;  %v1074_v56 = vmul.f32 %v1058_v36, %v1058_v36  ;;  %v1062_v41 = vsub.f32 %v1020_v10, %v1047_v20 }
 0x426   :  { %v1075_v59 = vmul.f32 %v1059_v40, %v1059_v40  ;;  %v1076_v45 = vmul.f32 %v1060_v50, %v1060_v50  ;;  %v1063_v1 = vsub.f32 %v1023_v62, %v1047_v20  ;;  %v1077_v6 = vmul.f32 %v1061_v58, %v1061_v58 }
 0x427   :  { %v1082_v21 = vadd.f32 %v1081_v27, %v1067_v23  ;;  %v1078_v8 = vmul.f32 %v1062_v41, %v1062_v41 }
 0x428   :  { %v1079_v4 = vmul.f32 %v1063_v1, %v1063_v1 }
 0x429   :  { %v1083_v49 = vadd.f32 %v1082_v21, %v1068_v24 }
 0x42b   :  { %v1084_v29 = vadd.f32 %v1083_v49, %v1069_v30 }
 0x42d   :  { %v1085_v34 = vadd.f32 %v1084_v29, %v1070_v43 }
 0x42f   :  { %v1086_v32 = vadd.f32 %v1085_v34, %v1071_v38 }
 0x431   :  { %v1087_v47 = vadd.f32 %v1086_v32, %v1072_v46 }
 0x433   :  { %v1088_v26 = vadd.f32 %v1087_v47, %v1073_v44 }
 0x435   :  { %v1089_v54 = vadd.f32 %v1088_v26, %v1074_v56 }
 0x437   :  { %v1090_v37 = vadd.f32 %v1089_v54, %v1075_v59 }
 0x439   :  { %v1091_v63 = vadd.f32 %v1090_v37, %v1076_v45  ;;  %v3628_v45 = vld [vmem:[#allocation11 + $0x10] sm:$0xff]   ;;  %v3629_v37 = vld [vmem:[#allocation11 + $0x8] sm:$0xff]  }
 0x43b   :  { %v1092_v48 = vadd.f32 %v1091_v63, %v1077_v6 }
 0x43d   :  { %v1093_v52 = vadd.f32 %v1092_v48, %v1078_v8  ;;  %v3023_v48 = vld [vmem:[%s4297_s14] ss:$0 sm:$0xff] }
 0x43f   :  { %v1094_v35 = vadd.f32 %v1093_v52, %v1079_v4 }
 0x441   :  { %v1095_v55 = vrot.slane %v1094_v35, 4 }
 0x443   :  { %v1096_v60 = vadd.f32 %v1095_v55, %v1094_v35 }
 0x445   :  { %v1097_v51 = vrot.slane %v1096_v60, 2 }
 0x447   :  { %v1098_v33 = vadd.f32 %v1097_v51, %v1096_v60 }
 0x449   :  { %v1099_v57 = vrot.slane %v1098_v33, 1 }
 0x44b   :  { %v1100_v2 = vadd.f32 %v1099_v57, %v1098_v33 }
 0x44d   :  { %v1101_v53 = vmul.f32 0.0078125, %v1100_v2 }
 0x44f   :  { %v1102_v61 = vadd.f32 1e-05, %v1101_v53 }
 0x451   :  { %3675 = vrsqrt.f32 %v1102_v61 }
 0x45e   :  { %v3676_v10 = vpop.eup %3675 }
 0x45f   :  { %v1104_v14 = vmul.f32 %v3676_v10, %v1048_v9  ;;  %v1105_v7 = vmul.f32 %v3676_v10, %v1049_v3  ;;  %v1106_v62 = vmul.f32 %v3676_v10, %v1050_v12  ;;  %v1107_v0 = vmul.f32 %v3676_v10, %v1051_v22 }
 0x460   :  { %v1108_v11 = vmul.f32 %v3676_v10, %v1052_v18  ;;  %v1109_v16 = vmul.f32 %v3676_v10, %v1053_v25  ;;  %v1110_v24 = vmul.f32 %v3676_v10, %v1054_v28  ;;  %v1111_v21 = vmul.f32 %v3676_v10, %v1055_v39 }
 0x461   :  { %v1120_v5 = vmax.f32 %v1104_v14, 0.0  ;;  %v1121_v20 = vmax.f32 %v1105_v7, 0.0  ;;  %v1122_v15 = vmax.f32 %v1106_v62, 0.0  ;;  %v1123_v17 = vmax.f32 %v1107_v0, 0.0 }
 0x462   :  { %v1124_v13 = vmax.f32 %v1108_v11, 0.0  ;;  %v1125_v19 = vmax.f32 %v1109_v16, 0.0  ;;  %v1112_v49 = vmul.f32 %v3676_v10, %v1056_v42  ;;  %v1113_v43 = vmul.f32 %v3676_v10, %v1057_v31 }
 0x463   :  { %v1136_v23 = vpack.c.bf16 %v1121_v20, %v1120_v5  ;;  %v1137_v27 = vpack.c.bf16 %v1123_v17, %v1122_v15  ;;  %v1126_v9 = vmax.f32 %v1110_v24, 0.0  ;;  %v1127_v3 = vmax.f32 %v1111_v21, 0.0 }
 0x464   :  { %v1138_v30 = vpack.c.bf16 %v1125_v19, %v1124_v13  ;;  %v1128_v12 = vmax.f32 %v1112_v49, 0.0  ;;  %v1129_v22 = vmax.f32 %v1113_v43, 0.0  ;;  %v1114_v25 = vmul.f32 %v3676_v10, %v1058_v36  ;;  %v3623_v36 = vld [vmem:[#allocation11 + $0x38] sm:$0xff]   ;;  %v3632_v49 = vld [vmem:[#allocation13 + $0x30] sm:$0xff]  }
 0x465   :  { %3358 = vmatprep.mubr.bf16.mxu1 %v1136_v23  ;;  %v1139_v18 = vpack.c.bf16 %v1127_v3, %v1126_v9  ;;  %v1115_v29 = vmul.f32 %v3676_v10, %v1059_v40  ;;  %v1117_v38 = vmul.f32 %v3676_v10, %v1061_v58  ;;  %v1116_v46 = vmul.f32 %v3676_v10, %v1060_v50  ;;  %v3624_v40 = vld [vmem:[#allocation11 + $0x30] sm:$0xff]   ;;  %v3625_v50 = vld [vmem:[#allocation11 + $0x28] sm:$0xff]   ;;  %v3626_v58 = vld [vmem:[#allocation11 + $0x20] sm:$0xff]  }
 0x466   :  { %3359 = vmatmul.mubr.bf16.vlgmr.msra.gmra.mxu1 %v1137_v27  ;;  %v1140_v34 = vpack.c.bf16 %v1129_v22, %v1128_v12  ;;  %v1130_v28 = vmax.f32 %v1114_v25, 0.0  ;;  %v1118_v31 = vmul.f32 %v3676_v10, %v1062_v41  ;;  %v1119_v47 = vmul.f32 %v3676_v10, %v1063_v1  ;;  %3374 = vmatprep.subr.bf16.mxu0 %v3623_v36  ;;  %v3627_v41 = vld [vmem:[#allocation11 + $0x18] sm:$0xff]   ;;  %v3630_v1 = vld [vmem:[#allocation11] sm:$0xff]   ;;  %v3633_v25 = vld [vmem:[#allocation13 + $0x28] sm:$0xff]  }
 0x467   :  { %3362 = vmatprep.mubr.bf16.mxu1 %v1138_v30  ;;  %v1131_v39 = vmax.f32 %v1115_v29, 0.0  ;;  %v1133_v32 = vmax.f32 %v1117_v38, 0.0  ;;  %v1132_v44 = vmax.f32 %v1116_v46, 0.0  ;;  %3375 = vmatpush3.bf16.msra.mxu0 %v3623_v36  ;;  %v3631_v30 = vld [vmem:[#allocation13 + $0x38] sm:$0xff]  }
 0x468   :  { %v1134_v26 = vmax.f32 %v1118_v31, 0.0  ;;  %v1135_v59 = vmax.f32 %v1119_v47, 0.0  ;;  %3376 = vmatprep.subr.bf16.mxu0 %v3624_v40  ;;  %3406 = vmatprep.subr.bf16.mxu1 %v3631_v30  ;;  %v3635_v47 = vld [vmem:[#allocation13 + $0x18] sm:$0xff]  }
 0x469   :  { %v1141_v42 = vpack.c.bf16 %v1131_v39, %v1130_v28  ;;  %v1142_v56 = vpack.c.bf16 %v1133_v32, %v1132_v44  ;;  %3407 = vmatpush3.bf16.msra.mxu1 %v3631_v30  ;;  %v3634_v39 = vld [vmem:[#allocation13 + $0x20] sm:$0xff]  }
 0x46a   :  { %v1143_v54 = vpack.c.bf16 %v1135_v59, %v1134_v26  ;;  %3408 = vmatprep.subr.bf16.mxu1 %v3632_v49  ;;  %v3636_v59 = vld [vmem:[#allocation13 + $0x10] sm:$0xff]  }
 0x46b   :  { %3377 = vmatpush3.bf16.msra.mxu0 %v3624_v40 }
 0x46c   :  { %3378 = vmatprep.subr.bf16.mxu0 %v3625_v50 }
 0x46d   :  { %3409 = vmatpush3.bf16.msra.mxu1 %v3632_v49 }
 0x46e   :  { %3363 = vmatmul.mubr.bf16.gmra.mxu1 %v1139_v18  ;;  %3410 = vmatprep.subr.bf16.mxu1 %v3633_v25 }
 0x46f   :  { %3366 = vmatprep.mubr.bf16.mxu1 %v1140_v34  ;;  %3379 = vmatpush3.bf16.msra.mxu0 %v3625_v50 }
 0x470   :  { %3380 = vmatprep.subr.bf16.mxu0 %v3626_v58 }
 0x471   :  { %3411 = vmatpush3.bf16.msra.mxu1 %v3633_v25 }
 0x472   :  { %3412 = vmatprep.subr.bf16.mxu1 %v3634_v39 }
 0x473   :  { %3381 = vmatpush3.bf16.msra.mxu0 %v3626_v58 }
 0x474   :  { %3382 = vmatprep.subr.bf16.mxu0 %v3627_v41 }
 0x475   :  { %3413 = vmatpush3.bf16.msra.mxu1 %v3634_v39 }
 0x476   :  { %3367 = vmatmul.mubr.bf16.gmra.mxu1 %v1141_v42  ;;  %3414 = vmatprep.subr.bf16.mxu1 %v3635_v47 }
 0x477   :  { %3370 = vmatprep.mubr.bf16.mxu1 %v1142_v56  ;;  %3383 = vmatpush3.bf16.msra.mxu0 %v3627_v41 }
 0x478   :  { %3384 = vmatprep.subr.bf16.mxu0 %v3628_v45 }
 0x479   :  { %3415 = vmatpush3.bf16.msra.mxu1 %v3635_v47 }
 0x47a   :  { %3416 = vmatprep.subr.bf16.mxu1 %v3636_v59 }
 0x47b   :  { %3385 = vmatpush3.bf16.msra.mxu0 %v3628_v45 }
 0x47c   :  { %3386 = vmatprep.subr.bf16.mxu0 %v3629_v37 }
 0x47d   :  { %3417 = vmatpush3.bf16.msra.mxu1 %v3636_v59 }
 0x47e   :  { %3371 = vmatmul.mubr.bf16.gmra.mxu1 %v1143_v54 }
 0x47f   :  { %3387 = vmatpush3.bf16.msra.mxu0 %v3629_v37 }
 0x480   :  { %3388 = vmatprep.subr.bf16.mxu0 %v3630_v1 }
 0x483   :  { %3389 = vmatpush3.bf16.msra.mxu0 %v3630_v1 }
 0x526   :  { %v3360_v6 = vpop.f32.mrf.mxu1 }
 0x527   :  { %v4195_v60 = vadd.f32 %v3360_v6, %v3023_v48 }
 0x528   :  { %v1249_v63 = vpop.f32.mrf.mxu1 }
 0x529   :  { %v4191_v52 = vadd.f32 %v3023_v48, %v1249_v63 }
 0x52a   :  { %v3361_v8 = vpop.f32.mrf.mxu1 }
 0x52b   :  { %v4199_v57 = vadd.f32 %v3361_v8, %v3023_v48 }
 0x52c   :  { %v1252_v4 = vpop.f32.mrf.mxu1 }
 0x52d   :  { %v4193_v35 = vadd.f32 %v3023_v48, %v1252_v4 }
 0x52e   :  { %v3364_v55 = vpop.f32.mrf.mxu1 }
 0x52f   :  { %v1312_v51 = vadd.f32 %v4193_v35, %v4191_v52  ;;  %v4208_v11 = vadd.f32 %v3364_v55, %v3023_v48 }
 0x530   :  { %v1265_v33 = vpop.f32.mrf.mxu1 }
 0x531   :  { %v1313_v2 = vadd.f32 %v1312_v51, %v4195_v60  ;;  %v4202_v61 = vadd.f32 %v3023_v48, %v1265_v33 }
 0x532   :  { %v3365_v53 = vpop.f32.mrf.mxu1 }
 0x533   :  { %v1314_v10 = vadd.f32 %v1313_v2, %v4199_v57  ;;  %v4211_v20 = vadd.f32 %v3365_v53, %v3023_v48 }
 0x534   :  { %v1268_v14 = vpop.f32.mrf.mxu1 }
 0x535   :  { %v1315_v7 = vadd.f32 %v1314_v10, %v4202_v61  ;;  %v4206_v62 = vadd.f32 %v3023_v48, %v1268_v14 }
 0x536   :  { %v3368_v0 = vpop.f32.mrf.mxu1 }
 0x537   :  { %v1316_v16 = vadd.f32 %v1315_v7, %v4206_v62  ;;  %v4220_v43 = vadd.f32 %v3368_v0, %v3023_v48 }
 0x538   :  { %v1281_v5 = vpop.f32.mrf.mxu1 }
 0x539   :  { %v1317_v15 = vadd.f32 %v1316_v16, %v4208_v11  ;;  %v4214_v13 = vadd.f32 %v3023_v48, %v1281_v5 }
 0x53a   :  { %v3369_v17 = vpop.f32.mrf.mxu1 }
 0x53b   :  { %v1318_v19 = vadd.f32 %v1317_v15, %v4211_v20  ;;  %v1293_v12 = vadd.f32 %v3369_v17, %v3023_v48 }
 0x53c   :  { %v1284_v23 = vpop.f32.mrf.mxu1 }
 0x53d   :  { %v1319_v27 = vadd.f32 %v1318_v19, %v4214_v13  ;;  %v4218_v24 = vadd.f32 %v3023_v48, %v1284_v23 }
 0x53e   :  { %v3372_v21 = vpop.f32.mrf.mxu1 }
 0x53f   :  { %v1320_v9 = vadd.f32 %v1319_v27, %v4218_v24  ;;  %v1306_v32 = vadd.f32 %v3372_v21, %v3023_v48 }
 0x540   :  { %v1297_v3 = vpop.f32.mrf.mxu1 }
 0x541   :  { %v1321_v22 = vadd.f32 %v1320_v9, %v4220_v43  ;;  %v1298_v29 = vadd.f32 %v3023_v48, %v1297_v3 }
 0x542   :  { %v3373_v18 = vpop.f32.mrf.mxu1 }
 0x543   :  { %v1322_v38 = vadd.f32 %v1321_v22, %v1293_v12  ;;  %v1309_v42 = vadd.f32 %v3373_v18, %v3023_v48 }
 0x544   :  { %v1300_v34 = vpop.f32.mrf.mxu1 }
 0x545   :  { %v1323_v46 = vadd.f32 %v1322_v38, %v1298_v29  ;;  %v1301_v28 = vadd.f32 %v3023_v48, %v1300_v34 }
 0x547   :  { %v1324_v44 = vadd.f32 %v1323_v46, %v1301_v28 }
 0x549   :  { %v1325_v31 = vadd.f32 %v1324_v44, %v1306_v32 }
 0x54b   :  { %v1326_v56 = vadd.f32 %v1325_v31, %v1309_v42 }
 0x54d   :  { %v1327_v26 = vrot.slane %v1326_v56, 4 }
 0x54f   :  { %v1328_v54 = vadd.f32 %v1327_v26, %v1326_v56 }
 0x551   :  { %v1329_v36 = vrot.slane %v1328_v54, 2 }
 0x553   :  { %v1330_v40 = vadd.f32 %v1329_v36, %v1328_v54 }
 0x555   :  { %v1331_v50 = vrot.slane %v1330_v40, 1 }
 0x557   :  { %v1332_v58 = vadd.f32 %v1331_v50, %v1330_v40 }
 0x559   :  { %v1333_v41 = vmul.f32 0.0078125, %v1332_v58 }
 0x55b   :  { %v1334_v45 = vsub.f32 %v4191_v52, %v1333_v41  ;;  %v1335_v37 = vsub.f32 %v4193_v35, %v1333_v41  ;;  %v1336_v1 = vsub.f32 %v4195_v60, %v1333_v41  ;;  %v1337_v8 = vsub.f32 %v4199_v57, %v1333_v41 }
 0x55c   :  { %v1338_v48 = vsub.f32 %v4202_v61, %v1333_v41  ;;  %v1339_v51 = vsub.f32 %v4206_v62, %v1333_v41  ;;  %v1340_v53 = vsub.f32 %v4208_v11, %v1333_v41  ;;  %v1341_v35 = vsub.f32 %v4211_v20, %v1333_v41 }
 0x55d   :  { %v1350_v6 = vmul.f32 %v1334_v45, %v1334_v45  ;;  %v1351_v63 = vmul.f32 %v1335_v37, %v1335_v37  ;;  %v1352_v4 = vmul.f32 %v1336_v1, %v1336_v1  ;;  %v1353_v33 = vmul.f32 %v1337_v8, %v1337_v8 }
 0x55e   :  { %v1354_v10 = vmul.f32 %v1338_v48, %v1338_v48  ;;  %v1355_v14 = vmul.f32 %v1339_v51, %v1339_v51  ;;  %v1342_v7 = vsub.f32 %v4214_v13, %v1333_v41  ;;  %v1356_v0 = vmul.f32 %v1340_v53, %v1340_v53 }
 0x55f   :  { %v1366_v55 = vadd.f32 %v1351_v63, %v1350_v6  ;;  %v1343_v61 = vsub.f32 %v4218_v24, %v1333_v41  ;;  %v1357_v16 = vmul.f32 %v1341_v35, %v1341_v35  ;;  %v1344_v62 = vsub.f32 %v4220_v43, %v1333_v41 }
 0x560   :  { %v1358_v15 = vmul.f32 %v1342_v7, %v1342_v7  ;;  %v1345_v19 = vsub.f32 %v1293_v12, %v1333_v41  ;;  %v1346_v27 = vsub.f32 %v1298_v29, %v1333_v41  ;;  %v1347_v30 = vsub.f32 %v1301_v28, %v1333_v41 }
 0x561   :  { %v1367_v2 = vadd.f32 %v1366_v55, %v1352_v4  ;;  %v1359_v11 = vmul.f32 %v1343_v61, %v1343_v61  ;;  %v1360_v21 = vmul.f32 %v1344_v62, %v1344_v62  ;;  %v1348_v13 = vsub.f32 %v1306_v32, %v1333_v41 }
 0x562   :  { %v1361_v49 = vmul.f32 %v1345_v19, %v1345_v19  ;;  %v1362_v3 = vmul.f32 %v1346_v27, %v1346_v27  ;;  %v1349_v18 = vsub.f32 %v1309_v42, %v1333_v41  ;;  %v1363_v24 = vmul.f32 %v1347_v30, %v1347_v30 }
 0x563   :  { %v1368_v52 = vadd.f32 %v1367_v2, %v1353_v33  ;;  %v1364_v38 = vmul.f32 %v1348_v13, %v1348_v13 }
 0x564   :  { %v1365_v43 = vmul.f32 %v1349_v18, %v1349_v18 }
 0x565   :  { %v1369_v60 = vadd.f32 %v1368_v52, %v1354_v10 }
 0x567   :  { %v1370_v57 = vadd.f32 %v1369_v60, %v1355_v14 }
 0x569   :  { %v1371_v5 = vadd.f32 %v1370_v57, %v1356_v0 }
 0x56b   :  { %v1372_v17 = vadd.f32 %v1371_v5, %v1357_v16 }
 0x56d   :  { %v1373_v23 = vadd.f32 %v1372_v17, %v1358_v15 }
 0x56f   :  { %v1374_v20 = vadd.f32 %v1373_v23, %v1359_v11 }
 0x571   :  { %v1375_v9 = vadd.f32 %v1374_v20, %v1360_v21 }
 0x573   :  { %v1376_v22 = vadd.f32 %v1375_v9, %v1361_v49 }
 0x575   :  { %v1377_v25 = vadd.f32 %v1376_v22, %v1362_v3 }
 0x577   :  { %v1378_v34 = vadd.f32 %v1377_v25, %v1363_v24 }
 0x579   :  { %v1379_v46 = vadd.f32 %v1378_v34, %v1364_v38 }
 0x57b   :  { %v1380_v39 = vadd.f32 %v1379_v46, %v1365_v43 }
 0x57d   :  { %v1381_v12 = vrot.slane %v1380_v39, 4 }
 0x57f   :  { %v1382_v44 = vadd.f32 %v1381_v12, %v1380_v39 }
 0x581   :  { %v1383_v31 = vrot.slane %v1382_v44, 2 }
 0x583   :  { %v1384_v29 = vadd.f32 %v1383_v31, %v1382_v44 }
 0x585   :  { %v1385_v47 = vrot.slane %v1384_v29, 1 }
 0x587   :  { %v1386_v56 = vadd.f32 %v1385_v47, %v1384_v29 }
 0x589   :  { %v1387_v28 = vmul.f32 0.0078125, %v1386_v56 }
 0x58b   :  { %v1388_v26 = vadd.f32 1e-05, %v1387_v28 }
 0x58d   :  { %3677 = vrsqrt.f32 %v1388_v26 }
 0x59a   :  { %v3678_v32 = vpop.eup %3677 }
 0x59b   :  { %v1390_v59 = vmul.f32 %v3678_v32, %v1334_v45  ;;  %v1391_v54 = vmul.f32 %v3678_v32, %v1335_v37  ;;  %v1392_v42 = vmul.f32 %v3678_v32, %v1336_v1  ;;  %v1393_v36 = vmul.f32 %v3678_v32, %v1337_v8 }
 0x59c   :  { %v1394_v40 = vmul.f32 %v3678_v32, %v1338_v48  ;;  %v1395_v50 = vmul.f32 %v3678_v32, %v1339_v51  ;;  %v1396_v10 = vmul.f32 %v3678_v32, %v1340_v53  ;;  %v1397_v52 = vmul.f32 %v3678_v32, %v1341_v35 }
 0x59d   :  { %v1406_v58 = vmax.f32 %v1390_v59, 0.0  ;;  %v1407_v41 = vmax.f32 %v1391_v54, 0.0  ;;  %v1408_v6 = vmax.f32 %v1392_v42, 0.0  ;;  %v1409_v63 = vmax.f32 %v1393_v36, 0.0 }
 0x59e   :  { %v1410_v4 = vmax.f32 %v1394_v40, 0.0  ;;  %v1411_v55 = vmax.f32 %v1395_v50, 0.0  ;;  %v1398_v60 = vmul.f32 %v3678_v32, %v1342_v7  ;;  %v1399_v0 = vmul.f32 %v3678_v32, %v1343_v61 }
 0x59f   :  { %v1422_v33 = vpack.c.bf16 %v1407_v41, %v1406_v58  ;;  %v1423_v2 = vpack.c.bf16 %v1409_v63, %v1408_v6  ;;  %v1412_v45 = vmax.f32 %v1396_v10, 0.0  ;;  %v1413_v37 = vmax.f32 %v1397_v52, 0.0 }
 0x5a0   :  { %v1424_v14 = vpack.c.bf16 %v1411_v55, %v1410_v4  ;;  %v1414_v1 = vmax.f32 %v1398_v60, 0.0  ;;  %v1415_v8 = vmax.f32 %v1399_v0, 0.0  ;;  %v1400_v51 = vmul.f32 %v3678_v32, %v1344_v62  ;;  %v3637_v62 = vld [vmem:[#allocation13 + $0x8] sm:$0xff]  }
 0x5a1   :  { %3390 = vmatprep.mubr.bf16.mxu0 %v1422_v33  ;;  %v1425_v48 = vpack.c.bf16 %v1413_v37, %v1412_v45  ;;  %v1401_v57 = vmul.f32 %v3678_v32, %v1345_v19  ;;  %v1403_v16 = vmul.f32 %v3678_v32, %v1347_v30  ;;  %v1402_v15 = vmul.f32 %v3678_v32, %v1346_v27  ;;  %v3638_v19 = vld [vmem:[#allocation13] sm:$0xff]   ;;  %v3639_v45 = vld [vmem:[#allocation14 + $0x38] sm:$0xff]   ;;  %v3640_v37 = vld [vmem:[#allocation14 + $0x30] sm:$0xff]  }
 0x5a2   :  { %3391 = vmatmul.mubr.bf16.vlgmr.msra.gmra.mxu0 %v1423_v2  ;;  %v1426_v5 = vpack.c.bf16 %v1415_v8, %v1414_v1  ;;  %v1416_v53 = vmax.f32 %v1400_v51, 0.0  ;;  %v1404_v61 = vmul.f32 %v3678_v32, %v1348_v13  ;;  %v1405_v23 = vmul.f32 %v3678_v32, %v1349_v18  ;;  %3418 = vmatprep.subr.bf16.mxu1 %v3637_v62  ;;  %v3032_v27 = vld [vmem:[%s4298_s15] ss:$0 sm:$0xff]  ;;  %v3641_v1 = vld [vmem:[#allocation14 + $0x28] sm:$0xff]   ;;  %v3644_v51 = vld [vmem:[#allocation14 + $0x10] sm:$0xff]  }
 0x5a3   :  { %3394 = vmatprep.mubr.bf16.mxu0 %v1424_v14  ;;  %v1417_v35 = vmax.f32 %v1401_v57, 0.0  ;;  %v1419_v17 = vmax.f32 %v1403_v16, 0.0  ;;  %v1418_v11 = vmax.f32 %v1402_v15, 0.0  ;;  %3419 = vmatpush3.bf16.msra.mxu1 %v3637_v62  ;;  %v3642_v8 = vld [vmem:[#allocation14 + $0x20] sm:$0xff]   ;;  %v3645_v57 = vld [vmem:[#allocation14 + $0x8] sm:$0xff]  }
 0x5a4   :  { %v1420_v20 = vmax.f32 %v1404_v61, 0.0  ;;  %v1421_v49 = vmax.f32 %v1405_v23, 0.0  ;;  %3420 = vmatprep.subr.bf16.mxu1 %v3638_v19  ;;  %3438 = vmatprep.subr.bf16.mxu0 %v3639_v45  ;;  %v3646_v16 = vld [vmem:[#allocation14] sm:$0xff]  }
 0x5a5   :  { %v1427_v7 = vpack.c.bf16 %v1417_v35, %v1416_v53  ;;  %v1428_v21 = vpack.c.bf16 %v1419_v17, %v1418_v11  ;;  %3439 = vmatpush3.bf16.msra.mxu0 %v3639_v45  ;;  %v3041_v53 = vld [vmem:[%s4299_s16] ss:$0 sm:$0xff] }
 0x5a6   :  { %v1429_v9 = vpack.c.bf16 %v1421_v49, %v1420_v20  ;;  %3440 = vmatprep.subr.bf16.mxu0 %v3640_v37 }
 0x5a7   :  { %3421 = vmatpush3.bf16.msra.mxu1 %v3638_v19 }
 0x5a9   :  { %3441 = vmatpush3.bf16.msra.mxu0 %v3640_v37 }
 0x5aa   :  { %3395 = vmatmul.mubr.bf16.gmra.mxu0 %v1425_v48  ;;  %3442 = vmatprep.subr.bf16.mxu0 %v3641_v1  ;;  %v3643_v48 = vld [vmem:[#allocation14 + $0x18] sm:$0xff]  }
 0x5ab   :  { %3398 = vmatprep.mubr.bf16.mxu0 %v1426_v5 }
 0x5ad   :  { %3443 = vmatpush3.bf16.msra.mxu0 %v3641_v1 }
 0x5ae   :  { %3444 = vmatprep.subr.bf16.mxu0 %v3642_v8 }
 0x5b1   :  { %3445 = vmatpush3.bf16.msra.mxu0 %v3642_v8 }
 0x5b2   :  { %3399 = vmatmul.mubr.bf16.gmra.mxu0 %v1427_v7  ;;  %3446 = vmatprep.subr.bf16.mxu0 %v3643_v48 }
 0x5b3   :  { %3402 = vmatprep.mubr.bf16.mxu0 %v1428_v21 }
 0x5b5   :  { %3447 = vmatpush3.bf16.msra.mxu0 %v3643_v48 }
 0x5b6   :  { %3448 = vmatprep.subr.bf16.mxu0 %v3644_v51 }
 0x5b9   :  { %3449 = vmatpush3.bf16.msra.mxu0 %v3644_v51 }
 0x5ba   :  { %3403 = vmatmul.mubr.bf16.gmra.mxu0 %v1429_v9  ;;  %3450 = vmatprep.subr.bf16.mxu0 %v3645_v57 }
 0x5bd   :  { %3451 = vmatpush3.bf16.msra.mxu0 %v3645_v57 }
 0x5be   :  { %3452 = vmatprep.subr.bf16.mxu0 %v3646_v16 }
 0x5c1   :  { %3453 = vmatpush3.bf16.msra.mxu0 %v3646_v16 }
 0x662   :  { %v3392_v30 = vpop.f32.mrf.mxu0 }
 0x663   :  { %v1544_v13 = vadd.f32 %v3392_v30, %v3032_v27 }
 0x664   :  { %v1535_v3 = vpop.f32.mrf.mxu0 }
 0x665   :  { %1600 = vst [vmem:[#allocation20 + $0x10] sm:$0xff] %v1544_v13  ;;  %v1536_v22 = vadd.f32 %v3032_v27, %v1535_v3 }
 0x666   :  { %v3393_v18 = vpop.f32.mrf.mxu0 }
 0x667   :  { %1598 = vst [vmem:[#allocation20] sm:$0xff] %v1536_v22  ;;  %v1547_v24 = vadd.f32 %v3393_v18, %v3032_v27 }
 0x668   :  { %v1538_v25 = vpop.f32.mrf.mxu0 }
 0x669   :  { %1601 = vst [vmem:[#allocation20 + $0x18] sm:$0xff] %v1547_v24  ;;  %v1539_v38 = vadd.f32 %v3032_v27, %v1538_v25  ;;  %v1615_v39 = vpack.c.bf16 %v1547_v24, %v1544_v13 }
 0x66a   :  { %v3396_v34 = vpop.f32.mrf.mxu0 }
 0x66b   :  { %1599 = vst [vmem:[#allocation20 + $0x8] sm:$0xff] %v1539_v38  ;;  %v1614_v43 = vpack.c.bf16 %v1539_v38, %v1536_v22  ;;  %v1560_v46 = vadd.f32 %v3396_v34, %v3032_v27 }
 0x66c   :  { %v1551_v12 = vpop.f32.mrf.mxu0 }
 0x66d   :  { %1604 = vst [vmem:[#allocation20 + $0x30] sm:$0xff] %v1560_v46  ;;  %v1552_v44 = vadd.f32 %v3032_v27, %v1551_v12  ;;  %3422 = vmatprep.mubr.bf16.mxu1 %v1614_v43 }
 0x66e   :  { %v3397_v31 = vpop.f32.mrf.mxu0  ;;  %3423 = vmatmul.mubr.bf16.vlgmr.msra.gmra.mxu1 %v1615_v39 }
 0x66f   :  { %1602 = vst [vmem:[#allocation20 + $0x20] sm:$0xff] %v1552_v44  ;;  %v1563_v29 = vadd.f32 %v3397_v31, %v3032_v27 }
 0x670   :  { %v1554_v47 = vpop.f32.mrf.mxu0 }
 0x671   :  { %1605 = vst [vmem:[#allocation20 + $0x38] sm:$0xff] %v1563_v29  ;;  %v1555_v56 = vadd.f32 %v3032_v27, %v1554_v47  ;;  %v1617_v59 = vpack.c.bf16 %v1563_v29, %v1560_v46 }
 0x672   :  { %v3400_v28 = vpop.f32.mrf.mxu0 }
 0x673   :  { %1603 = vst [vmem:[#allocation20 + $0x28] sm:$0xff] %v1555_v56  ;;  %v1616_v26 = vpack.c.bf16 %v1555_v56, %v1552_v44  ;;  %v1576_v32 = vadd.f32 %v3400_v28, %v3032_v27 }
 0x674   :  { %v1567_v54 = vpop.f32.mrf.mxu0 }
 0x675   :  { %1608 = vst [vmem:[#allocation20 + $0x50] sm:$0xff] %v1576_v32  ;;  %v1568_v42 = vadd.f32 %v3032_v27, %v1567_v54  ;;  %3426 = vmatprep.mubr.bf16.mxu1 %v1616_v26 }
 0x676   :  { %v3401_v36 = vpop.f32.mrf.mxu0  ;;  %3427 = vmatmul.mubr.bf16.gmra.mxu1 %v1617_v59 }
 0x677   :  { %1606 = vst [vmem:[#allocation20 + $0x40] sm:$0xff] %v1568_v42  ;;  %v1579_v40 = vadd.f32 %v3401_v36, %v3032_v27 }
 0x678   :  { %v1570_v50 = vpop.f32.mrf.mxu0 }
 0x679   :  { %1609 = vst [vmem:[#allocation20 + $0x58] sm:$0xff] %v1579_v40  ;;  %v1571_v58 = vadd.f32 %v3032_v27, %v1570_v50  ;;  %v1619_v4 = vpack.c.bf16 %v1579_v40, %v1576_v32 }
 0x67a   :  { %v3404_v41 = vpop.f32.mrf.mxu0 }
 0x67b   :  { %1607 = vst [vmem:[#allocation20 + $0x48] sm:$0xff] %v1571_v58  ;;  %v1618_v6 = vpack.c.bf16 %v1571_v58, %v1568_v42  ;;  %v1592_v63 = vadd.f32 %v3404_v41, %v3032_v27 }
 0x67c   :  { %v1583_v55 = vpop.f32.mrf.mxu0 }
 0x67d   :  { %1612 = vst [vmem:[#allocation20 + $0x70] sm:$0xff] %v1592_v63  ;;  %v1584_v33 = vadd.f32 %v3032_v27, %v1583_v55  ;;  %3430 = vmatprep.mubr.bf16.mxu1 %v1618_v6 }
 0x67e   :  { %v3405_v2 = vpop.f32.mrf.mxu0  ;;  %3431 = vmatmul.mubr.bf16.gmra.mxu1 %v1619_v4 }
 0x67f   :  { %1610 = vst [vmem:[#allocation20 + $0x60] sm:$0xff] %v1584_v33  ;;  %v1595_v10 = vadd.f32 %v3405_v2, %v3032_v27 }
 0x680   :  { %v1586_v52 = vpop.f32.mrf.mxu0 }
 0x681   :  { %1613 = vst [vmem:[#allocation20 + $0x78] sm:$0xff] %v1595_v10  ;;  %v1587_v14 = vadd.f32 %v3032_v27, %v1586_v52  ;;  %v1621_v0 = vpack.c.bf16 %v1595_v10, %v1592_v63 }
 0x683   :  { %1611 = vst [vmem:[#allocation20 + $0x68] sm:$0xff] %v1587_v14  ;;  %v1620_v60 = vpack.c.bf16 %v1587_v14, %v1584_v33 }
 0x685   :  { %3434 = vmatprep.mubr.bf16.mxu1 %v1620_v60 }
 0x686   :  { %3435 = vmatmul.mubr.bf16.gmra.mxu1 %v1621_v0 }
 0x72e   :  { %v3424_v5 = vpop.f32.mrf.mxu1 }
 0x72f   :  { %v4243_v7 = vadd.f32 %v3424_v5, %v3041_v53 }
 0x730   :  { %v1727_v15 = vpop.f32.mrf.mxu1 }
 0x731   :  { %v4241_v17 = vadd.f32 %v3041_v53, %v1727_v15  ;;  %v1792_v62 = vmax.f32 %v4243_v7, 0.0 }
 0x732   :  { %v3425_v35 = vpop.f32.mrf.mxu1 }
 0x733   :  { %v1790_v21 = vmax.f32 %v4241_v17, 0.0  ;;  %v4248_v20 = vadd.f32 %v3425_v35, %v3041_v53 }
 0x734   :  { %v1730_v11 = vpop.f32.mrf.mxu1 }
 0x735   :  { %v4245_v61 = vadd.f32 %v3041_v53, %v1730_v11  ;;  %v1793_v13 = vmax.f32 %v4248_v20, 0.0 }
 0x736   :  { %v3428_v23 = vpop.f32.mrf.mxu1 }
 0x737   :  { %v1791_v49 = vmax.f32 %v4245_v61, 0.0  ;;  %v4255_v18 = vadd.f32 %v3428_v23, %v3041_v53 }
 0x738   :  { %v1743_v9 = vpop.f32.mrf.mxu1 }
 0x739   :  { %v1806_v19 = vadd.f32 %v1791_v49, %v1790_v21  ;;  %v4252_v27 = vadd.f32 %v3041_v53, %v1743_v9  ;;  %v1796_v44 = vmax.f32 %v4255_v18, 0.0 }
 0x73a   :  { %v3429_v30 = vpop.f32.mrf.mxu1 }
 0x73b   :  { %v1807_v3 = vadd.f32 %v1806_v19, %v1792_v62  ;;  %v1794_v24 = vmax.f32 %v4252_v27, 0.0  ;;  %v1755_v46 = vadd.f32 %v3429_v30, %v3041_v53 }
 0x73c   :  { %v1746_v22 = vpop.f32.mrf.mxu1 }
 0x73d   :  { %v1808_v25 = vadd.f32 %v1807_v3, %v1793_v13  ;;  %v1747_v38 = vadd.f32 %v3041_v53, %v1746_v22  ;;  %v1797_v56 = vmax.f32 %v1755_v46, 0.0 }
 0x73e   :  { %v3432_v34 = vpop.f32.mrf.mxu1 }
 0x73f   :  { %v1809_v43 = vadd.f32 %v1808_v25, %v1794_v24  ;;  %v1795_v39 = vmax.f32 %v1747_v38, 0.0  ;;  %v1768_v32 = vadd.f32 %v3432_v34, %v3041_v53 }
 0x740   :  { %v1759_v12 = vpop.f32.mrf.mxu1 }
 0x741   :  { %v1810_v31 = vadd.f32 %v1809_v43, %v1795_v39  ;;  %v1760_v29 = vadd.f32 %v3041_v53, %v1759_v12  ;;  %v1800_v6 = vmax.f32 %v1768_v32, 0.0 }
 0x742   :  { %v3433_v47 = vpop.f32.mrf.mxu1 }
 0x743   :  { %v1811_v28 = vadd.f32 %v1810_v31, %v1796_v44  ;;  %v1798_v59 = vmax.f32 %v1760_v29, 0.0  ;;  %v1771_v50 = vadd.f32 %v3433_v47, %v3041_v53 }
 0x744   :  { %v1762_v26 = vpop.f32.mrf.mxu1 }
 0x745   :  { %v1812_v54 = vadd.f32 %v1811_v28, %v1797_v56  ;;  %v1763_v42 = vadd.f32 %v3041_v53, %v1762_v26  ;;  %v1801_v33 = vmax.f32 %v1771_v50, 0.0 }
 0x746   :  { %v3436_v36 = vpop.f32.mrf.mxu1 }
 0x747   :  { %v1813_v40 = vadd.f32 %v1812_v54, %v1798_v59  ;;  %v1799_v58 = vmax.f32 %v1763_v42, 0.0  ;;  %v1784_v52 = vadd.f32 %v3436_v36, %v3041_v53 }
 0x748   :  { %v1775_v41 = vpop.f32.mrf.mxu1 }
 0x749   :  { %v1814_v63 = vadd.f32 %v1813_v40, %v1799_v58  ;;  %v1776_v4 = vadd.f32 %v3041_v53, %v1775_v41  ;;  %v1804_v8 = vmax.f32 %v1784_v52, 0.0 }
 0x74a   :  { %v3437_v55 = vpop.f32.mrf.mxu1 }
 0x74b   :  { %v1815_v2 = vadd.f32 %v1814_v63, %v1800_v6  ;;  %v1802_v14 = vmax.f32 %v1776_v4, 0.0  ;;  %v1787_v37 = vadd.f32 %v3437_v55, %v3041_v53 }
 0x74c   :  { %v1778_v10 = vpop.f32.mrf.mxu1 }
 0x74d   :  { %v1816_v60 = vadd.f32 %v1815_v2, %v1801_v33  ;;  %v1779_v0 = vadd.f32 %v3041_v53, %v1778_v10  ;;  %v1805_v51 = vmax.f32 %v1787_v37, 0.0 }
 0x74f   :  { %v1817_v45 = vadd.f32 %v1816_v60, %v1802_v14  ;;  %v1803_v1 = vmax.f32 %v1779_v0, 0.0 }
 0x751   :  { %v1818_v48 = vadd.f32 %v1817_v45, %v1803_v1 }
 0x753   :  { %v1819_v57 = vadd.f32 %v1818_v48, %v1804_v8 }
 0x755   :  { %v1820_v16 = vadd.f32 %v1819_v57, %v1805_v51 }
 0x757   :  { %v1821_v5 = vrot.slane %v1820_v16, 4 }
 0x759   :  { %v1822_v15 = vadd.f32 %v1821_v5, %v1820_v16 }
 0x75b   :  { %v1823_v35 = vrot.slane %v1822_v15, 2 }
 0x75d   :  { %v1824_v17 = vadd.f32 %v1823_v35, %v1822_v15 }
 0x75f   :  { %v1825_v11 = vrot.slane %v1824_v17, 1 }
 0x761   :  { %v1826_v7 = vadd.f32 %v1825_v11, %v1824_v17 }
 0x763   :  { %v1827_v61 = vmul.f32 0.0078125, %v1826_v7 }
 0x765   :  { %v1828_v23 = vsub.f32 %v1790_v21, %v1827_v61  ;;  %v1829_v20 = vsub.f32 %v1791_v49, %v1827_v61  ;;  %v1830_v9 = vsub.f32 %v1792_v62, %v1827_v61  ;;  %v1831_v30 = vsub.f32 %v1793_v13, %v1827_v61 }
 0x766   :  { %v1832_v53 = vsub.f32 %v1794_v24, %v1827_v61  ;;  %v1833_v18 = vsub.f32 %v1795_v39, %v1827_v61  ;;  %v1834_v34 = vsub.f32 %v1796_v44, %v1827_v61  ;;  %v1835_v12 = vsub.f32 %v1797_v56, %v1827_v61 }
 0x767   :  { %v1844_v19 = vmul.f32 %v1828_v23, %v1828_v23  ;;  %v1845_v27 = vmul.f32 %v1829_v20, %v1829_v20  ;;  %v1846_v3 = vmul.f32 %v1830_v9, %v1830_v9  ;;  %v1847_v25 = vmul.f32 %v1831_v30, %v1831_v30 }
 0x768   :  { %v1848_v43 = vmul.f32 %v1832_v53, %v1832_v53  ;;  %v1849_v31 = vmul.f32 %v1833_v18, %v1833_v18  ;;  %v1836_v47 = vsub.f32 %v1798_v59, %v1827_v61  ;;  %v1850_v28 = vmul.f32 %v1834_v34, %v1834_v34 }
 0x769   :  { %v1860_v22 = vadd.f32 %v1845_v27, %v1844_v19  ;;  %v1837_v49 = vsub.f32 %v1799_v58, %v1827_v61  ;;  %v1851_v62 = vmul.f32 %v1835_v12, %v1835_v12  ;;  %v1838_v32 = vsub.f32 %v1800_v6, %v1827_v61 }
 0x76a   :  { %v1852_v13 = vmul.f32 %v1836_v47, %v1836_v47  ;;  %v1839_v54 = vsub.f32 %v1801_v33, %v1827_v61  ;;  %v1840_v36 = vsub.f32 %v1802_v14, %v1827_v61  ;;  %v1841_v50 = vsub.f32 %v1803_v1, %v1827_v61 }
 0x76b   :  { %v1861_v38 = vadd.f32 %v1860_v22, %v1846_v3  ;;  %v1853_v42 = vmul.f32 %v1837_v49, %v1837_v49  ;;  %v1854_v40 = vmul.f32 %v1838_v32, %v1838_v32  ;;  %v1842_v63 = vsub.f32 %v1804_v8, %v1827_v61 }
 0x76c   :  { %v1855_v41 = vmul.f32 %v1839_v54, %v1839_v54  ;;  %v1856_v4 = vmul.f32 %v1840_v36, %v1840_v36  ;;  %v1843_v55 = vsub.f32 %v1805_v51, %v1827_v61  ;;  %v1857_v2 = vmul.f32 %v1841_v50, %v1841_v50 }
 0x76d   :  { %v1862_v46 = vadd.f32 %v1861_v38, %v1847_v25  ;;  %v1858_v10 = vmul.f32 %v1842_v63, %v1842_v63 }
 0x76e   :  { %v1859_v6 = vmul.f32 %v1843_v55, %v1843_v55 }
 0x76f   :  { %v1863_v29 = vadd.f32 %v1862_v46, %v1848_v43 }
 0x771   :  { %v1864_v21 = vadd.f32 %v1863_v29, %v1849_v31 }
 0x773   :  { %v1865_v26 = vadd.f32 %v1864_v21, %v1850_v28  ;;  %v3650_v28 = vld [vmem:[#allocation16 + $0x20] sm:$0xff]   ;;  %v3651_v21 = vld [vmem:[#allocation16 + $0x18] sm:$0xff]  }
 0x775   :  { %v1866_v24 = vadd.f32 %v1865_v26, %v1851_v62  ;;  %v3653_v62 = vld [vmem:[#allocation16 + $0x8] sm:$0xff]   ;;  %v3654_v26 = vld [vmem:[#allocation16] sm:$0xff]  }
 0x777   :  { %v1867_v39 = vadd.f32 %v1866_v24, %v1852_v13 }
 0x779   :  { %v1868_v44 = vadd.f32 %v1867_v39, %v1853_v42 }
 0x77b   :  { %v1869_v56 = vadd.f32 %v1868_v44, %v1854_v40 }
 0x77d   :  { %v1870_v59 = vadd.f32 %v1869_v56, %v1855_v41 }
 0x77f   :  { %v1871_v58 = vadd.f32 %v1870_v59, %v1856_v4 }
 0x781   :  { %v1872_v52 = vadd.f32 %v1871_v58, %v1857_v2 }
 0x783   :  { %v1873_v60 = vadd.f32 %v1872_v52, %v1858_v10 }
 0x785   :  { %v1874_v0 = vadd.f32 %v1873_v60, %v1859_v6 }
 0x787   :  { %v1875_v33 = vrot.slane %v1874_v0, 4 }
 0x789   :  { %v1876_v45 = vadd.f32 %v1875_v33, %v1874_v0 }
 0x78b   :  { %v1877_v37 = vrot.slane %v1876_v45, 2 }
 0x78d   :  { %v1878_v14 = vadd.f32 %v1877_v37, %v1876_v45 }
 0x78f   :  { %v1879_v48 = vrot.slane %v1878_v14, 1 }
 0x791   :  { %v1880_v57 = vadd.f32 %v1879_v48, %v1878_v14 }
 0x793   :  { %v1881_v1 = vmul.f32 0.0078125, %v1880_v57 }
 0x795   :  { %v1882_v16 = vadd.f32 1e-05, %v1881_v1 }
 0x797   :  { %3679 = vrsqrt.f32 %v1882_v16 }
 0x7a4   :  { %v3680_v8 = vpop.eup %3679 }
 0x7a5   :  { %v1884_v5 = vmul.f32 %v3680_v8, %v1828_v23  ;;  %v1885_v15 = vmul.f32 %v3680_v8, %v1829_v20  ;;  %v1886_v51 = vmul.f32 %v3680_v8, %v1830_v9  ;;  %v1887_v35 = vmul.f32 %v3680_v8, %v1831_v30 }
 0x7a6   :  { %v1888_v17 = vmul.f32 %v3680_v8, %v1832_v53  ;;  %v1889_v11 = vmul.f32 %v3680_v8, %v1833_v18  ;;  %v1890_v27 = vmul.f32 %v3680_v8, %v1834_v34  ;;  %v1891_v3 = vmul.f32 %v3680_v8, %v1835_v12  ;;  %v3647_v34 = vld [vmem:[#allocation16 + $0x38] sm:$0xff]   ;;  %v3648_v12 = vld [vmem:[#allocation16 + $0x30] sm:$0xff]  }
 0x7a7   :  { %v1900_v7 = vpack.c.bf16 %v1885_v15, %v1884_v5  ;;  %v1901_v61 = vpack.c.bf16 %v1887_v35, %v1886_v51  ;;  %v1892_v22 = vmul.f32 %v3680_v8, %v1836_v47  ;;  %v1893_v25 = vmul.f32 %v3680_v8, %v1837_v49  ;;  %3470 = vmatprep.subr.bf16.mxu1 %v3647_v34  ;;  %v3649_v47 = vld [vmem:[#allocation16 + $0x28] sm:$0xff]   ;;  %v3652_v49 = vld [vmem:[#allocation16 + $0x10] sm:$0xff]  }
 0x7a8   :  { %v1902_v19 = vpack.c.bf16 %v1889_v11, %v1888_v17  ;;  %v1903_v38 = vpack.c.bf16 %v1891_v3, %v1890_v27  ;;  %v1894_v23 = vmul.f32 %v3680_v8, %v1838_v32  ;;  %v1895_v20 = vmul.f32 %v3680_v8, %v1839_v54  ;;  %3471 = vmatpush3.bf16.msra.mxu1 %v3647_v34  ;;  %v3050_v54 = vld [vmem:[%s4300_s17] ss:$0 sm:$0xff] }
 0x7a9   :  { %3454 = vmatprep.mubr.bf16.mxu0 %v1900_v7  ;;  %v1904_v43 = vpack.c.bf16 %v1893_v25, %v1892_v22  ;;  %v1897_v9 = vmul.f32 %v3680_v8, %v1841_v50  ;;  %v1896_v30 = vmul.f32 %v3680_v8, %v1840_v36  ;;  %v1898_v46 = vmul.f32 %v3680_v8, %v1842_v63 }
 0x7aa   :  { %3455 = vmatmul.mubr.bf16.vlgmr.msra.gmra.mxu0 %v1901_v61  ;;  %v1905_v53 = vpack.c.bf16 %v1895_v20, %v1894_v23  ;;  %v1899_v31 = vmul.f32 %v3680_v8, %v1843_v55  ;;  %3472 = vmatprep.subr.bf16.mxu1 %v3648_v12 }
 0x7ab   :  { %3458 = vmatprep.mubr.bf16.mxu0 %v1902_v19  ;;  %v1906_v18 = vpack.c.bf16 %v1897_v9, %v1896_v30 }
 0x7ac   :  { %v1907_v29 = vpack.c.bf16 %v1899_v31, %v1898_v46  ;;  %3473 = vmatpush3.bf16.msra.mxu1 %v3648_v12 }
 0x7ad   :  { %3474 = vmatprep.subr.bf16.mxu1 %v3649_v47 }
 0x7b0   :  { %3475 = vmatpush3.bf16.msra.mxu1 %v3649_v47 }
 0x7b1   :  { %3476 = vmatprep.subr.bf16.mxu1 %v3650_v28 }
 0x7b2   :  { %3459 = vmatmul.mubr.bf16.gmra.mxu0 %v1903_v38 }
 0x7b3   :  { %3462 = vmatprep.mubr.bf16.mxu0 %v1904_v43 }
 0x7b4   :  { %3477 = vmatpush3.bf16.msra.mxu1 %v3650_v28 }
 0x7b5   :  { %3478 = vmatprep.subr.bf16.mxu1 %v3651_v21 }
 0x7b8   :  { %3479 = vmatpush3.bf16.msra.mxu1 %v3651_v21 }
 0x7b9   :  { %3480 = vmatprep.subr.bf16.mxu1 %v3652_v49 }
 0x7ba   :  { %3463 = vmatmul.mubr.bf16.gmra.mxu0 %v1905_v53 }
 0x7bb   :  { %3466 = vmatprep.mubr.bf16.mxu0 %v1906_v18 }
 0x7bc   :  { %3481 = vmatpush3.bf16.msra.mxu1 %v3652_v49 }
 0x7bd   :  { %3482 = vmatprep.subr.bf16.mxu1 %v3653_v62 }
 0x7c0   :  { %3483 = vmatpush3.bf16.msra.mxu1 %v3653_v62 }
 0x7c1   :  { %3484 = vmatprep.subr.bf16.mxu1 %v3654_v26 }
 0x7c2   :  { %3467 = vmatmul.mubr.bf16.gmra.mxu0 %v1907_v29 }
 0x7c4   :  { %3485 = vmatpush3.bf16.msra.mxu1 %v3654_v26 }
 0x86a   :  { %v3456_v32 = vpop.f32.mrf.mxu0 }
 0x86b   :  { %v2022_v44 = vadd.f32 %v3456_v32, %v3050_v54 }
 0x86c   :  { %v2013_v13 = vpop.f32.mrf.mxu0 }
 0x86d   :  { %v2014_v39 = vadd.f32 %v3050_v54, %v2013_v13 }
 0x86e   :  { %v3457_v24 = vpop.f32.mrf.mxu0 }
 0x86f   :  { %v2025_v56 = vadd.f32 %v3457_v24, %v3050_v54 }
 0x870   :  { %v2016_v42 = vpop.f32.mrf.mxu0 }
 0x871   :  { %v2017_v36 = vadd.f32 %v3050_v54, %v2016_v42 }
 0x872   :  { %v3460_v40 = vpop.f32.mrf.mxu0 }
 0x873   :  { %v2076_v50 = vadd.f32 %v2017_v36, %v2014_v39  ;;  %v2038_v6 = vadd.f32 %v3460_v40, %v3050_v54 }
 0x874   :  { %v2029_v41 = vpop.f32.mrf.mxu0 }
 0x875   :  { %v2077_v63 = vadd.f32 %v2076_v50, %v2022_v44  ;;  %v2030_v59 = vadd.f32 %v3050_v54, %v2029_v41 }
 0x876   :  { %v3461_v4 = vpop.f32.mrf.mxu0 }
 0x877   :  { %v2078_v55 = vadd.f32 %v2077_v63, %v2025_v56  ;;  %v2041_v33 = vadd.f32 %v3461_v4, %v3050_v54 }
 0x878   :  { %v2032_v2 = vpop.f32.mrf.mxu0 }
 0x879   :  { %v2079_v58 = vadd.f32 %v2078_v55, %v2030_v59  ;;  %v2033_v10 = vadd.f32 %v3050_v54, %v2032_v2 }
 0x87a   :  { %v3464_v52 = vpop.f32.mrf.mxu0 }
 0x87b   :  { %v2080_v60 = vadd.f32 %v2079_v58, %v2033_v10  ;;  %v2054_v5 = vadd.f32 %v3464_v52, %v3050_v54 }
 0x87c   :  { %v2045_v0 = vpop.f32.mrf.mxu0 }
 0x87d   :  { %v2081_v45 = vadd.f32 %v2080_v60, %v2038_v6  ;;  %v2046_v14 = vadd.f32 %v3050_v54, %v2045_v0 }
 0x87e   :  { %v3465_v37 = vpop.f32.mrf.mxu0 }
 0x87f   :  { %v2082_v48 = vadd.f32 %v2081_v45, %v2041_v33  ;;  %v2057_v35 = vadd.f32 %v3465_v37, %v3050_v54 }
 0x880   :  { %v2048_v57 = vpop.f32.mrf.mxu0 }
 0x881   :  { %v2083_v1 = vadd.f32 %v2082_v48, %v2046_v14  ;;  %v2049_v16 = vadd.f32 %v3050_v54, %v2048_v57 }
 0x882   :  { %v3468_v8 = vpop.f32.mrf.mxu0 }
 0x883   :  { %v2084_v15 = vadd.f32 %v2083_v1, %v2049_v16  ;;  %v2070_v22 = vadd.f32 %v3468_v8, %v3050_v54 }
 0x884   :  { %v2061_v51 = vpop.f32.mrf.mxu0 }
 0x885   :  { %v2085_v17 = vadd.f32 %v2084_v15, %v2054_v5  ;;  %v2062_v7 = vadd.f32 %v3050_v54, %v2061_v51 }
 0x886   :  { %v3469_v11 = vpop.f32.mrf.mxu0 }
 0x887   :  { %v2086_v61 = vadd.f32 %v2085_v17, %v2057_v35  ;;  %v2073_v38 = vadd.f32 %v3469_v11, %v3050_v54 }
 0x888   :  { %v2064_v19 = vpop.f32.mrf.mxu0 }
 0x889   :  { %v2087_v27 = vadd.f32 %v2086_v61, %v2062_v7  ;;  %v2065_v3 = vadd.f32 %v3050_v54, %v2064_v19 }
 0x88b   :  { %v2088_v25 = vadd.f32 %v2087_v27, %v2065_v3 }
 0x88d   :  { %v2089_v43 = vadd.f32 %v2088_v25, %v2070_v22 }
 0x88f   :  { %v2090_v23 = vadd.f32 %v2089_v43, %v2073_v38 }
 0x891   :  { %v2091_v20 = vrot.slane %v2090_v23, 4 }
 0x893   :  { %v2092_v9 = vadd.f32 %v2091_v20, %v2090_v23 }
 0x895   :  { %v2093_v30 = vrot.slane %v2092_v9, 2 }
 0x897   :  { %v2094_v53 = vadd.f32 %v2093_v30, %v2092_v9 }
 0x899   :  { %v2095_v18 = vrot.slane %v2094_v53, 1 }
 0x89b   :  { %v2096_v46 = vadd.f32 %v2095_v18, %v2094_v53 }
 0x89d   :  { %v2097_v31 = vmul.f32 0.0078125, %v2096_v46 }
 0x89f   :  { %v2098_v29 = vsub.f32 %v2014_v39, %v2097_v31  ;;  %v2099_v34 = vsub.f32 %v2017_v36, %v2097_v31  ;;  %v2100_v12 = vsub.f32 %v2022_v44, %v2097_v31  ;;  %v2101_v21 = vsub.f32 %v2025_v56, %v2097_v31 }
 0x8a0   :  { %v2102_v49 = vsub.f32 %v2030_v59, %v2097_v31  ;;  %v2103_v32 = vsub.f32 %v2033_v10, %v2097_v31  ;;  %v2104_v54 = vsub.f32 %v2038_v6, %v2097_v31  ;;  %v2105_v50 = vsub.f32 %v2041_v33, %v2097_v31 }
 0x8a1   :  { %v2114_v47 = vmul.f32 %v2098_v29, %v2098_v29  ;;  %v2115_v28 = vmul.f32 %v2099_v34, %v2099_v34  ;;  %v2116_v62 = vmul.f32 %v2100_v12, %v2100_v12  ;;  %v2117_v13 = vmul.f32 %v2101_v21, %v2101_v21 }
 0x8a2   :  { %v2118_v42 = vmul.f32 %v2102_v49, %v2102_v49  ;;  %v2119_v41 = vmul.f32 %v2103_v32, %v2103_v32  ;;  %v2106_v4 = vsub.f32 %v2046_v14, %v2097_v31  ;;  %v2120_v55 = vmul.f32 %v2104_v54, %v2104_v54 }
 0x8a3   :  { %v2130_v26 = vadd.f32 %v2115_v28, %v2114_v47  ;;  %v2107_v36 = vsub.f32 %v2049_v16, %v2097_v31  ;;  %v2121_v44 = vmul.f32 %v2105_v50, %v2105_v50  ;;  %v2108_v58 = vsub.f32 %v2054_v5, %v2097_v31 }
 0x8a4   :  { %v2122_v56 = vmul.f32 %v2106_v4, %v2106_v4  ;;  %v2109_v52 = vsub.f32 %v2057_v35, %v2097_v31  ;;  %v2110_v0 = vsub.f32 %v2062_v7, %v2097_v31  ;;  %v2111_v37 = vsub.f32 %v2065_v3, %v2097_v31 }
 0x8a5   :  { %v2131_v24 = vadd.f32 %v2130_v26, %v2116_v62  ;;  %v2123_v60 = vmul.f32 %v2107_v36, %v2107_v36  ;;  %v2124_v45 = vmul.f32 %v2108_v58, %v2108_v58  ;;  %v2112_v57 = vsub.f32 %v2070_v22, %v2097_v31 }
 0x8a6   :  { %v2125_v48 = vmul.f32 %v2109_v52, %v2109_v52  ;;  %v2126_v1 = vmul.f32 %v2110_v0, %v2110_v0  ;;  %v2113_v8 = vsub.f32 %v2073_v38, %v2097_v31  ;;  %v2127_v15 = vmul.f32 %v2111_v37, %v2111_v37 }
 0x8a7   :  { %v2132_v40 = vadd.f32 %v2131_v24, %v2117_v13  ;;  %v2128_v51 = vmul.f32 %v2112_v57, %v2112_v57 }
 0x8a8   :  { %v2129_v5 = vmul.f32 %v2113_v8, %v2113_v8 }
 0x8a9   :  { %v2133_v63 = vadd.f32 %v2132_v40, %v2118_v42 }
 0x8ab   :  { %v2134_v39 = vadd.f32 %v2133_v63, %v2119_v41 }
 0x8ad   :  { %v2135_v2 = vadd.f32 %v2134_v39, %v2120_v55 }
 0x8af   :  { %v2136_v59 = vadd.f32 %v2135_v2, %v2121_v44 }
 0x8b1   :  { %v2137_v10 = vadd.f32 %v2136_v59, %v2122_v56 }
 0x8b3   :  { %v2138_v6 = vadd.f32 %v2137_v10, %v2123_v60 }
 0x8b5   :  { %v2139_v33 = vadd.f32 %v2138_v6, %v2124_v45 }
 0x8b7   :  { %v2140_v14 = vadd.f32 %v2139_v33, %v2125_v48 }
 0x8b9   :  { %v2141_v16 = vadd.f32 %v2140_v14, %v2126_v1  ;;  %v3660_v1 = vld [vmem:[#allocation17 + $0x10] sm:$0xff]   ;;  %v3661_v14 = vld [vmem:[#allocation17 + $0x8] sm:$0xff]  }
 0x8bb   :  { %v2142_v17 = vadd.f32 %v2141_v16, %v2127_v15 }
 0x8bd   :  { %v2143_v11 = vadd.f32 %v2142_v17, %v2128_v51  ;;  %v3059_v17 = vld [vmem:[%s4301_s18] ss:$0 sm:$0xff] }
 0x8bf   :  { %v2144_v61 = vadd.f32 %v2143_v11, %v2129_v5 }
 0x8c1   :  { %v2145_v35 = vrot.slane %v2144_v61, 4 }
 0x8c3   :  { %v2146_v19 = vadd.f32 %v2145_v35, %v2144_v61 }
 0x8c5   :  { %v2147_v27 = vrot.slane %v2146_v19, 2 }
 0x8c7   :  { %v2148_v7 = vadd.f32 %v2147_v27, %v2146_v19 }
 0x8c9   :  { %v2149_v25 = vrot.slane %v2148_v7, 1 }
 0x8cb   :  { %v2150_v43 = vadd.f32 %v2149_v25, %v2148_v7 }
 0x8cd   :  { %v2151_v3 = vmul.f32 0.0078125, %v2150_v43 }
 0x8cf   :  { %v2152_v23 = vadd.f32 1e-05, %v2151_v3 }
 0x8d1   :  { %3681 = vrsqrt.f32 %v2152_v23 }
 0x8de   :  { %v3682_v22 = vpop.eup %3681 }
 0x8df   :  { %v2154_v20 = vmul.f32 %v3682_v22, %v2098_v29  ;;  %v2155_v9 = vmul.f32 %v3682_v22, %v2099_v34  ;;  %v2156_v38 = vmul.f32 %v3682_v22, %v2100_v12  ;;  %v2157_v30 = vmul.f32 %v3682_v22, %v2101_v21 }
 0x8e0   :  { %v2158_v53 = vmul.f32 %v3682_v22, %v2102_v49  ;;  %v2159_v18 = vmul.f32 %v3682_v22, %v2103_v32  ;;  %v2160_v42 = vmul.f32 %v3682_v22, %v2104_v54  ;;  %v2161_v40 = vmul.f32 %v3682_v22, %v2105_v50 }
 0x8e1   :  { %v2170_v46 = vmax.f32 %v2154_v20, 0.0  ;;  %v2171_v31 = vmax.f32 %v2155_v9, 0.0  ;;  %v2172_v47 = vmax.f32 %v2156_v38, 0.0  ;;  %v2173_v28 = vmax.f32 %v2157_v30, 0.0 }
 0x8e2   :  { %v2174_v62 = vmax.f32 %v2158_v53, 0.0  ;;  %v2175_v26 = vmax.f32 %v2159_v18, 0.0  ;;  %v2162_v63 = vmul.f32 %v3682_v22, %v2106_v4  ;;  %v2163_v55 = vmul.f32 %v3682_v22, %v2107_v36 }
 0x8e3   :  { %v2186_v13 = vpack.c.bf16 %v2171_v31, %v2170_v46  ;;  %v2187_v24 = vpack.c.bf16 %v2173_v28, %v2172_v47  ;;  %v2176_v29 = vmax.f32 %v2160_v42, 0.0  ;;  %v2177_v34 = vmax.f32 %v2161_v40, 0.0 }
 0x8e4   :  { %v2188_v41 = vpack.c.bf16 %v2175_v26, %v2174_v62  ;;  %v2178_v12 = vmax.f32 %v2162_v63, 0.0  ;;  %v2179_v21 = vmax.f32 %v2163_v55, 0.0  ;;  %v2164_v32 = vmul.f32 %v3682_v22, %v2108_v58  ;;  %v3655_v58 = vld [vmem:[#allocation17 + $0x38] sm:$0xff]  }
 0x8e5   :  { %3486 = vmatprep.mubr.bf16.mxu1 %v2186_v13  ;;  %v2189_v49 = vpack.c.bf16 %v2177_v34, %v2176_v29  ;;  %v2165_v39 = vmul.f32 %v3682_v22, %v2109_v52  ;;  %v2167_v44 = vmul.f32 %v3682_v22, %v2111_v37  ;;  %v2166_v56 = vmul.f32 %v3682_v22, %v2110_v0  ;;  %v3656_v52 = vld [vmem:[#allocation17 + $0x30] sm:$0xff]   ;;  %v3657_v0 = vld [vmem:[#allocation17 + $0x28] sm:$0xff]   ;;  %v3658_v37 = vld [vmem:[#allocation17 + $0x20] sm:$0xff]  }
 0x8e6   :  { %3487 = vmatmul.mubr.bf16.vlgmr.msra.gmra.mxu1 %v2187_v24  ;;  %v2190_v2 = vpack.c.bf16 %v2179_v21, %v2178_v12  ;;  %v2180_v54 = vmax.f32 %v2164_v32, 0.0  ;;  %v2168_v36 = vmul.f32 %v3682_v22, %v2112_v57  ;;  %v2169_v10 = vmul.f32 %v3682_v22, %v2113_v8  ;;  %3502 = vmatprep.subr.bf16.mxu0 %v3655_v58  ;;  %v3659_v57 = vld [vmem:[#allocation17 + $0x18] sm:$0xff]   ;;  %v3662_v8 = vld [vmem:[#allocation17] sm:$0xff]  }
 0x8e7   :  { %3490 = vmatprep.mubr.bf16.mxu1 %v2188_v41  ;;  %v2181_v50 = vmax.f32 %v2165_v39, 0.0  ;;  %v2183_v59 = vmax.f32 %v2167_v44, 0.0  ;;  %v2182_v60 = vmax.f32 %v2166_v56, 0.0  ;;  %3503 = vmatpush3.bf16.msra.mxu0 %v3655_v58 }
 0x8e8   :  { %v2184_v6 = vmax.f32 %v2168_v36, 0.0  ;;  %v2185_v48 = vmax.f32 %v2169_v10, 0.0  ;;  %3504 = vmatprep.subr.bf16.mxu0 %v3656_v52 }
 0x8e9   :  { %v2191_v4 = vpack.c.bf16 %v2181_v50, %v2180_v54  ;;  %v2192_v45 = vpack.c.bf16 %v2183_v59, %v2182_v60 }
 0x8ea   :  { %v2193_v33 = vpack.c.bf16 %v2185_v48, %v2184_v6 }
 0x8eb   :  { %3505 = vmatpush3.bf16.msra.mxu0 %v3656_v52 }
 0x8ec   :  { %3506 = vmatprep.subr.bf16.mxu0 %v3657_v0 }
 0x8ee   :  { %3491 = vmatmul.mubr.bf16.gmra.mxu1 %v2189_v49 }
 0x8ef   :  { %3494 = vmatprep.mubr.bf16.mxu1 %v2190_v2  ;;  %3507 = vmatpush3.bf16.msra.mxu0 %v3657_v0 }
 0x8f0   :  { %3508 = vmatprep.subr.bf16.mxu0 %v3658_v37 }
 0x8f3   :  { %3509 = vmatpush3.bf16.msra.mxu0 %v3658_v37 }
 0x8f4   :  { %3510 = vmatprep.subr.bf16.mxu0 %v3659_v57 }
 0x8f6   :  { %3495 = vmatmul.mubr.bf16.gmra.mxu1 %v2191_v4 }
 0x8f7   :  { %3498 = vmatprep.mubr.bf16.mxu1 %v2192_v45  ;;  %3511 = vmatpush3.bf16.msra.mxu0 %v3659_v57 }
 0x8f8   :  { %3512 = vmatprep.subr.bf16.mxu0 %v3660_v1 }
 0x8fb   :  { %3513 = vmatpush3.bf16.msra.mxu0 %v3660_v1 }
 0x8fc   :  { %3514 = vmatprep.subr.bf16.mxu0 %v3661_v14 }
 0x8fe   :  { %3499 = vmatmul.mubr.bf16.gmra.mxu1 %v2193_v33 }
 0x8ff   :  { %3515 = vmatpush3.bf16.msra.mxu0 %v3661_v14 }
 0x900   :  { %3516 = vmatprep.subr.bf16.mxu0 %v3662_v8 }
 0x903   :  { %3517 = vmatpush3.bf16.msra.mxu0 %v3662_v8 }
 0x9a6   :  { %v3488_v15 = vpop.f32.mrf.mxu1 }
 0x9a7   :  { %v2308_v19 = vadd.f32 %v3488_v15, %v3059_v17 }
 0x9a8   :  { %v2299_v16 = vpop.f32.mrf.mxu1 }
 0x9a9   :  { %v2300_v11 = vadd.f32 %v3059_v17, %v2299_v16 }
 0x9aa   :  { %v3489_v51 = vpop.f32.mrf.mxu1 }
 0x9ab   :  { %v2311_v25 = vadd.f32 %v3489_v51, %v3059_v17 }
 0x9ac   :  { %v2302_v5 = vpop.f32.mrf.mxu1 }
 0x9ad   :  { %v2303_v61 = vadd.f32 %v3059_v17, %v2302_v5 }
 0x9ae   :  { %v3492_v35 = vpop.f32.mrf.mxu1 }
 0x9af   :  { %v2362_v27 = vadd.f32 %v2303_v61, %v2300_v11  ;;  %v2324_v53 = vadd.f32 %v3492_v35, %v3059_v17 }
 0x9b0   :  { %v2315_v7 = vpop.f32.mrf.mxu1 }
 0x9b1   :  { %v2363_v43 = vadd.f32 %v2362_v27, %v2308_v19  ;;  %v2316_v23 = vadd.f32 %v3059_v17, %v2315_v7 }
 0x9b2   :  { %v3493_v3 = vpop.f32.mrf.mxu1 }
 0x9b3   :  { %v2364_v22 = vadd.f32 %v2363_v43, %v2311_v25  ;;  %v2327_v31 = vadd.f32 %v3493_v3, %v3059_v17 }
 0x9b4   :  { %v2318_v20 = vpop.f32.mrf.mxu1 }
 0x9b5   :  { %v2365_v9 = vadd.f32 %v2364_v22, %v2316_v23  ;;  %v2319_v38 = vadd.f32 %v3059_v17, %v2318_v20 }
 0x9b6   :  { %v3496_v30 = vpop.f32.mrf.mxu1 }
 0x9b7   :  { %v2366_v18 = vadd.f32 %v2365_v9, %v2319_v38  ;;  %v2340_v41 = vadd.f32 %v3496_v30, %v3059_v17 }
 0x9b8   :  { %v2331_v46 = vpop.f32.mrf.mxu1 }
 0x9b9   :  { %v2367_v47 = vadd.f32 %v2366_v18, %v2324_v53  ;;  %v2332_v62 = vadd.f32 %v3059_v17, %v2331_v46 }
 0x9ba   :  { %v3497_v28 = vpop.f32.mrf.mxu1 }
 0x9bb   :  { %v2368_v26 = vadd.f32 %v2367_v47, %v2327_v31  ;;  %v2343_v29 = vadd.f32 %v3497_v28, %v3059_v17 }
 0x9bc   :  { %v2334_v13 = vpop.f32.mrf.mxu1 }
 0x9bd   :  { %v2369_v24 = vadd.f32 %v2368_v26, %v2332_v62  ;;  %v2335_v42 = vadd.f32 %v3059_v17, %v2334_v13 }
 0x9be   :  { %v3500_v40 = vpop.f32.mrf.mxu1 }
 0x9bf   :  { %v2370_v63 = vadd.f32 %v2369_v24, %v2335_v42  ;;  %v2356_v2 = vadd.f32 %v3500_v40, %v3059_v17 }
 0x9c0   :  { %v2347_v55 = vpop.f32.mrf.mxu1 }
 0x9c1   :  { %v2371_v34 = vadd.f32 %v2370_v63, %v2340_v41  ;;  %v2348_v21 = vadd.f32 %v3059_v17, %v2347_v55 }
 0x9c2   :  { %v3501_v12 = vpop.f32.mrf.mxu1 }
 0x9c3   :  { %v2372_v49 = vadd.f32 %v2371_v34, %v2343_v29  ;;  %v2359_v54 = vadd.f32 %v3501_v12, %v3059_v17 }
 0x9c4   :  { %v2350_v32 = vpop.f32.mrf.mxu1 }
 0x9c5   :  { %v2373_v39 = vadd.f32 %v2372_v49, %v2348_v21  ;;  %v2351_v44 = vadd.f32 %v3059_v17, %v2350_v32 }
 0x9c7   :  { %v2374_v56 = vadd.f32 %v2373_v39, %v2351_v44 }
 0x9c9   :  { %v2375_v50 = vadd.f32 %v2374_v56, %v2356_v2 }
 0x9cb   :  { %v2376_v59 = vadd.f32 %v2375_v50, %v2359_v54 }
 0x9cd   :  { %v2377_v60 = vrot.slane %v2376_v59, 4 }
 0x9cf   :  { %v2378_v4 = vadd.f32 %v2377_v60, %v2376_v59 }
 0x9d1   :  { %v2379_v36 = vrot.slane %v2378_v4, 2 }
 0x9d3   :  { %v2380_v10 = vadd.f32 %v2379_v36, %v2378_v4 }
 0x9d5   :  { %v2381_v45 = vrot.slane %v2380_v10, 1 }
 0x9d7   :  { %v2382_v6 = vadd.f32 %v2381_v45, %v2380_v10 }
 0x9d9   :  { %v2383_v48 = vmul.f32 0.0078125, %v2382_v6 }
 0x9db   :  { %v2384_v33 = vsub.f32 %v2300_v11, %v2383_v48  ;;  %v2385_v58 = vsub.f32 %v2303_v61, %v2383_v48  ;;  %v2386_v52 = vsub.f32 %v2308_v19, %v2383_v48  ;;  %v2387_v57 = vsub.f32 %v2311_v25, %v2383_v48 }
 0x9dc   :  { %v2388_v1 = vsub.f32 %v2316_v23, %v2383_v48  ;;  %v2389_v15 = vsub.f32 %v2319_v38, %v2383_v48  ;;  %v2390_v17 = vsub.f32 %v2324_v53, %v2383_v48  ;;  %v2391_v27 = vsub.f32 %v2327_v31, %v2383_v48 }
 0x9dd   :  { %v2400_v0 = vmul.f32 %v2384_v33, %v2384_v33  ;;  %v2401_v37 = vmul.f32 %v2385_v58, %v2385_v58  ;;  %v2402_v14 = vmul.f32 %v2386_v52, %v2386_v52  ;;  %v2403_v16 = vmul.f32 %v2387_v57, %v2387_v57 }
 0x9de   :  { %v2404_v5 = vmul.f32 %v2388_v1, %v2388_v1  ;;  %v2405_v7 = vmul.f32 %v2389_v15, %v2389_v15  ;;  %v2392_v3 = vsub.f32 %v2332_v62, %v2383_v48  ;;  %v2406_v22 = vmul.f32 %v2390_v17, %v2390_v17 }
 0x9df   :  { %v2416_v8 = vadd.f32 %v2401_v37, %v2400_v0  ;;  %v2393_v61 = vsub.f32 %v2335_v42, %v2383_v48  ;;  %v2407_v19 = vmul.f32 %v2391_v27, %v2391_v27  ;;  %v2394_v9 = vsub.f32 %v2340_v41, %v2383_v48 }
 0x9e0   :  { %v2408_v25 = vmul.f32 %v2392_v3, %v2392_v3  ;;  %v2395_v30 = vsub.f32 %v2343_v29, %v2383_v48  ;;  %v2396_v46 = vsub.f32 %v2348_v21, %v2383_v48  ;;  %v2397_v28 = vsub.f32 %v2351_v44, %v2383_v48 }
 0x9e1   :  { %v2417_v51 = vadd.f32 %v2416_v8, %v2402_v14  ;;  %v2409_v18 = vmul.f32 %v2393_v61, %v2393_v61  ;;  %v2410_v47 = vmul.f32 %v2394_v9, %v2394_v9  ;;  %v2398_v13 = vsub.f32 %v2356_v2, %v2383_v48 }
 0x9e2   :  { %v2411_v26 = vmul.f32 %v2395_v30, %v2395_v30  ;;  %v2412_v24 = vmul.f32 %v2396_v46, %v2396_v46  ;;  %v2399_v40 = vsub.f32 %v2359_v54, %v2383_v48  ;;  %v2413_v63 = vmul.f32 %v2397_v28, %v2397_v28 }
 0x9e3   :  { %v2418_v35 = vadd.f32 %v2417_v51, %v2403_v16  ;;  %v2414_v55 = vmul.f32 %v2398_v13, %v2398_v13 }
 0x9e4   :  { %v2415_v41 = vmul.f32 %v2399_v40, %v2399_v40 }
 0x9e5   :  { %v2419_v43 = vadd.f32 %v2418_v35, %v2404_v5 }
 0x9e7   :  { %v2420_v11 = vadd.f32 %v2419_v43, %v2405_v7 }
 0x9e9   :  { %v2421_v20 = vadd.f32 %v2420_v11, %v2406_v22 }
 0x9eb   :  { %v2422_v23 = vadd.f32 %v2421_v20, %v2407_v19 }
 0x9ed   :  { %v2423_v38 = vadd.f32 %v2422_v23, %v2408_v25 }
 0x9ef   :  { %v2424_v53 = vadd.f32 %v2423_v38, %v2409_v18 }
 0x9f1   :  { %v2425_v31 = vadd.f32 %v2424_v53, %v2410_v47 }
 0x9f3   :  { %v2426_v62 = vadd.f32 %v2425_v31, %v2411_v26 }
 0x9f5   :  { %v2427_v42 = vadd.f32 %v2426_v62, %v2412_v24  ;;  %v3668_v24 = vld [vmem:[#allocation19 + $0x10] sm:$0xff]   ;;  %v3669_v62 = vld [vmem:[#allocation19 + $0x8] sm:$0xff]  }
 0x9f7   :  { %v2428_v34 = vadd.f32 %v2427_v42, %v2413_v63 }
 0x9f9   :  { %v2429_v12 = vadd.f32 %v2428_v34, %v2414_v55  ;;  %v3068_v34 = vld [vmem:[%s4302_s19] ss:$0 sm:$0xff]  ;;  %s3976_s19 = smov [#allocation20]  }
 0x9fa   :  { %s2955_s2 = sshll.u32 %s3976_s19, 4  ;;  %s2956_s2 = int_to_ptr.vmem [resolvable:$true] %s2955_s2 }
 0x9fb   :  { %v2430_v49 = vadd.f32 %v2429_v12, %v2415_v41  ;;  %s3907_s26 = scalar_lea.vmem %s2956_s2, 2048  ;;  %p3912_p0 = scmp.lt.s32.totalorder %s2956_s2, %s2956_s2 }
 0x9fc   :  { %p3908_p13 = scmp.ne.s32.totalorder %s2956_s2, %s3907_s26  ;;  %p3913_p1 = scmp.lt.s32.totalorder %s3907_s26, %s3907_s26 }
 0x9fd   :  { %v2431_v29 = vrot.slane %v2430_v49, 4 }
 0x9fe   :  { %p3914_p2 = por %p3913_p1, %p3912_p0 }
 0x9ff   :  { %v2432_v32 = vadd.f32 %v2431_v29, %v2430_v49 }
 0xa00   :  { %p3915_p3 = pnand %p3914_p2, %p3908_p13 }
 0xa01   :  { %v2433_v39 = vrot.slane %v2432_v32, 2 }
 0xa03   :  { %v2434_v21 = vadd.f32 %v2433_v39, %v2432_v32 }
 0xa05   :  { %v2435_v56 = vrot.slane %v2434_v21, 1 }
 0xa07   :  { %v2436_v50 = vadd.f32 %v2435_v56, %v2434_v21 }
 0xa09   :  { %v2437_v44 = vmul.f32 0.0078125, %v2436_v50 }
 0xa0b   :  { %v2438_v59 = vadd.f32 1e-05, %v2437_v44 }
 0xa0d   :  { %3683 = vrsqrt.f32 %v2438_v59 }
 0xa1a   :  { %v3684_v2 = vpop.eup %3683 }
 0xa1b   :  { %v2440_v60 = vmul.f32 %v3684_v2, %v2384_v33  ;;  %v2441_v4 = vmul.f32 %v3684_v2, %v2385_v58  ;;  %v2442_v54 = vmul.f32 %v3684_v2, %v2386_v52  ;;  %v2443_v36 = vmul.f32 %v3684_v2, %v2387_v57 }
 0xa1c   :  { %v2444_v10 = vmul.f32 %v3684_v2, %v2388_v1  ;;  %v2445_v45 = vmul.f32 %v3684_v2, %v2389_v15  ;;  %v2446_v5 = vmul.f32 %v3684_v2, %v2390_v17  ;;  %v2447_v35 = vmul.f32 %v3684_v2, %v2391_v27 }
 0xa1d   :  { %v2456_v6 = vmax.f32 %v2440_v60, 0.0  ;;  %v2457_v48 = vmax.f32 %v2441_v4, 0.0  ;;  %v2458_v0 = vmax.f32 %v2442_v54, 0.0  ;;  %v2459_v37 = vmax.f32 %v2443_v36, 0.0 }
 0xa1e   :  { %v2460_v14 = vmax.f32 %v2444_v10, 0.0  ;;  %v2461_v8 = vmax.f32 %v2445_v45, 0.0  ;;  %v2448_v43 = vmul.f32 %v3684_v2, %v2392_v3  ;;  %v2449_v22 = vmul.f32 %v3684_v2, %v2393_v61 }
 0xa1f   :  { %v2472_v16 = vpack.c.bf16 %v2457_v48, %v2456_v6  ;;  %v2473_v51 = vpack.c.bf16 %v2459_v37, %v2458_v0  ;;  %v2462_v33 = vmax.f32 %v2446_v5, 0.0  ;;  %v2463_v58 = vmax.f32 %v2447_v35, 0.0 }
 0xa20   :  { %v2474_v7 = vpack.c.bf16 %v2461_v8, %v2460_v14  ;;  %v2464_v52 = vmax.f32 %v2448_v43, 0.0  ;;  %v2465_v57 = vmax.f32 %v2449_v22, 0.0  ;;  %v2450_v15 = vmul.f32 %v3684_v2, %v2394_v9  ;;  %v3663_v9 = vld [vmem:[#allocation19 + $0x38] sm:$0xff]  }
 0xa21   :  { %3518 = vmatprep.mubr.bf16.mxu0 %v2472_v16  ;;  %v2475_v1 = vpack.c.bf16 %v2463_v58, %v2462_v33  ;;  %v2451_v11 = vmul.f32 %v3684_v2, %v2395_v30  ;;  %v2453_v19 = vmul.f32 %v3684_v2, %v2397_v28  ;;  %v2452_v25 = vmul.f32 %v3684_v2, %v2396_v46  ;;  %v3664_v30 = vld [vmem:[#allocation19 + $0x30] sm:$0xff]   ;;  %v3665_v46 = vld [vmem:[#allocation19 + $0x28] sm:$0xff]   ;;  %v3666_v28 = vld [vmem:[#allocation19 + $0x20] sm:$0xff]  }
 0xa22   :  { %3519 = vmatmul.mubr.bf16.vlgmr.msra.gmra.mxu0 %v2473_v51  ;;  %v2476_v20 = vpack.c.bf16 %v2465_v57, %v2464_v52  ;;  %v2466_v17 = vmax.f32 %v2450_v15, 0.0  ;;  %v2454_v61 = vmul.f32 %v3684_v2, %v2398_v13  ;;  %v2455_v38 = vmul.f32 %v3684_v2, %v2399_v40  ;;  %3534 = vmatprep.subr.bf16.mxu1 %v3663_v9  ;;  %v3667_v13 = vld [vmem:[#allocation19 + $0x18] sm:$0xff]   ;;  %v3670_v40 = vld [vmem:[#allocation19] sm:$0xff]  }
 0xa23   :  { %3522 = vmatprep.mubr.bf16.mxu0 %v2474_v7  ;;  %v2467_v27 = vmax.f32 %v2451_v11, 0.0  ;;  %v2469_v23 = vmax.f32 %v2453_v19, 0.0  ;;  %v2468_v18 = vmax.f32 %v2452_v25, 0.0  ;;  %3535 = vmatpush3.bf16.msra.mxu1 %v3663_v9 }
 0xa24   :  { %v2470_v53 = vmax.f32 %v2454_v61, 0.0  ;;  %v2471_v26 = vmax.f32 %v2455_v38, 0.0  ;;  %3536 = vmatprep.subr.bf16.mxu1 %v3664_v30 }
 0xa25   :  { %v2477_v3 = vpack.c.bf16 %v2467_v27, %v2466_v17  ;;  %v2478_v47 = vpack.c.bf16 %v2469_v23, %v2468_v18 }
 0xa26   :  { %v2479_v31 = vpack.c.bf16 %v2471_v26, %v2470_v53 }
 0xa27   :  { %3537 = vmatpush3.bf16.msra.mxu1 %v3664_v30 }
 0xa28   :  { %3538 = vmatprep.subr.bf16.mxu1 %v3665_v46 }
 0xa2a   :  { %3523 = vmatmul.mubr.bf16.gmra.mxu0 %v2475_v1 }
 0xa2b   :  { %3526 = vmatprep.mubr.bf16.mxu0 %v2476_v20  ;;  %3539 = vmatpush3.bf16.msra.mxu1 %v3665_v46 }
 0xa2c   :  { %3540 = vmatprep.subr.bf16.mxu1 %v3666_v28 }
 0xa2f   :  { %3541 = vmatpush3.bf16.msra.mxu1 %v3666_v28 }
 0xa30   :  { %3542 = vmatprep.subr.bf16.mxu1 %v3667_v13 }
 0xa32   :  { %3527 = vmatmul.mubr.bf16.gmra.mxu0 %v2477_v3 }
 0xa33   :  { %3530 = vmatprep.mubr.bf16.mxu0 %v2478_v47  ;;  %3543 = vmatpush3.bf16.msra.mxu1 %v3667_v13 }
 0xa34   :  { %3544 = vmatprep.subr.bf16.mxu1 %v3668_v24 }
 0xa37   :  { %3545 = vmatpush3.bf16.msra.mxu1 %v3668_v24 }
 0xa38   :  { %3546 = vmatprep.subr.bf16.mxu1 %v3669_v62 }
 0xa3a   :  { %3531 = vmatmul.mubr.bf16.gmra.mxu0 %v2479_v31 }
 0xa3b   :  { %3547 = vmatpush3.bf16.msra.mxu1 %v3669_v62 }
 0xa3c   :  { %3548 = vmatprep.subr.bf16.mxu1 %v3670_v40 }
 0xa3f   :  { %3549 = vmatpush3.bf16.msra.mxu1 %v3670_v40 }
 0xae2   :  { %v3520_v63 = vpop.f32.mrf.mxu0 }
 0xae3   :  { %v2594_v32 = vadd.f32 %v3520_v63, %v3068_v34 }
 0xae4   :  { %v2585_v42 = vpop.f32.mrf.mxu0 }
 0xae5   :  { %v2586_v12 = vadd.f32 %v3068_v34, %v2585_v42 }
 0xae6   :  { %v3521_v55 = vpop.f32.mrf.mxu0 }
 0xae7   :  { %v2597_v56 = vadd.f32 %v3521_v55, %v3068_v34 }
 0xae8   :  { %v2588_v41 = vpop.f32.mrf.mxu0 }
 0xae9   :  { %v2589_v49 = vadd.f32 %v3068_v34, %v2588_v41 }
 0xaea   :  { %v3524_v29 = vpop.f32.mrf.mxu0 }
 0xaeb   :  { %v2648_v39 = vadd.f32 %v2589_v49, %v2586_v12  ;;  %v2610_v10 = vadd.f32 %v3524_v29, %v3068_v34 }
 0xaec   :  { %v2601_v21 = vpop.f32.mrf.mxu0 }
 0xaed   :  { %v2649_v50 = vadd.f32 %v2648_v39, %v2594_v32  ;;  %v2602_v59 = vadd.f32 %v3068_v34, %v2601_v21 }
 0xaee   :  { %v3525_v44 = vpop.f32.mrf.mxu0 }
 0xaef   :  { %v2650_v2 = vadd.f32 %v2649_v50, %v2597_v56  ;;  %v2613_v48 = vadd.f32 %v3525_v44, %v3068_v34 }
 0xaf0   :  { %v2604_v60 = vpop.f32.mrf.mxu0 }
 0xaf1   :  { %v2651_v4 = vadd.f32 %v2650_v2, %v2602_v59  ;;  %v2605_v54 = vadd.f32 %v3068_v34, %v2604_v60 }
 0xaf2   :  { %v3528_v36 = vpop.f32.mrf.mxu0 }
 0xaf3   :  { %v2652_v45 = vadd.f32 %v2651_v4, %v2605_v54  ;;  %v2626_v7 = vadd.f32 %v3528_v36, %v3068_v34 }
 0xaf4   :  { %v2617_v6 = vpop.f32.mrf.mxu0 }
 0xaf5   :  { %v2653_v0 = vadd.f32 %v2652_v45, %v2610_v10  ;;  %v2618_v14 = vadd.f32 %v3068_v34, %v2617_v6 }
 0xaf6   :  { %v3529_v37 = vpop.f32.mrf.mxu0 }
 0xaf7   :  { %v2654_v8 = vadd.f32 %v2653_v0, %v2613_v48  ;;  %v2629_v33 = vadd.f32 %v3529_v37, %v3068_v34 }
 0xaf8   :  { %v2620_v16 = vpop.f32.mrf.mxu0 }
 0xaf9   :  { %v2655_v51 = vadd.f32 %v2654_v8, %v2618_v14  ;;  %v2621_v5 = vadd.f32 %v3068_v34, %v2620_v16 }
 0xafa   :  { %v3532_v35 = vpop.f32.mrf.mxu0 }
 0xafb   :  { %v2656_v43 = vadd.f32 %v2655_v51, %v2621_v5  ;;  %v2642_v20 = vadd.f32 %v3532_v35, %v3068_v34 }
 0xafc   :  { %v2633_v22 = vpop.f32.mrf.mxu0 }
 0xafd   :  { %v2657_v58 = vadd.f32 %v2656_v43, %v2626_v7  ;;  %v2634_v57 = vadd.f32 %v3068_v34, %v2633_v22 }
 0xafe   :  { %v3533_v52 = vpop.f32.mrf.mxu0 }
 0xaff   :  { %v2658_v1 = vadd.f32 %v2657_v58, %v2629_v33  ;;  %v2645_v17 = vadd.f32 %v3533_v52, %v3068_v34 }
 0xb00   :  { %v2636_v15 = vpop.f32.mrf.mxu0 }
 0xb01   :  { %v2659_v11 = vadd.f32 %v2658_v1, %v2634_v57  ;;  %v2637_v19 = vadd.f32 %v3068_v34, %v2636_v15 }
 0xb03   :  { %v2660_v25 = vadd.f32 %v2659_v11, %v2637_v19 }
 0xb05   :  { %v2661_v27 = vadd.f32 %v2660_v25, %v2642_v20 }
 0xb07   :  { %v2662_v23 = vadd.f32 %v2661_v27, %v2645_v17 }
 0xb09   :  { %v2663_v18 = vrot.slane %v2662_v23, 4 }
 0xb0b   :  { %v2664_v3 = vadd.f32 %v2663_v18, %v2662_v23 }
 0xb0d   :  { %v2665_v61 = vrot.slane %v2664_v3, 2 }
 0xb0f   :  { %v2666_v38 = vadd.f32 %v2665_v61, %v2664_v3 }
 0xb11   :  { %v2667_v47 = vrot.slane %v2666_v38, 1 }
 0xb13   :  { %v2668_v53 = vadd.f32 %v2667_v47, %v2666_v38 }
 0xb15   :  { %v2669_v26 = vmul.f32 0.0078125, %v2668_v53 }
 0xb17   :  { %v2670_v31 = vsub.f32 %v2586_v12, %v2669_v26  ;;  %v2671_v9 = vsub.f32 %v2589_v49, %v2669_v26  ;;  %v2672_v30 = vsub.f32 %v2594_v32, %v2669_v26  ;;  %v2673_v13 = vsub.f32 %v2597_v56, %v2669_v26 }
 0xb18   :  { %v2674_v24 = vsub.f32 %v2602_v59, %v2669_v26  ;;  %v2675_v63 = vsub.f32 %v2605_v54, %v2669_v26  ;;  %v2676_v34 = vsub.f32 %v2610_v10, %v2669_v26  ;;  %v2677_v39 = vsub.f32 %v2613_v48, %v2669_v26 }
 0xb19   :  { %v2686_v46 = vmul.f32 %v2670_v31, %v2670_v31  ;;  %v2687_v28 = vmul.f32 %v2671_v9, %v2671_v9  ;;  %v2688_v62 = vmul.f32 %v2672_v30, %v2672_v30  ;;  %v2689_v42 = vmul.f32 %v2673_v13, %v2673_v13 }
 0xb1a   :  { %v2690_v41 = vmul.f32 %v2674_v24, %v2674_v24  ;;  %v2691_v21 = vmul.f32 %v2675_v63, %v2675_v63  ;;  %v2678_v44 = vsub.f32 %v2618_v14, %v2669_v26  ;;  %v2692_v2 = vmul.f32 %v2676_v34, %v2676_v34 }
 0xb1b   :  { %v2702_v40 = vadd.f32 %v2687_v28, %v2686_v46  ;;  %v2679_v49 = vsub.f32 %v2621_v5, %v2669_v26  ;;  %v2693_v32 = vmul.f32 %v2677_v39, %v2677_v39  ;;  %v2680_v4 = vsub.f32 %v2626_v7, %v2669_v26 }
 0xb1c   :  { %v2694_v56 = vmul.f32 %v2678_v44, %v2678_v44  ;;  %v2681_v36 = vsub.f32 %v2629_v33, %v2669_v26  ;;  %v2682_v6 = vsub.f32 %v2634_v57, %v2669_v26  ;;  %v2683_v37 = vsub.f32 %v2637_v19, %v2669_v26 }
 0xb1d   :  { %v2703_v55 = vadd.f32 %v2702_v40, %v2688_v62  ;;  %v2695_v45 = vmul.f32 %v2679_v49, %v2679_v49  ;;  %v2696_v0 = vmul.f32 %v2680_v4, %v2680_v4  ;;  %v2684_v16 = vsub.f32 %v2642_v20, %v2669_v26 }
 0xb1e   :  { %v2697_v8 = vmul.f32 %v2681_v36, %v2681_v36  ;;  %v2698_v51 = vmul.f32 %v2682_v6, %v2682_v6  ;;  %v2685_v35 = vsub.f32 %v2645_v17, %v2669_v26  ;;  %v2699_v43 = vmul.f32 %v2683_v37, %v2683_v37 }
 0xb1f   :  { %v2704_v29 = vadd.f32 %v2703_v55, %v2689_v42  ;;  %v2700_v22 = vmul.f32 %v2684_v16, %v2684_v16 }
 0xb20   :  { %v2701_v7 = vmul.f32 %v2685_v35, %v2685_v35 }
 0xb21   :  { %v2705_v50 = vadd.f32 %v2704_v29, %v2690_v41 }
 0xb23   :  { %v2706_v12 = vadd.f32 %v2705_v50, %v2691_v21 }
 0xb25   :  { %v2707_v60 = vadd.f32 %v2706_v12, %v2692_v2 }
 0xb27   :  { %v2708_v59 = vadd.f32 %v2707_v60, %v2693_v32 }
 0xb29   :  { %v2709_v54 = vadd.f32 %v2708_v59, %v2694_v56 }
 0xb2b   :  { %v2710_v10 = vadd.f32 %v2709_v54, %v2695_v45 }
 0xb2d   :  { %v2711_v48 = vadd.f32 %v2710_v10, %v2696_v0 }
 0xb2f   :  { %v2712_v14 = vadd.f32 %v2711_v48, %v2697_v8 }
 0xb31   :  { %v2713_v5 = vadd.f32 %v2712_v14, %v2698_v51 }
 0xb33   :  { %v2714_v58 = vadd.f32 %v2713_v5, %v2699_v43 }
 0xb35   :  { %v2715_v52 = vadd.f32 %v2714_v58, %v2700_v22 }
 0xb37   :  { %v2716_v1 = vadd.f32 %v2715_v52, %v2701_v7 }
 0xb39   :  { %v2717_v33 = vrot.slane %v2716_v1, 4 }
 0xb3b   :  { %v2718_v15 = vadd.f32 %v2717_v33, %v2716_v1 }
 0xb3d   :  { %v2719_v11 = vrot.slane %v2718_v15, 2 }
 0xb3f   :  { %v2720_v57 = vadd.f32 %v2719_v11, %v2718_v15 }
 0xb41   :  { %v2721_v25 = vrot.slane %v2720_v57, 1 }
 0xb43   :  { %v2722_v27 = vadd.f32 %v2721_v25, %v2720_v57 }
 0xb45   :  { %v2723_v19 = vmul.f32 0.0078125, %v2722_v27 }
 0xb47   :  { %v2724_v23 = vadd.f32 1e-05, %v2723_v19 }
 0xb49   :  { %3685 = vrsqrt.f32 %v2724_v23 }
 0xb56   :  { %v3686_v20 = vpop.eup %3685 }
 0xb57   :  { %v2726_v18 = vmul.f32 %v3686_v20, %v2670_v31  ;;  %v2727_v3 = vmul.f32 %v3686_v20, %v2671_v9  ;;  %v2728_v17 = vmul.f32 %v3686_v20, %v2672_v30  ;;  %v2729_v61 = vmul.f32 %v3686_v20, %v2673_v13 }
 0xb58   :  { %v2730_v38 = vmul.f32 %v3686_v20, %v2674_v24  ;;  %v2731_v47 = vmul.f32 %v3686_v20, %v2675_v63  ;;  %v2732_v41 = vmul.f32 %v3686_v20, %v2676_v34  ;;  %v2733_v29 = vmul.f32 %v3686_v20, %v2677_v39 }
 0xb59   :  { %v2742_v53 = vmax.f32 %v2726_v18, 0.0  ;;  %v2743_v26 = vmax.f32 %v2727_v3, 0.0  ;;  %v2744_v46 = vmax.f32 %v2728_v17, 0.0  ;;  %v2745_v28 = vmax.f32 %v2729_v61, 0.0 }
 0xb5a   :  { %v2746_v62 = vmax.f32 %v2730_v38, 0.0  ;;  %v2747_v40 = vmax.f32 %v2731_v47, 0.0  ;;  %v2734_v50 = vmul.f32 %v3686_v20, %v2678_v44  ;;  %v2735_v2 = vmul.f32 %v3686_v20, %v2679_v49 }
 0xb5b   :  { %v2758_v42 = vpack.c.bf16 %v2743_v26, %v2742_v53  ;;  %v2759_v55 = vpack.c.bf16 %v2745_v28, %v2744_v46  ;;  %v2748_v31 = vmax.f32 %v2732_v41, 0.0  ;;  %v2749_v9 = vmax.f32 %v2733_v29, 0.0 }
 0xb5c   :  { %v2760_v21 = vpack.c.bf16 %v2747_v40, %v2746_v62  ;;  %v2750_v30 = vmax.f32 %v2734_v50, 0.0  ;;  %v2751_v13 = vmax.f32 %v2735_v2, 0.0  ;;  %v2736_v63 = vmul.f32 %v3686_v20, %v2680_v4 }
 0xb5d   :  { %3550 = vmatprep.mubr.bf16.mxu1 %v2758_v42  ;;  %v2761_v24 = vpack.c.bf16 %v2749_v9, %v2748_v31  ;;  %v2737_v12 = vmul.f32 %v3686_v20, %v2681_v36  ;;  %v2739_v32 = vmul.f32 %v3686_v20, %v2683_v37  ;;  %v2738_v56 = vmul.f32 %v3686_v20, %v2682_v6 }
 0xb5e   :  { %3551 = vmatmul.mubr.bf16.vlgmr.msra.gmra.mxu1 %v2759_v55  ;;  %v2762_v60 = vpack.c.bf16 %v2751_v13, %v2750_v30  ;;  %v2752_v34 = vmax.f32 %v2736_v63, 0.0  ;;  %v2740_v49 = vmul.f32 %v3686_v20, %v2684_v16  ;;  %v2741_v54 = vmul.f32 %v3686_v20, %v2685_v35 }
 0xb5f   :  { %3554 = vmatprep.mubr.bf16.mxu1 %v2760_v21  ;;  %v2753_v39 = vmax.f32 %v2737_v12, 0.0  ;;  %v2755_v59 = vmax.f32 %v2739_v32, 0.0  ;;  %v2754_v45 = vmax.f32 %v2738_v56, 0.0 }
 0xb60   :  { %v2756_v10 = vmax.f32 %v2740_v49, 0.0  ;;  %v2757_v8 = vmax.f32 %v2741_v54, 0.0 }
 0xb61   :  { %v2763_v44 = vpack.c.bf16 %v2753_v39, %v2752_v34  ;;  %v2764_v0 = vpack.c.bf16 %v2755_v59, %v2754_v45 }
 0xb62   :  { %v2765_v48 = vpack.c.bf16 %v2757_v8, %v2756_v10 }
 0xb66   :  { %3555 = vmatmul.mubr.bf16.gmra.mxu1 %v2761_v24 }
 0xb67   :  { %3558 = vmatprep.mubr.bf16.mxu1 %v2762_v60 }
 0xb6e   :  { %3559 = vmatmul.mubr.bf16.gmra.mxu1 %v2763_v44 }
 0xb6f   :  { %3562 = vmatprep.mubr.bf16.mxu1 %v2764_v0 }
 0xb76   :  { %3563 = vmatmul.mubr.bf16.gmra.mxu1 %v2765_v48 }
 0xb77   :  { %3918 = shalt.err (!%p3915_p3)
}
 0xb78   :  { %s3977_s27 = smov 128   ;;  %s3978_s3 = smov 8   ;;  %v3077_v4 = vld [vmem:[%s4303_s20] ss:$0 sm:$0xff] }
 0xb79   :  { %2961 = dma.vmem_to_hbm [thread:$0]  %s2956_s2, 2048, %s4304_s21, [#allocation4], %s3977_s27, %s3977_s27, %s3978_s3  }
 0xb7a   :  { %s3979_s20 = smov [#allocation21]  }
 0xb7b   :  { %s2967_s21 = sshll.u32 %s3979_s20, 4  ;;  %s2968_s21 = int_to_ptr.vmem [resolvable:$true] %s2967_s21 }
 0xb7c   :  { %s3927_s4 = scalar_lea.vmem %s2968_s21, 2048  ;;  %p3932_p5 = scmp.lt.s32.totalorder %s2968_s21, %s2968_s21 }
 0xb7d   :  { %p3928_p4 = scmp.ne.s32.totalorder %s2968_s21, %s3927_s4  ;;  %p3933_p6 = scmp.lt.s32.totalorder %s3927_s4, %s3927_s4 }
 0xb7f   :  { %p3934_p7 = por %p3933_p6, %p3932_p5 }
 0xb81   :  { %p3935_p8 = pnand %p3934_p7, %p3928_p4 }
 0xc1e   :  { %v3552_v36 = vpop.f32.mrf.mxu1 }
 0xc1f   :  { %v2880_v6 = vadd.f32 %v3552_v36, %v3077_v4 }
 0xc20   :  { %v2871_v37 = vpop.f32.mrf.mxu1 }
 0xc21   :  { %2936 = vst [vmem:[#allocation21 + $0x10] sm:$0xff] %v2880_v6  ;;  %v2872_v16 = vadd.f32 %v3077_v4, %v2871_v37 }
 0xc22   :  { %v3553_v51 = vpop.f32.mrf.mxu1 }
 0xc23   :  { %2934 = vst [vmem:[#allocation21] sm:$0xff] %v2872_v16  ;;  %v2883_v14 = vadd.f32 %v3553_v51, %v3077_v4 }
 0xc24   :  { %v2874_v35 = vpop.f32.mrf.mxu1 }
 0xc25   :  { %2937 = vst [vmem:[#allocation21 + $0x18] sm:$0xff] %v2883_v14  ;;  %v2875_v43 = vadd.f32 %v3077_v4, %v2874_v35 }
 0xc26   :  { %v3556_v5 = vpop.f32.mrf.mxu1 }
 0xc27   :  { %2935 = vst [vmem:[#allocation21 + $0x8] sm:$0xff] %v2875_v43  ;;  %v2896_v22 = vadd.f32 %v3556_v5, %v3077_v4 }
 0xc28   :  { %v2887_v58 = vpop.f32.mrf.mxu1 }
 0xc29   :  { %2940 = vst [vmem:[#allocation21 + $0x30] sm:$0xff] %v2896_v22  ;;  %v2888_v7 = vadd.f32 %v3077_v4, %v2887_v58 }
 0xc2a   :  { %v3557_v52 = vpop.f32.mrf.mxu1 }
 0xc2b   :  { %2938 = vst [vmem:[#allocation21 + $0x20] sm:$0xff] %v2888_v7  ;;  %v2899_v1 = vadd.f32 %v3557_v52, %v3077_v4 }
 0xc2c   :  { %v2890_v33 = vpop.f32.mrf.mxu1 }
 0xc2d   :  { %2941 = vst [vmem:[#allocation21 + $0x38] sm:$0xff] %v2899_v1  ;;  %v2891_v15 = vadd.f32 %v3077_v4, %v2890_v33 }
 0xc2e   :  { %v3560_v11 = vpop.f32.mrf.mxu1 }
 0xc2f   :  { %2939 = vst [vmem:[#allocation21 + $0x28] sm:$0xff] %v2891_v15  ;;  %v2912_v57 = vadd.f32 %v3560_v11, %v3077_v4 }
 0xc30   :  { %v2903_v25 = vpop.f32.mrf.mxu1 }
 0xc31   :  { %2944 = vst [vmem:[#allocation21 + $0x50] sm:$0xff] %v2912_v57  ;;  %v2904_v27 = vadd.f32 %v3077_v4, %v2903_v25 }
 0xc32   :  { %v3561_v19 = vpop.f32.mrf.mxu1 }
 0xc33   :  { %2942 = vst [vmem:[#allocation21 + $0x40] sm:$0xff] %v2904_v27  ;;  %v2915_v23 = vadd.f32 %v3561_v19, %v3077_v4 }
 0xc34   :  { %v2906_v20 = vpop.f32.mrf.mxu1 }
 0xc35   :  { %2945 = vst [vmem:[#allocation21 + $0x58] sm:$0xff] %v2915_v23  ;;  %v2907_v18 = vadd.f32 %v3077_v4, %v2906_v20 }
 0xc36   :  { %v3564_v3 = vpop.f32.mrf.mxu1 }
 0xc37   :  { %2943 = vst [vmem:[#allocation21 + $0x48] sm:$0xff] %v2907_v18  ;;  %v2928_v17 = vadd.f32 %v3564_v3, %v3077_v4 }
 0xc38   :  { %v2919_v61 = vpop.f32.mrf.mxu1 }
 0xc39   :  { %2948 = vst [vmem:[#allocation21 + $0x70] sm:$0xff] %v2928_v17  ;;  %v2920_v38 = vadd.f32 %v3077_v4, %v2919_v61 }
 0xc3a   :  { %v3565_v47 = vpop.f32.mrf.mxu1 }
 0xc3b   :  { %2946 = vst [vmem:[#allocation21 + $0x60] sm:$0xff] %v2920_v38  ;;  %v2931_v53 = vadd.f32 %v3565_v47, %v3077_v4 }
 0xc3c   :  { %v2922_v26 = vpop.f32.mrf.mxu1 }
 0xc3d   :  { %2949 = vst [vmem:[#allocation21 + $0x78] sm:$0xff] %v2931_v53  ;;  %v2923_v46 = vadd.f32 %v3077_v4, %v2922_v26 }
 0xc3f   :  { %2947 = vst [vmem:[#allocation21 + $0x68] sm:$0xff] %v2923_v46 }
 0xc40   :  { %3938 = shalt.err (!%p3935_p8)
}
 0xc41   :  { %2973 = dma.vmem_to_hbm [thread:$0]  %s2968_s21, 2048, %s4305_s22, [#allocation22], %s3977_s27, %s3977_s27, %s3978_s3  }
 0xc42   :  { %3959 = dma.done.wait [#allocation4], 2048  }
 0xc43   :  { %3960 = vsyncadd [#allocation4], 4294965248 }
 0xc44   :  { %3961 = dma.done.wait [#allocation22], 2048  }
 0xc45   :  { %3962 = vsyncadd [#allocation22], 4294965248 }
 0xc46   :  { %2980 = vsyncpa [#allocation3], 1 }
 0xc47   :  { %2981 = vsyncpa [#allocation6], 1 }
 0xc48   :  { %2982 = vsyncpa [#allocation9], 1 }
 0xc49   :  { %2983 = vsyncpa [#allocation12], 1 }
 0xc4a   :  { %2984 = vsyncpa [#allocation15], 1 }
 0xc4b   :  { %2985 = vsyncpa [#allocation18], 1 }
 0xc4c   :  { %2986 = vsyncpa [#allocation4], 1 }
 0xc4d   :  { %2987 = vsyncpa [#allocation22], 1 }

</bundles_post_ra>
